<compile_context>
chip_gen: v7x
topology: tpu7x:2x2x1
jax: 0.10.0
libtpu: 0.0.40
codegen_flags: <defaults>
</compile_context>

<pallas_src>
import jax
import jax.numpy as jnp
from jax.experimental import pallas as pl
from jax.experimental.pallas import tpu as pltpu
import numpy as np


# ----------------------------------------------------------------------------
# Kernel
# ----------------------------------------------------------------------------
def _double_conv_kernel(x_ref, w1_ref, s1_ref, t1_ref, w2_ref, s2_ref, t2_ref,
                        o_ref, xpad1, xpad2):
    """One batch element: (conv3x3 + scale/shift + ReLU) x 2, fused.

    x_ref:  (1, H, W, Cin)        input tile, compute dtype (VMEM)
    w1_ref: (9, CpIn, CpMid)      conv1 weights, tap-major, channel-padded
    s1_ref, t1_ref: (1, CpMid)    folded BN1 scale / shift (f32)
    w2_ref: (9, CpMid, CpOut)     conv2 weights
    s2_ref, t2_ref: (1, CpOut)    folded BN2 scale / shift (f32)
    o_ref:  (1, Cout, H*W)        f32 output (NCHW order, lane-dense last dim)
    xpad1:  (H+2, W+2, CpIn)      VMEM scratch: padded conv1 input
    xpad2:  (H+2, W+2, CpMid)     VMEM scratch: padded conv2 input (intermediate)
    """
    _, H, W, cin = x_ref.shape
    cp_in = xpad1.shape[-1]
    cp_mid = xpad2.shape[-1]
    cout = o_ref.shape[1]
    cdtype = xpad1.dtype

    # Zero the padded scratches (halo border + channel tail). Cheap VMEM-only
    # work, and keeps every grid step independent so the batch axis can be
    # 'parallel' (v7x megacore sharding).
    xpad1[...] = jnp.zeros_like(xpad1)
    xpad2[...] = jnp.zeros_like(xpad2)

    # Stage-1 input: place the (H, W, Cin) tile inside the zero halo and the
    # zero-padded 128-lane channel slab (all in VMEM, no HBM pad copy).
    xpad1[1:H + 1, 1:W + 1, 0:cin] = x_ref[0].astype(cdtype)

    def conv3x3(xpad, w_ref, cp, cp_o):
        acc = jnp.zeros((H * W, cp_o), jnp.float32)
        for ky in range(3):
            for kx in range(3):
                patch = xpad[ky:ky + H, kx:kx + W, :].reshape(H * W, cp)
                acc = acc + jnp.dot(patch, w_ref[ky * 3 + kx],
                                    preferred_element_type=jnp.float32)
        return acc

    # conv1 + BN1 + ReLU (f32 epilogue; padded channels have scale=shift=0)
    a1 = conv3x3(xpad1, w1_ref, cp_in, cp_mid)                 # (H*W, CpMid) f32
    h1 = jnp.maximum(a1 * s1_ref[...] + t1_ref[...], 0.0)

    # Intermediate stays in VMEM: write it (cast to compute dtype) into the
    # second padded scratch -- no HBM round trip between the two convs.
    xpad2[1:H + 1, 1:W + 1, :] = h1.reshape(H, W, cp_mid).astype(cdtype)

    # conv2 + BN2 + ReLU
    a2 = conv3x3(xpad2, w2_ref, cp_mid, w2_ref.shape[-1])      # (H*W, CpOut) f32
    h2 = jnp.maximum(a2 * s2_ref[...] + t2_ref[...], 0.0)

    # Lane-dense NCHW store: (Cout, H*W); last dim is a multiple of 128 so the
    # store is unmasked, and no output transpose is needed in the wrapper.
    o_ref[0] = h2.T[0:cout, :].astype(o_ref.dtype)


# ----------------------------------------------------------------------------
# Wrapper
# ----------------------------------------------------------------------------
def _round_up(v, m):
    return (v + m - 1) // m * m


def _fold_bn(gamma, beta, mean, var, conv_bias, eps):
    scale = gamma / jnp.sqrt(var + eps)
    shift = beta + (conv_bias - mean) * scale
    return scale, shift


def _pad_weight(w_hwio, cp_in, cp_out, dtype):
    kh, kw, ci, co = w_hwio.shape
    w = jnp.pad(w_hwio, ((0, 0), (0, 0), (0, cp_in - ci), (0, cp_out - co)))
    return w.reshape(kh * kw, cp_in, cp_out).astype(dtype)


def _pad_vec(v, cp):
    return jnp.pad(v, (0, cp - v.shape[0])).reshape(1, cp).astype(jnp.float32)


def double_conv(x_nchw, params, *, eps=1e-5, compute_dtype=jnp.bfloat16):
    """DoubleConv forward: (conv3x3(pad=1) -> BN(eval) -> ReLU) * 2.

    Input/output in NCHW (PyTorch convention). compute_dtype controls the MXU
    operand dtype (bf16 recommended on v6e/v7x); accumulation is always f32.
    """
    N, cin, H, W = x_nchw.shape
    cmid = params["w1"].shape[-1]
    cout = params["w2"].shape[-1]
    cp_in = _round_up(cin, 128)
    cp_mid = _round_up(cmid, 128)
    cp_out = _round_up(cout, 128)

    # Fold BN (+ conv bias) into per-channel scale/shift; pad channels so the
    # in-kernel matmuls and epilogues are 128-lane dense (pad entries are 0).
    s1, t1 = _fold_bn(params["bn1_gamma"], params["bn1_beta"],
                      params["bn1_mean"], params["bn1_var"], params["b1"], eps)
    s2, t2 = _fold_bn(params["bn2_gamma"], params["bn2_beta"],
                      params["bn2_mean"], params["bn2_var"], params["b2"], eps)
    w1 = _pad_weight(params["w1"], cp_in, cp_mid, compute_dtype)
    w2 = _pad_weight(params["w2"], cp_mid, cp_out, compute_dtype)
    s1p, t1p = _pad_vec(s1, cp_mid), _pad_vec(t1, cp_mid)
    s2p, t2p = _pad_vec(s2, cp_out), _pad_vec(t2, cp_out)

    # NCHW -> NHWC once (channels on lanes inside the kernel); cast fuses into
    # the same relayout.
    # TODO(synk): keep the surrounding model's activations NHWC end-to-end to
    # drop this transpose from the hot path entirely.
    x_nhwc = jnp.transpose(x_nchw, (0, 2, 3, 1)).astype(compute_dtype)

    flops = 2 * 9 * N * H * W * (cin * cmid + cmid * cout)
    bytes_accessed = (x_nhwc.size * x_nhwc.dtype.itemsize
                      + w1.size * w1.dtype.itemsize
                      + w2.size * w2.dtype.itemsize
                      + N * cout * H * W * 4)

    out_flat = pl.pallas_call(
        _double_conv_kernel,
        out_shape=jax.ShapeDtypeStruct((N, cout, H * W), jnp.float32),
        grid=(N,),
        in_specs=[
            pl.BlockSpec((1, H, W, cin), lambda n: (n, 0, 0, 0)),
            pl.BlockSpec((9, cp_in, cp_mid), lambda n: (0, 0, 0)),
            pl.BlockSpec((1, cp_mid), lambda n: (0, 0)),
            pl.BlockSpec((1, cp_mid), lambda n: (0, 0)),
            pl.BlockSpec((9, cp_mid, cp_out), lambda n: (0, 0, 0)),
            pl.BlockSpec((1, cp_out), lambda n: (0, 0)),
            pl.BlockSpec((1, cp_out), lambda n: (0, 0)),
        ],
        out_specs=pl.BlockSpec((1, cout, H * W), lambda n: (n, 0, 0)),
        scratch_shapes=[
            pltpu.VMEM((H + 2, W + 2, cp_in), compute_dtype),
            pltpu.VMEM((H + 2, W + 2, cp_mid), compute_dtype),
        ],
        compiler_params=pltpu.CompilerParams(
            dimension_semantics=("parallel",),
            vmem_limit_bytes=32 * 1024 * 1024,
        ),
        cost_estimate=pl.CostEstimate(
            flops=flops, transcendentals=0, bytes_accessed=bytes_accessed),
    )(x_nhwc, w1, s1p, t1p, w2, s2p, t2p)

    # (N, Cout, H*W) is already NCHW memory order -> metadata-only reshape.
    return out_flat.reshape(N, cout, H, W)


# ----------------------------------------------------------------------------
# Pure-JAX reference (lax conv), quantizing MXU operands like the kernel does.
# ----------------------------------------------------------------------------
def _reference_double_conv(x_nchw, params, eps=1e-5, compute_dtype=jnp.float32):
    x = jnp.transpose(x_nchw, (0, 2, 3, 1))

    def block(x, w, cb, g, b, m, v):
        y = jax.lax.conv_general_dilated(
            x.astype(compute_dtype), w.astype(compute_dtype),
            window_strides=(1, 1), padding="SAME",
            dimension_numbers=("NHWC", "HWIO", "NHWC"),
            preferred_element_type=jnp.float32,
        )
        scale = g / jnp.sqrt(v + eps)
        shift = b + (cb - m) * scale
        return jnp.maximum(y * scale + shift, 0.0)

    h = block(x, params["w1"], params["b1"], params["bn1_gamma"],
              params["bn1_beta"], params["bn1_mean"], params["bn1_var"])
    h = block(h, params["w2"], params["b2"], params["bn2_gamma"],
              params["bn2_beta"], params["bn2_mean"], params["bn2_var"])
    return jnp.transpose(h, (0, 3, 1, 2))


def init_params(key, in_ch, mid_ch, out_ch):
    ks = jax.random.split(key, 8)
    return {
        # Conv2d weights in HWIO layout: (3, 3, Cin, Cout)
        "w1": jax.random.normal(ks[0], (3, 3, in_ch, mid_ch), jnp.float32) * 0.1,
        "b1": jax.random.normal(ks[1], (mid_ch,), jnp.float32) * 0.1,
        "w2": jax.random.normal(ks[2], (3, 3, mid_ch, out_ch), jnp.float32) * 0.1,
        "b2": jax.random.normal(ks[3], (out_ch,), jnp.float32) * 0.1,
        # BatchNorm2d params / running stats (inference mode)
        "bn1_gamma": 1.0 + 0.1 * jax.random.normal(ks[4], (mid_ch,), jnp.float32),
        "bn1_beta": 0.1 * jax.random.normal(ks[5], (mid_ch,), jnp.float32),
        "bn1_mean": jnp.zeros((mid_ch,), jnp.float32),
        "bn1_var": jnp.ones((mid_ch,), jnp.float32),
        "bn2_gamma": 1.0 + 0.1 * jax.random.normal(ks[6], (out_ch,), jnp.float32),
        "bn2_beta": 0.1 * jax.random.normal(ks[7], (out_ch,), jnp.float32),
        "bn2_mean": jnp.zeros((out_ch,), jnp.float32),
        "bn2_var": jnp.ones((out_ch,), jnp.float32),
    }


if __name__ == "__main__":
    N, C_IN, H, W = 2, 4, 16, 16
    C_MID = C_OUT = 8

    key = jax.random.PRNGKey(0)
    kx, kp = jax.random.split(key)
    x = jax.random.normal(kx, (N, C_IN, H, W), jnp.float32)
    params = init_params(kp, C_IN, C_MID, C_OUT)

    # Exact-precision check: f32 MXU operands vs f32 lax-conv reference.
    out_f32 = jax.block_until_ready(
        double_conv(x, params, compute_dtype=jnp.float32))
    ref_f32 = jax.block_until_ready(
        _reference_double_conv(x, params, compute_dtype=jnp.float32))
    assert out_f32.shape == (N, C_OUT, H, W), out_f32.shape
    np.testing.assert_allclose(np.asarray(out_f32), np.asarray(ref_f32),
                               rtol=1e-4, atol=1e-4)

    # Fast path: bf16 MXU operands (f32 accumulation) vs a reference that
    # quantizes its operands identically.
    out_bf16 = jax.block_until_ready(
        double_conv(x, params, compute_dtype=jnp.bfloat16))
    ref_bf16 = jax.block_until_ready(
        _reference_double_conv(x, params, compute_dtype=jnp.bfloat16))
    np.testing.assert_allclose(np.asarray(out_bf16), np.asarray(ref_bf16),
                               rtol=2e-2, atol=2e-2)

    print("KERNEL_OK")
</pallas_src>

<mosaic_0001>
module attributes {stable_mosaic.version = 11 : i64} {
  func.func @_double_conv_kernel(%arg0: i32, %arg1: memref<1x16x16x4xf32, #tpu.memory_space<vmem>>, %arg2: memref<9x128x128xf32, #tpu.memory_space<vmem>>, %arg3: memref<1x128xf32, #tpu.memory_space<vmem>>, %arg4: memref<1x128xf32, #tpu.memory_space<vmem>>, %arg5: memref<9x128x128xf32, #tpu.memory_space<vmem>>, %arg6: memref<1x128xf32, #tpu.memory_space<vmem>>, %arg7: memref<1x128xf32, #tpu.memory_space<vmem>>, %arg8: memref<1x8x256xf32, #tpu.memory_space<vmem>>, %arg9: memref<18x18x128xf32, #tpu.memory_space<vmem>>, %arg10: memref<18x18x128xf32, #tpu.memory_space<vmem>>) attributes {dimension_semantics = [#tpu.dimension_semantics<parallel>], iteration_bounds = array<i64: 2>, scalar_prefetch = 0 : i64, scratch_operands = 2 : i64, tpu.core_type = #tpu.core_type<tc>, window_params = [{transform_indices = @transform_0, window_bounds = array<i64: 1, 16, 16, 4>}, {pipeline_mode = #tpu.pipeline_mode<synchronous>, transform_indices = @transform_1, window_bounds = array<i64: 9, 128, 128>}, {pipeline_mode = #tpu.pipeline_mode<synchronous>, transform_indices = @transform_2, window_bounds = array<i64: 1, 128>}, {pipeline_mode = #tpu.pipeline_mode<synchronous>, transform_indices = @transform_3, window_bounds = array<i64: 1, 128>}, {pipeline_mode = #tpu.pipeline_mode<synchronous>, transform_indices = @transform_4, window_bounds = array<i64: 9, 128, 128>}, {pipeline_mode = #tpu.pipeline_mode<synchronous>, transform_indices = @transform_5, window_bounds = array<i64: 1, 128>}, {pipeline_mode = #tpu.pipeline_mode<synchronous>, transform_indices = @transform_6, window_bounds = array<i64: 1, 128>}, {transform_indices = @transform_7, window_bounds = array<i64: 1, 8, 256>}]} {
    %cst = arith.constant 0.000000e+00 : f32
    %0 = vector.broadcast %cst : f32 to vector<18x18x128xf32>
    %c0 = arith.constant 0 : index
    %c0_0 = arith.constant 0 : index
    %c0_1 = arith.constant 0 : index
    %1 = vector.load %arg9[%c0, %c0_0, %c0_1] : memref<18x18x128xf32, #tpu.memory_space<vmem>>, vector<18x18x128xf32>
    tpu.vector_store %arg9[%c0, %c0_0, %c0_1], %0 {strides = array<i32>} : memref<18x18x128xf32, #tpu.memory_space<vmem>>, vector<18x18x128xf32>,
    %cst_2 = arith.constant 0.000000e+00 : f32
    %2 = vector.broadcast %cst_2 : f32 to vector<18x18x128xf32>
    %c0_3 = arith.constant 0 : index
    %c0_4 = arith.constant 0 : index
    %c0_5 = arith.constant 0 : index
    %3 = vector.load %arg10[%c0_3, %c0_4, %c0_5] : memref<18x18x128xf32, #tpu.memory_space<vmem>>, vector<18x18x128xf32>
    tpu.vector_store %arg10[%c0_3, %c0_4, %c0_5], %2 {strides = array<i32>} : memref<18x18x128xf32, #tpu.memory_space<vmem>>, vector<18x18x128xf32>,
    %c0_6 = arith.constant 0 : index
    %c0_7 = arith.constant 0 : index
    %c0_8 = arith.constant 0 : index
    %c0_9 = arith.constant 0 : index
    %4 = vector.load %arg1[%c0_6, %c0_7, %c0_8, %c0_9] : memref<1x16x16x4xf32, #tpu.memory_space<vmem>>, vector<1x16x16x4xf32>
    %5 = vector.shape_cast %4 : vector<1x16x16x4xf32> to vector<16x16x4xf32>
    %c1 = arith.constant 1 : index
    %c1_10 = arith.constant 1 : index
    %c0_11 = arith.constant 0 : index
    %6 = vector.load %arg9[%c1, %c1_10, %c0_11] : memref<18x18x128xf32, #tpu.memory_space<vmem>>, vector<16x16x4xf32>
    tpu.vector_store %arg9[%c1, %c1_10, %c0_11], %5 {strides = array<i32>} : memref<18x18x128xf32, #tpu.memory_space<vmem>>, vector<16x16x4xf32>,
    %cst_12 = arith.constant 0.000000e+00 : f32
    %7 = vector.broadcast %cst_12 : f32 to vector<256x128xf32>
    %c0_13 = arith.constant 0 : index
    %c0_14 = arith.constant 0 : index
    %c0_15 = arith.constant 0 : index
    %8 = vector.load %arg9[%c0_13, %c0_14, %c0_15] : memref<18x18x128xf32, #tpu.memory_space<vmem>>, vector<16x16x128xf32>
    %9 = vector.shape_cast %8 : vector<16x16x128xf32> to vector<256x128xf32>
    %c0_16 = arith.constant 0 : index
    %c0_17 = arith.constant 0 : index
    %c0_18 = arith.constant 0 : index
    %10 = vector.load %arg2[%c0_16, %c0_17, %c0_18] : memref<9x128x128xf32, #tpu.memory_space<vmem>>, vector<1x128x128xf32>
    %11 = vector.shape_cast %10 : vector<1x128x128xf32> to vector<128x128xf32>
    %cst_19 = arith.constant dense<0.000000e+00> : vector<256x128xf32>
    %12 = tpu.matmul %9, %11, %cst_19 {dimension_numbers = #tpu.dot_dimension_numbers<[1], [0], [0], [1], [0, 0, 1, 1], [], []>} : vector<256x128xf32>, vector<128x128xf32>, vector<256x128xf32> -> vector<256x128xf32>
    %13 = arith.addf %7, %12 : vector<256x128xf32>
    %c0_20 = arith.constant 0 : index
    %c1_21 = arith.constant 1 : index
    %c0_22 = arith.constant 0 : index
    %14 = vector.load %arg9[%c0_20, %c1_21, %c0_22] : memref<18x18x128xf32, #tpu.memory_space<vmem>>, vector<16x16x128xf32>
    %15 = vector.shape_cast %14 : vector<16x16x128xf32> to vector<256x128xf32>
    %c1_23 = arith.constant 1 : index
    %c0_24 = arith.constant 0 : index
    %c0_25 = arith.constant 0 : index
    %16 = vector.load %arg2[%c1_23, %c0_24, %c0_25] : memref<9x128x128xf32, #tpu.memory_space<vmem>>, vector<1x128x128xf32>
    %17 = vector.shape_cast %16 : vector<1x128x128xf32> to vector<128x128xf32>
    %cst_26 = arith.constant dense<0.000000e+00> : vector<256x128xf32>
    %18 = tpu.matmul %15, %17, %cst_26 {dimension_numbers = #tpu.dot_dimension_numbers<[1], [0], [0], [1], [0, 0, 1, 1], [], []>} : vector<256x128xf32>, vector<128x128xf32>, vector<256x128xf32> -> vector<256x128xf32>
    %19 = arith.addf %13, %18 : vector<256x128xf32>
    %c0_27 = arith.constant 0 : index
    %c2 = arith.constant 2 : index
    %c0_28 = arith.constant 0 : index
    %20 = vector.load %arg9[%c0_27, %c2, %c0_28] : memref<18x18x128xf32, #tpu.memory_space<vmem>>, vector<16x16x128xf32>
    %21 = vector.shape_cast %20 : vector<16x16x128xf32> to vector<256x128xf32>
    %c2_29 = arith.constant 2 : index
    %c0_30 = arith.constant 0 : index
    %c0_31 = arith.constant 0 : index
    %22 = vector.load %arg2[%c2_29, %c0_30, %c0_31] : memref<9x128x128xf32, #tpu.memory_space<vmem>>, vector<1x128x128xf32>
    %23 = vector.shape_cast %22 : vector<1x128x128xf32> to vector<128x128xf32>
    %cst_32 = arith.constant dense<0.000000e+00> : vector<256x128xf32>
    %24 = tpu.matmul %21, %23, %cst_32 {dimension_numbers = #tpu.dot_dimension_numbers<[1], [0], [0], [1], [0, 0, 1, 1], [], []>} : vector<256x128xf32>, vector<128x128xf32>, vector<256x128xf32> -> vector<256x128xf32>
    %25 = arith.addf %19, %24 : vector<256x128xf32>
    %c1_33 = arith.constant 1 : index
    %c0_34 = arith.constant 0 : index
    %c0_35 = arith.constant 0 : index
    %26 = vector.load %arg9[%c1_33, %c0_34, %c0_35] : memref<18x18x128xf32, #tpu.memory_space<vmem>>, vector<16x16x128xf32>
    %27 = vector.shape_cast %26 : vector<16x16x128xf32> to vector<256x128xf32>
    %c3 = arith.constant 3 : index
    %c0_36 = arith.constant 0 : index
    %c0_37 = arith.constant 0 : index
    %28 = vector.load %arg2[%c3, %c0_36, %c0_37] : memref<9x128x128xf32, #tpu.memory_space<vmem>>, vector<1x128x128xf32>
    %29 = vector.shape_cast %28 : vector<1x128x128xf32> to vector<128x128xf32>
    %cst_38 = arith.constant dense<0.000000e+00> : vector<256x128xf32>
    %30 = tpu.matmul %27, %29, %cst_38 {dimension_numbers = #tpu.dot_dimension_numbers<[1], [0], [0], [1], [0, 0, 1, 1], [], []>} : vector<256x128xf32>, vector<128x128xf32>, vector<256x128xf32> -> vector<256x128xf32>
    %31 = arith.addf %25, %30 : vector<256x128xf32>
    %c1_39 = arith.constant 1 : index
    %c1_40 = arith.constant 1 : index
    %c0_41 = arith.constant 0 : index
    %32 = vector.load %arg9[%c1_39, %c1_40, %c0_41] : memref<18x18x128xf32, #tpu.memory_space<vmem>>, vector<16x16x128xf32>
    %33 = vector.shape_cast %32 : vector<16x16x128xf32> to vector<256x128xf32>
    %c4 = arith.constant 4 : index
    %c0_42 = arith.constant 0 : index
    %c0_43 = arith.constant 0 : index
    %34 = vector.load %arg2[%c4, %c0_42, %c0_43] : memref<9x128x128xf32, #tpu.memory_space<vmem>>, vector<1x128x128xf32>
    %35 = vector.shape_cast %34 : vector<1x128x128xf32> to vector<128x128xf32>
    %cst_44 = arith.constant dense<0.000000e+00> : vector<256x128xf32>
    %36 = tpu.matmul %33, %35, %cst_44 {dimension_numbers = #tpu.dot_dimension_numbers<[1], [0], [0], [1], [0, 0, 1, 1], [], []>} : vector<256x128xf32>, vector<128x128xf32>, vector<256x128xf32> -> vector<256x128xf32>
    %37 = arith.addf %31, %36 : vector<256x128xf32>
    %c1_45 = arith.constant 1 : index
    %c2_46 = arith.constant 2 : index
    %c0_47 = arith.constant 0 : index
    %38 = vector.load %arg9[%c1_45, %c2_46, %c0_47] : memref<18x18x128xf32, #tpu.memory_space<vmem>>, vector<16x16x128xf32>
    %39 = vector.shape_cast %38 : vector<16x16x128xf32> to vector<256x128xf32>
    %c5 = arith.constant 5 : index
    %c0_48 = arith.constant 0 : index
    %c0_49 = arith.constant 0 : index
    %40 = vector.load %arg2[%c5, %c0_48, %c0_49] : memref<9x128x128xf32, #tpu.memory_space<vmem>>, vector<1x128x128xf32>
    %41 = vector.shape_cast %40 : vector<1x128x128xf32> to vector<128x128xf32>
    %cst_50 = arith.constant dense<0.000000e+00> : vector<256x128xf32>
    %42 = tpu.matmul %39, %41, %cst_50 {dimension_numbers = #tpu.dot_dimension_numbers<[1], [0], [0], [1], [0, 0, 1, 1], [], []>} : vector<256x128xf32>, vector<128x128xf32>, vector<256x128xf32> -> vector<256x128xf32>
    %43 = arith.addf %37, %42 : vector<256x128xf32>
    %c2_51 = arith.constant 2 : index
    %c0_52 = arith.constant 0 : index
    %c0_53 = arith.constant 0 : index
    %44 = vector.load %arg9[%c2_51, %c0_52, %c0_53] : memref<18x18x128xf32, #tpu.memory_space<vmem>>, vector<16x16x128xf32>
    %45 = vector.shape_cast %44 : vector<16x16x128xf32> to vector<256x128xf32>
    %c6 = arith.constant 6 : index
    %c0_54 = arith.constant 0 : index
    %c0_55 = arith.constant 0 : index
    %46 = vector.load %arg2[%c6, %c0_54, %c0_55] : memref<9x128x128xf32, #tpu.memory_space<vmem>>, vector<1x128x128xf32>
    %47 = vector.shape_cast %46 : vector<1x128x128xf32> to vector<128x128xf32>
    %cst_56 = arith.constant dense<0.000000e+00> : vector<256x128xf32>
    %48 = tpu.matmul %45, %47, %cst_56 {dimension_numbers = #tpu.dot_dimension_numbers<[1], [0], [0], [1], [0, 0, 1, 1], [], []>} : vector<256x128xf32>, vector<128x128xf32>, vector<256x128xf32> -> vector<256x128xf32>
    %49 = arith.addf %43, %48 : vector<256x128xf32>
    %c2_57 = arith.constant 2 : index
    %c1_58 = arith.constant 1 : index
    %c0_59 = arith.constant 0 : index
    %50 = vector.load %arg9[%c2_57, %c1_58, %c0_59] : memref<18x18x128xf32, #tpu.memory_space<vmem>>, vector<16x16x128xf32>
    %51 = vector.shape_cast %50 : vector<16x16x128xf32> to vector<256x128xf32>
    %c7 = arith.constant 7 : index
    %c0_60 = arith.constant 0 : index
    %c0_61 = arith.constant 0 : index
    %52 = vector.load %arg2[%c7, %c0_60, %c0_61] : memref<9x128x128xf32, #tpu.memory_space<vmem>>, vector<1x128x128xf32>
    %53 = vector.shape_cast %52 : vector<1x128x128xf32> to vector<128x128xf32>
    %cst_62 = arith.constant dense<0.000000e+00> : vector<256x128xf32>
    %54 = tpu.matmul %51, %53, %cst_62 {dimension_numbers = #tpu.dot_dimension_numbers<[1], [0], [0], [1], [0, 0, 1, 1], [], []>} : vector<256x128xf32>, vector<128x128xf32>, vector<256x128xf32> -> vector<256x128xf32>
    %55 = arith.addf %49, %54 : vector<256x128xf32>
    %c2_63 = arith.constant 2 : index
    %c2_64 = arith.constant 2 : index
    %c0_65 = arith.constant 0 : index
    %56 = vector.load %arg9[%c2_63, %c2_64, %c0_65] : memref<18x18x128xf32, #tpu.memory_space<vmem>>, vector<16x16x128xf32>
    %57 = vector.shape_cast %56 : vector<16x16x128xf32> to vector<256x128xf32>
    %c8 = arith.constant 8 : index
    %c0_66 = arith.constant 0 : index
    %c0_67 = arith.constant 0 : index
    %58 = vector.load %arg2[%c8, %c0_66, %c0_67] : memref<9x128x128xf32, #tpu.memory_space<vmem>>, vector<1x128x128xf32>
    %59 = vector.shape_cast %58 : vector<1x128x128xf32> to vector<128x128xf32>
    %cst_68 = arith.constant dense<0.000000e+00> : vector<256x128xf32>
    %60 = tpu.matmul %57, %59, %cst_68 {dimension_numbers = #tpu.dot_dimension_numbers<[1], [0], [0], [1], [0, 0, 1, 1], [], []>} : vector<256x128xf32>, vector<128x128xf32>, vector<256x128xf32> -> vector<256x128xf32>
    %61 = arith.addf %55, %60 : vector<256x128xf32>
    %c0_69 = arith.constant 0 : index
    %c0_70 = arith.constant 0 : index
    %62 = vector.load %arg3[%c0_69, %c0_70] : memref<1x128xf32, #tpu.memory_space<vmem>>, vector<1x128xf32>
    %63 = vector.broadcast %62 : vector<1x128xf32> to vector<256x128xf32>
    %64 = arith.mulf %61, %63 : vector<256x128xf32>
    %c0_71 = arith.constant 0 : index
    %c0_72 = arith.constant 0 : index
    %65 = vector.load %arg4[%c0_71, %c0_72] : memref<1x128xf32, #tpu.memory_space<vmem>>, vector<1x128xf32>
    %66 = vector.broadcast %65 : vector<1x128xf32> to vector<256x128xf32>
    %67 = arith.addf %64, %66 : vector<256x128xf32>
    %cst_73 = arith.constant 0.000000e+00 : f32
    %68 = vector.broadcast %cst_73 : f32 to vector<256x128xf32>
    %69 = arith.maximumf %67, %68 : vector<256x128xf32>
    %70 = vector.shape_cast %69 : vector<256x128xf32> to vector<16x16x128xf32>
    %c1_74 = arith.constant 1 : index
    %c1_75 = arith.constant 1 : index
    %c0_76 = arith.constant 0 : index
    %71 = vector.load %arg10[%c1_74, %c1_75, %c0_76] : memref<18x18x128xf32, #tpu.memory_space<vmem>>, vector<16x16x128xf32>
    tpu.vector_store %arg10[%c1_74, %c1_75, %c0_76], %70 {strides = array<i32>} : memref<18x18x128xf32, #tpu.memory_space<vmem>>, vector<16x16x128xf32>,
    %cst_77 = arith.constant 0.000000e+00 : f32
    %72 = vector.broadcast %cst_77 : f32 to vector<256x128xf32>
    %c0_78 = arith.constant 0 : index
    %c0_79 = arith.constant 0 : index
    %c0_80 = arith.constant 0 : index
    %73 = vector.load %arg10[%c0_78, %c0_79, %c0_80] : memref<18x18x128xf32, #tpu.memory_space<vmem>>, vector<16x16x128xf32>
    %74 = vector.shape_cast %73 : vector<16x16x128xf32> to vector<256x128xf32>
    %c0_81 = arith.constant 0 : index
    %c0_82 = arith.constant 0 : index
    %c0_83 = arith.constant 0 : index
    %75 = vector.load %arg5[%c0_81, %c0_82, %c0_83] : memref<9x128x128xf32, #tpu.memory_space<vmem>>, vector<1x128x128xf32>
    %76 = vector.shape_cast %75 : vector<1x128x128xf32> to vector<128x128xf32>
    %cst_84 = arith.constant dense<0.000000e+00> : vector<256x128xf32>
    %77 = tpu.matmul %74, %76, %cst_84 {dimension_numbers = #tpu.dot_dimension_numbers<[1], [0], [0], [1], [0, 0, 1, 1], [], []>} : vector<256x128xf32>, vector<128x128xf32>, vector<256x128xf32> -> vector<256x128xf32>
    %78 = arith.addf %72, %77 : vector<256x128xf32>
    %c0_85 = arith.constant 0 : index
    %c1_86 = arith.constant 1 : index
    %c0_87 = arith.constant 0 : index
    %79 = vector.load %arg10[%c0_85, %c1_86, %c0_87] : memref<18x18x128xf32, #tpu.memory_space<vmem>>, vector<16x16x128xf32>
    %80 = vector.shape_cast %79 : vector<16x16x128xf32> to vector<256x128xf32>
    %c1_88 = arith.constant 1 : index
    %c0_89 = arith.constant 0 : index
    %c0_90 = arith.constant 0 : index
    %81 = vector.load %arg5[%c1_88, %c0_89, %c0_90] : memref<9x128x128xf32, #tpu.memory_space<vmem>>, vector<1x128x128xf32>
    %82 = vector.shape_cast %81 : vector<1x128x128xf32> to vector<128x128xf32>
    %cst_91 = arith.constant dense<0.000000e+00> : vector<256x128xf32>
    %83 = tpu.matmul %80, %82, %cst_91 {dimension_numbers = #tpu.dot_dimension_numbers<[1], [0], [0], [1], [0, 0, 1, 1], [], []>} : vector<256x128xf32>, vector<128x128xf32>, vector<256x128xf32> -> vector<256x128xf32>
    %84 = arith.addf %78, %83 : vector<256x128xf32>
    %c0_92 = arith.constant 0 : index
    %c2_93 = arith.constant 2 : index
    %c0_94 = arith.constant 0 : index
    %85 = vector.load %arg10[%c0_92, %c2_93, %c0_94] : memref<18x18x128xf32, #tpu.memory_space<vmem>>, vector<16x16x128xf32>
    %86 = vector.shape_cast %85 : vector<16x16x128xf32> to vector<256x128xf32>
    %c2_95 = arith.constant 2 : index
    %c0_96 = arith.constant 0 : index
    %c0_97 = arith.constant 0 : index
    %87 = vector.load %arg5[%c2_95, %c0_96, %c0_97] : memref<9x128x128xf32, #tpu.memory_space<vmem>>, vector<1x128x128xf32>
    %88 = vector.shape_cast %87 : vector<1x128x128xf32> to vector<128x128xf32>
    %cst_98 = arith.constant dense<0.000000e+00> : vector<256x128xf32>
    %89 = tpu.matmul %86, %88, %cst_98 {dimension_numbers = #tpu.dot_dimension_numbers<[1], [0], [0], [1], [0, 0, 1, 1], [], []>} : vector<256x128xf32>, vector<128x128xf32>, vector<256x128xf32> -> vector<256x128xf32>
    %90 = arith.addf %84, %89 : vector<256x128xf32>
    %c1_99 = arith.constant 1 : index
    %c0_100 = arith.constant 0 : index
    %c0_101 = arith.constant 0 : index
    %91 = vector.load %arg10[%c1_99, %c0_100, %c0_101] : memref<18x18x128xf32, #tpu.memory_space<vmem>>, vector<16x16x128xf32>
    %92 = vector.shape_cast %91 : vector<16x16x128xf32> to vector<256x128xf32>
    %c3_102 = arith.constant 3 : index
    %c0_103 = arith.constant 0 : index
    %c0_104 = arith.constant 0 : index
    %93 = vector.load %arg5[%c3_102, %c0_103, %c0_104] : memref<9x128x128xf32, #tpu.memory_space<vmem>>, vector<1x128x128xf32>
    %94 = vector.shape_cast %93 : vector<1x128x128xf32> to vector<128x128xf32>
    %cst_105 = arith.constant dense<0.000000e+00> : vector<256x128xf32>
    %95 = tpu.matmul %92, %94, %cst_105 {dimension_numbers = #tpu.dot_dimension_numbers<[1], [0], [0], [1], [0, 0, 1, 1], [], []>} : vector<256x128xf32>, vector<128x128xf32>, vector<256x128xf32> -> vector<256x128xf32>
    %96 = arith.addf %90, %95 : vector<256x128xf32>
    %c1_106 = arith.constant 1 : index
    %c1_107 = arith.constant 1 : index
    %c0_108 = arith.constant 0 : index
    %97 = vector.load %arg10[%c1_106, %c1_107, %c0_108] : memref<18x18x128xf32, #tpu.memory_space<vmem>>, vector<16x16x128xf32>
    %98 = vector.shape_cast %97 : vector<16x16x128xf32> to vector<256x128xf32>
    %c4_109 = arith.constant 4 : index
    %c0_110 = arith.constant 0 : index
    %c0_111 = arith.constant 0 : index
    %99 = vector.load %arg5[%c4_109, %c0_110, %c0_111] : memref<9x128x128xf32, #tpu.memory_space<vmem>>, vector<1x128x128xf32>
    %100 = vector.shape_cast %99 : vector<1x128x128xf32> to vector<128x128xf32>
    %cst_112 = arith.constant dense<0.000000e+00> : vector<256x128xf32>
    %101 = tpu.matmul %98, %100, %cst_112 {dimension_numbers = #tpu.dot_dimension_numbers<[1], [0], [0], [1], [0, 0, 1, 1], [], []>} : vector<256x128xf32>, vector<128x128xf32>, vector<256x128xf32> -> vector<256x128xf32>
    %102 = arith.addf %96, %101 : vector<256x128xf32>
    %c1_113 = arith.constant 1 : index
    %c2_114 = arith.constant 2 : index
    %c0_115 = arith.constant 0 : index
    %103 = vector.load %arg10[%c1_113, %c2_114, %c0_115] : memref<18x18x128xf32, #tpu.memory_space<vmem>>, vector<16x16x128xf32>
    %104 = vector.shape_cast %103 : vector<16x16x128xf32> to vector<256x128xf32>
    %c5_116 = arith.constant 5 : index
    %c0_117 = arith.constant 0 : index
    %c0_118 = arith.constant 0 : index
    %105 = vector.load %arg5[%c5_116, %c0_117, %c0_118] : memref<9x128x128xf32, #tpu.memory_space<vmem>>, vector<1x128x128xf32>
    %106 = vector.shape_cast %105 : vector<1x128x128xf32> to vector<128x128xf32>
    %cst_119 = arith.constant dense<0.000000e+00> : vector<256x128xf32>
    %107 = tpu.matmul %104, %106, %cst_119 {dimension_numbers = #tpu.dot_dimension_numbers<[1], [0], [0], [1], [0, 0, 1, 1], [], []>} : vector<256x128xf32>, vector<128x128xf32>, vector<256x128xf32> -> vector<256x128xf32>
    %108 = arith.addf %102, %107 : vector<256x128xf32>
    %c2_120 = arith.constant 2 : index
    %c0_121 = arith.constant 0 : index
    %c0_122 = arith.constant 0 : index
    %109 = vector.load %arg10[%c2_120, %c0_121, %c0_122] : memref<18x18x128xf32, #tpu.memory_space<vmem>>, vector<16x16x128xf32>
    %110 = vector.shape_cast %109 : vector<16x16x128xf32> to vector<256x128xf32>
    %c6_123 = arith.constant 6 : index
    %c0_124 = arith.constant 0 : index
    %c0_125 = arith.constant 0 : index
    %111 = vector.load %arg5[%c6_123, %c0_124, %c0_125] : memref<9x128x128xf32, #tpu.memory_space<vmem>>, vector<1x128x128xf32>
    %112 = vector.shape_cast %111 : vector<1x128x128xf32> to vector<128x128xf32>
    %cst_126 = arith.constant dense<0.000000e+00> : vector<256x128xf32>
    %113 = tpu.matmul %110, %112, %cst_126 {dimension_numbers = #tpu.dot_dimension_numbers<[1], [0], [0], [1], [0, 0, 1, 1], [], []>} : vector<256x128xf32>, vector<128x128xf32>, vector<256x128xf32> -> vector<256x128xf32>
    %114 = arith.addf %108, %113 : vector<256x128xf32>
    %c2_127 = arith.constant 2 : index
    %c1_128 = arith.constant 1 : index
    %c0_129 = arith.constant 0 : index
    %115 = vector.load %arg10[%c2_127, %c1_128, %c0_129] : memref<18x18x128xf32, #tpu.memory_space<vmem>>, vector<16x16x128xf32>
    %116 = vector.shape_cast %115 : vector<16x16x128xf32> to vector<256x128xf32>
    %c7_130 = arith.constant 7 : index
    %c0_131 = arith.constant 0 : index
    %c0_132 = arith.constant 0 : index
    %117 = vector.load %arg5[%c7_130, %c0_131, %c0_132] : memref<9x128x128xf32, #tpu.memory_space<vmem>>, vector<1x128x128xf32>
    %118 = vector.shape_cast %117 : vector<1x128x128xf32> to vector<128x128xf32>
    %cst_133 = arith.constant dense<0.000000e+00> : vector<256x128xf32>
    %119 = tpu.matmul %116, %118, %cst_133 {dimension_numbers = #tpu.dot_dimension_numbers<[1], [0], [0], [1], [0, 0, 1, 1], [], []>} : vector<256x128xf32>, vector<128x128xf32>, vector<256x128xf32> -> vector<256x128xf32>
    %120 = arith.addf %114, %119 : vector<256x128xf32>
    %c2_134 = arith.constant 2 : index
    %c2_135 = arith.constant 2 : index
    %c0_136 = arith.constant 0 : index
    %121 = vector.load %arg10[%c2_134, %c2_135, %c0_136] : memref<18x18x128xf32, #tpu.memory_space<vmem>>, vector<16x16x128xf32>
    %122 = vector.shape_cast %121 : vector<16x16x128xf32> to vector<256x128xf32>
    %c8_137 = arith.constant 8 : index
    %c0_138 = arith.constant 0 : index
    %c0_139 = arith.constant 0 : index
    %123 = vector.load %arg5[%c8_137, %c0_138, %c0_139] : memref<9x128x128xf32, #tpu.memory_space<vmem>>, vector<1x128x128xf32>
    %124 = vector.shape_cast %123 : vector<1x128x128xf32> to vector<128x128xf32>
    %cst_140 = arith.constant dense<0.000000e+00> : vector<256x128xf32>
    %125 = tpu.matmul %122, %124, %cst_140 {dimension_numbers = #tpu.dot_dimension_numbers<[1], [0], [0], [1], [0, 0, 1, 1], [], []>} : vector<256x128xf32>, vector<128x128xf32>, vector<256x128xf32> -> vector<256x128xf32>
    %126 = arith.addf %120, %125 : vector<256x128xf32>
    %c0_141 = arith.constant 0 : index
    %c0_142 = arith.constant 0 : index
    %127 = vector.load %arg6[%c0_141, %c0_142] : memref<1x128xf32, #tpu.memory_space<vmem>>, vector<1x128xf32>
    %128 = vector.broadcast %127 : vector<1x128xf32> to vector<256x128xf32>
    %129 = arith.mulf %126, %128 : vector<256x128xf32>
    %c0_143 = arith.constant 0 : index
    %c0_144 = arith.constant 0 : index
    %130 = vector.load %arg7[%c0_143, %c0_144] : memref<1x128xf32, #tpu.memory_space<vmem>>, vector<1x128xf32>
    %131 = vector.broadcast %130 : vector<1x128xf32> to vector<256x128xf32>
    %132 = arith.addf %129, %131 : vector<256x128xf32>
    %cst_145 = arith.constant 0.000000e+00 : f32
    %133 = vector.broadcast %cst_145 : f32 to vector<256x128xf32>
    %134 = arith.maximumf %132, %133 : vector<256x128xf32>
    %135 = tpu.transpose %134, [1, 0] : vector<256x128xf32> -> vector<128x256xf32>
    %136 = vector.extract_strided_slice %135 {offsets = [0, 0], sizes = [8, 256], strides = [1, 1]} : vector<128x256xf32> to vector<8x256xf32>
    %c0_146 = arith.constant 0 : index
    %c0_147 = arith.constant 0 : index
    %c0_148 = arith.constant 0 : index
    %137 = vector.load %arg8[%c0_146, %c0_147, %c0_148] : memref<1x8x256xf32, #tpu.memory_space<vmem>>, vector<1x8x256xf32>
    %138 = vector.shape_cast %137 : vector<1x8x256xf32> to vector<8x256xf32>
    %139 = vector.shape_cast %136 : vector<8x256xf32> to vector<1x8x256xf32>
    tpu.vector_store %arg8[%c0_146, %c0_147, %c0_148], %139 {strides = array<i32>} : memref<1x8x256xf32, #tpu.memory_space<vmem>>, vector<1x8x256xf32>,
    return
  }
  func.func @transform_0(%arg0: i32) -> (i32, i32, i32, i32) {
    %c0_i32 = arith.constant 0 : i32
    %c0_i32_0 = arith.constant 0 : i32
    %c0_i32_1 = arith.constant 0 : i32
    %c0_i32_2 = arith.constant 0 : i32
    return %arg0, %c0_i32, %c0_i32_0, %c0_i32_1 : i32, i32, i32, i32
  }
  func.func @transform_1(%arg0: i32) -> (i32, i32, i32) {
    %c0_i32 = arith.constant 0 : i32
    %c0_i32_0 = arith.constant 0 : i32
    %c0_i32_1 = arith.constant 0 : i32
    %c0_i32_2 = arith.constant 0 : i32
    return %c0_i32, %c0_i32_0, %c0_i32_1 : i32, i32, i32
  }
  func.func @transform_2(%arg0: i32) -> (i32, i32) {
    %c0_i32 = arith.constant 0 : i32
    %c0_i32_0 = arith.constant 0 : i32
    %c0_i32_1 = arith.constant 0 : i32
    return %c0_i32, %c0_i32_0 : i32, i32
  }
  func.func @transform_3(%arg0: i32) -> (i32, i32) {
    %c0_i32 = arith.constant 0 : i32
    %c0_i32_0 = arith.constant 0 : i32
    %c0_i32_1 = arith.constant 0 : i32
    return %c0_i32, %c0_i32_0 : i32, i32
  }
  func.func @transform_4(%arg0: i32) -> (i32, i32, i32) {
    %c0_i32 = arith.constant 0 : i32
    %c0_i32_0 = arith.constant 0 : i32
    %c0_i32_1 = arith.constant 0 : i32
    %c0_i32_2 = arith.constant 0 : i32
    return %c0_i32, %c0_i32_0, %c0_i32_1 : i32, i32, i32
  }
  func.func @transform_5(%arg0: i32) -> (i32, i32) {
    %c0_i32 = arith.constant 0 : i32
    %c0_i32_0 = arith.constant 0 : i32
    %c0_i32_1 = arith.constant 0 : i32
    return %c0_i32, %c0_i32_0 : i32, i32
  }
  func.func @transform_6(%arg0: i32) -> (i32, i32) {
    %c0_i32 = arith.constant 0 : i32
    %c0_i32_0 = arith.constant 0 : i32
    %c0_i32_1 = arith.constant 0 : i32
    return %c0_i32, %c0_i32_0 : i32, i32
  }
  func.func @transform_7(%arg0: i32) -> (i32, i32, i32) {
    %c0_i32 = arith.constant 0 : i32
    %c0_i32_0 = arith.constant 0 : i32
    %c0_i32_1 = arith.constant 0 : i32
    return %arg0, %c0_i32, %c0_i32_0 : i32, i32, i32
  }
}

</mosaic_0001>

<bundles_post_ra>
// kernel: tpu_custom_call.1
= control target key start
LH: loop header
LB: loop body
LE: loop exit
PB: predicated region body
PF: predicated region fallthrough
CT: control target
= control target key end

     0   :  { %12 = vsyncpa [#allocation5], 0  ;;  %s11276_s0 = inlined_call_operand.vmem [shape: f32[2,16,16,4], index: 0, kind: input, shape index: {}]   ;;  %s11277_s1 = inlined_call_operand.hbm [shape: f32[9,128,128], index: 1, kind: input, shape index: {}]   ;;  %s11278_s2 = inlined_call_operand.vmem [shape: f32[1,128], index: 2, kind: input, shape index: {}]   ;;  %s11279_s3 = inlined_call_operand.vmem [shape: f32[1,128], index: 3, kind: input, shape index: {}]   ;;  %s11280_s4 = inlined_call_operand.hbm [shape: f32[9,128,128], index: 4, kind: input, shape index: {}]   ;;  %s11281_s5 = inlined_call_operand.vmem [shape: f32[1,128], index: 5, kind: input, shape index: {}]   ;;  %s11282_s6 = inlined_call_operand.vmem [shape: f32[1,128], index: 6, kind: input, shape index: {}]   ;;  %s11283_s7 = inlined_call_operand.hbm [shape: f32[2,8,256], index: 7, kind: output, shape index: {}]  }
   0x1   :  { %13 = vsyncpa [#allocation8], 0 }
   0x2   :  { %14 = vsyncpa [#allocation6], 0 }
   0x3   :  { %16 = vsyncpa [#allocation6 + $0x1], 0  ;;  %s9929_s24 = smov 0   ;;  %s9931_s25 = smov 0  }
   0x4   :  { %s9933_s26 = smov 0   ;;  %s9935_s27 = smov 0  }
   0x5 LB: > { %s9950_s28 = sadd.s32 4294967295, %s9881_s27   ;;  %s6276_s29 = sadd.s32 4294967294, %s9881_s27   ;;  %s9881_s27 = sphi %s9935_s27, %s11517_s27   ;;  %s9877_s26 = sphi %s9933_s26, %s11516_s26   ;;  %s9873_s25 = sphi %s9931_s25, %s11515_s25   ;;  %s9869_s24 = sphi %s9929_s24, %s11514_s24  }
   0x6   : > { %s9954_s30 = sadd.s32 1, %s9881_s27   ;;  %s181_s8 = sadd.s32 1, %s9877_s26 }
   0x7   : > { %s178_s9 = ssub.s32 %s9881_s27, %s9954_s30  ;;  %p191_p0 = scmp.ne.s32.totalorder %s9877_s26, %s9873_s25 }
   0x8   : > { %p179_p1 = scmp.eq.s32.totalorder %s178_s9, 0  ;;  %p192_p2 = scmp.eq.s32.totalorder %s9950_s28, 1 }
   0x9   : > { %p197_p3 = scmp.ne.s32.totalorder %s9873_s25, %s9869_s24  ;;  %p198_p4 = scmp.eq.s32.totalorder %s6276_s29, 1 }
   0xa   : > { %s9965_s10 = scalar_select %p179_p1, %s9877_s26, %s181_s8  }
   0xb   : > { %p9967_p5 = por %p192_p2, %p191_p0  ;;  %p9971_p6 = por %p198_p4, %p197_p3 }
   0xc   : > { %11359 = sst [smem:[#allocation13_spill]] %s9965_s10  ;;  %p6277_p7 = scmp.ge.s32.totalorder %s9881_s27, 1 }
   0xd   : > { %s11360_s11 = scalar_select %p9967_p5, 1, 0 }
   0xe   : > { %s11361_s12 = scalar_select %p9971_p6, 1, 0 }
   0xf   : > { %p205_p8 = scmp.lt.s32.totalorder %s9881_s27, 3  ;;  %p11284_p9 = scmp.eq.s32.totalorder %s9950_s28, 0 }
  0x10   : > { %s9883_s14 = smov [#allocation4]   ;;  %s9884_s17 = smov [#allocation7]  }
  0x11   : > { %p9978_p10 = pnand %p6277_p7, %p205_p8  ;;  %s217_s15 = sshll.u32 %s9883_s14, 4  ;;  %s218_s15 = int_to_ptr.vmem [resolvable:$true] %s217_s15 }
  0x12   : > { %s236_s18 = sshll.u32 %s9884_s17, 4  ;;  %s9755_s21 = scalar_lea.hbm %s11277_s1, 18432  ;;  %s9990_s18 = int_to_ptr.vmem [resolvable:$true] %s236_s18 }
  0x13   : > { %s11362_s13 = scalar_select %p9978_p10, 1, 0 }
  0x14   : > { %p9700_p11 = pneg %p9978_p10  ;;  %p9756_p13 = scmp.ne.s32.totalorder %s11277_s1, %s9755_s21 }
  0x15   : > { %p9762_p3 = scmp.lt.u32.totalorder %s9755_s21, %s11277_s1 }
  0x16   : > { %p9986_p12 = pnand %p11284_p9, %p9700_p11 }
  0x18   : > { %p9757_p0 = pneg %p9986_p12 }
  0x1a   : > { %p9758_p1 = pnand %p9757_p0, %p9756_p13 }
  0x1c   : > { %p9759_p2 = pneg %p9758_p1 }
  0x1e   : > { %p9764_p4 = pnand %p9762_p3, %p9759_p2 }
  0x20   : > { %9767 = shalt.err (!%p9764_p4)
}
  0x21   : > { %s9768_s9 = scalar_lea.vmem %s218_s15, 18432  ;;  %p9776_p9 = scmp.lt.s32.totalorder %s218_s15, %s218_s15 }
  0x22   : > { %p9769_p7 = scmp.ne.s32.totalorder %s218_s15, %s9768_s9  ;;  %p9777_p6 = scmp.lt.s32.totalorder %s9768_s9, %s9768_s9 }
  0x24   : > { %p9771_p8 = pnand %p9769_p7, %p9757_p0  ;;  %p9778_p5 = por %p9777_p6, %p9776_p9 }
  0x26   : > { %p9772_p11 = pneg %p9771_p8 }
  0x28   : > { %p9779_p10 = pnand %p9778_p5, %p9772_p11 }
  0x2a   : > { %9782 = shalt.err (!%p9779_p10)
}
  0x2b   : > { %s9885_s14 = smov 128   ;;  %s9886_s17 = smov 8  }
  0x2c   : > { %9703 = dma.hbm_to_vmem [thread:$0]  (!%p9986_p12), %s11277_s1, 18432, %s218_s15, [#allocation5], %s9885_s14, %s9885_s14, %s9886_s17  }
  0x2d   : > { %s9783_s23 = scalar_lea.hbm %s11280_s4, 18432 }
  0x2e   : > { %p9784_p13 = scmp.ne.s32.totalorder %s11280_s4, %s9783_s23  ;;  %p9790_p9 = scmp.lt.u32.totalorder %s9783_s23, %s11280_s4 }
  0x30   : > { %p9786_p5 = pnand %p9784_p13, %p9757_p0 }
  0x32   : > { %p9787_p6 = pneg %p9786_p5 }
  0x34   : > { %p9792_p10 = pnand %p9790_p9, %p9787_p6 }
  0x36   : > { %9795 = shalt.err (!%p9792_p10)
}
  0x37   : > { %s9796_s15 = scalar_lea.vmem %s9990_s18, 18432  ;;  %p9804_p4 = scmp.lt.s32.totalorder %s9990_s18, %s9990_s18 }
  0x38   : > { %p9797_p1 = scmp.ne.s32.totalorder %s9990_s18, %s9796_s15  ;;  %p9805_p7 = scmp.lt.s32.totalorder %s9796_s15, %s9796_s15 }
  0x3a   : > { %p9799_p2 = pnand %p9797_p1, %p9757_p0  ;;  %p9806_p8 = por %p9805_p7, %p9804_p4 }
  0x3c   : > { %p9800_p3 = pneg %p9799_p2 }
  0x3e   : > { %p9807_p11 = pnand %p9806_p8, %p9800_p3 }
  0x40   : > { %9810 = shalt.err (!%p9807_p11)
}
  0x41   : > { %9706 = dma.hbm_to_vmem [thread:$0]  (!%p9986_p12), %s11280_s4, 18432, %s9990_s18, [#allocation8], %s9885_s14, %s9885_s14, %s9886_s17  }
  0x42   : > { %p11364_p13 = scmp.ne.s32.totalorder %s11362_s13, 0 }
  0x44   : > { %266 = sbr.rel (%p11364_p13) target bundleno = 1776 (0x6f0), region = 48 }
  0x4b   : > { %p11365_p5 = scmp.eq.s32.totalorder %s9950_s28, 0 }
  0x4d   : > { %9856 = dma.done.wait (%p11365_p5), [#allocation5], 18432   ;;  %p11366_p0 = pmov %p11365_p5 }
  0x4f   : > { %9858 = vsyncadd (%p11366_p0), [#allocation5], 4294948864  ;;  %p11367_p6 = pmov %p11366_p0 }
  0x50   : > { %p11368_p9 = pmov %p11366_p0 }
  0x51   : > { %9860 = dma.done.wait (%p11367_p6), [#allocation8], 18432  }
  0x52   : > { %9862 = vsyncadd (%p11368_p9), [#allocation8], 4294948864  ;;  %p302_p10 = scmp.lt.s32.totalorder %s9950_s28, 1  ;;  %v9887_v0 = vmov 0.0   ;;  %v562_v1 = vld [vmem:[#allocation4 + $0x80] sm:$0xff]  ;;  %v563_v2 = vld [vmem:[#allocation4 + $0x88] sm:$0xff] }
  0x53   : > { %307 = vst [vmem:[#allocation2] sm:$0xff] %v9887_v0  ;;  %308 = vst [vmem:[#allocation2 + $0x8] sm:$0xff] %v9887_v0  ;;  %v564_v3 = vld [vmem:[#allocation4 + $0x90] sm:$0xff]  ;;  %v8602_v4 = vpack.c.bf16 %v563_v2, %v562_v1  ;;  %v565_v5 = vld [vmem:[#allocation4 + $0x98] sm:$0xff]  ;;  %vm448_vm0 = vcmask 31744   ;;  %s299_s10 = sand.u32 1, %s9873_s25  }
  0x54   : > { %309 = vst [vmem:[#allocation2 + $0x10] sm:$0x3] %v9887_v0  ;;  %310 = vst [vmem:[#allocation2 + $0x18] sm:$0xff] %v9887_v0  ;;  %s303_s13 = scalar_select %p302_p10, %s9950_s28, 1  ;;  %v8606_v6 = vpack.c.bf16 %v565_v5, %v564_v3  ;;  %v566_v7 = vld [vmem:[#allocation4 + $0xa0] sm:$0xff]  ;;  %v567_v8 = vld [vmem:[#allocation4 + $0xa8] sm:$0xff] }
  0x55   : > { %311 = vst [vmem:[#allocation2 + $0x20] sm:$0xff] %v9887_v0  ;;  %312 = vst [vmem:[#allocation2 + $0x28] sm:$0x3] %v9887_v0  ;;  %8603 = vmatprep.subr.bf16.mxu0 %v8602_v4  ;;  %v8610_v9 = vpack.c.bf16 %v567_v8, %v566_v7  ;;  %v568_v11 = vld [vmem:[#allocation4 + $0xb0] sm:$0xff]  ;;  %v569_v12 = vld [vmem:[#allocation4 + $0xb8] sm:$0xff]  ;;  %s6284_s19 = sshll.u32 %s299_s10, 4 }
  0x56   : > { %313 = vst [vmem:[#allocation2 + $0x30] sm:$0xff] %v9887_v0  ;;  %314 = vst [vmem:[#allocation2 + $0x38] sm:$0xff] %v9887_v0  ;;  %s6296_s16 = sshll.u32 %s303_s13, 8  ;;  %8605 = vmatpush3.bf16.msra.mxu0 %v8602_v4  ;;  %v8614_v18 = vpack.c.bf16 %v569_v12, %v568_v11  ;;  %v570_v22 = vld [vmem:[#allocation4 + $0xc0] sm:$0xff]  ;;  %v571_v23 = vld [vmem:[#allocation4 + $0xc8] sm:$0xff]  ;;  %s301_s13 = scalar_lea.vmem [#allocation9], %s6284_s19 }
  0x57   : > { %315 = vst [vmem:[#allocation2 + $0x40] sm:$0x3] %v9887_v0  ;;  %316 = vst [vmem:[#allocation2 + $0x48] sm:$0xff] %v9887_v0  ;;  %s10164_s17 = scalar_lea.vmem %s11276_s0, %s6296_s16  ;;  %8607 = vmatprep.subr.bf16.mxu0 %v8606_v6  ;;  %v8618_v29 = vpack.c.bf16 %v571_v23, %v570_v22  ;;  %v572_v33 = vld [vmem:[#allocation4 + $0xd0] sm:$0xff]  ;;  %v573_v34 = vld [vmem:[#allocation4 + $0xd8] sm:$0xff]  ;;  %s6195_s16 = sshll.u32 %s301_s13, 4  ;;  %s11231_s16 = int_to_ptr.vmem [resolvable:$true] %s6195_s16 }
  0x58   : > { %317 = vst [vmem:[#allocation2 + $0x50] sm:$0xff] %v9887_v0  ;;  %318 = vst [vmem:[#allocation2 + $0x58] sm:$0x3] %v9887_v0  ;;  %v415_v13 = vld [vmem:[%s10164_s17] sm:$0xff]  ;;  %v416_v14 = vld [vmem:[%s10164_s17 + $0x8] sm:$0xff]  ;;  %v8622_v37 = vpack.c.bf16 %v573_v34, %v572_v33  ;;  %s6297_s18 = sshll.u32 %s9950_s28, 8 }
  0x59   : > { %319 = vst [vmem:[#allocation2 + $0x60] sm:$0xff] %v9887_v0  ;;  %320 = vst [vmem:[#allocation2 + $0x68] sm:$0xff] %v9887_v0  ;;  %v417_v15 = vld [vmem:[%s10164_s17 + $0x10] sm:$0xff]  ;;  %v418_v16 = vld [vmem:[%s10164_s17 + $0x18] sm:$0xff]  ;;  %s11236_s20 = scalar_lea.hbm %s11283_s7, %s6297_s18  ;;  %s6181_s21 = scalar_lea.sflag [#allocation6], %s299_s10 }
  0x5a   : > { %321 = vst [vmem:[#allocation2 + $0x70] sm:$0x3] %v9887_v0  ;;  %322 = vst [vmem:[#allocation2 + $0x78] sm:$0xff] %v9887_v0  ;;  %v529_v10 = vld [vmem:[#allocation2 + $0x1] sm:$0xff]  ;;  %8609 = vmatpush3.bf16.msra.mxu0 %v8606_v6  ;;  %v421_v20 = vld [vmem:[%s10164_s17 + $0x30] sm:$0xff]  ;;  %s9811_s22 = scalar_lea.vmem %s11231_s16, 256 }
  0x5b   : > { %323 = vst [vmem:[#allocation2 + $0x80] sm:$0xff] %v9887_v0  ;;  %324 = vst [vmem:[#allocation2 + $0x88] sm:$0x3] %v9887_v0  ;;  %7194 = vmatprep.mubr.f32.mxu0 %v529_v10  ;;  %v419_v17 = vld [vmem:[%s10164_s17 + $0x20] sm:$0xff]  ;;  %8611 = vmatprep.subr.bf16.mxu0 %v8610_v9  ;;  %v420_v19 = vld [vmem:[%s10164_s17 + $0x28] sm:$0xff]  ;;  %p9812_p12 = scmp.ne.s32.totalorder %s11231_s16, %s9811_s22  ;;  %p11511_p1 = scmp.ne.s32.totalorder %s11360_s11, 0 }
  0x5c   : > { %325 = vst [vmem:[#allocation2 + $0x90] sm:$0xff] %v9887_v0  ;;  %326 = vst [vmem:[#allocation2 + $0x98] sm:$0xff] %v9887_v0  ;;  %v422_v21 = vld [vmem:[%s10164_s17 + $0x38] sm:$0xff]  ;;  %v423_v24 = vld [vmem:[%s10164_s17 + $0x40] sm:$0xff]  ;;  %s9888_s23 = smov [#allocation9]  }
  0x5d   : > { %327 = vst [vmem:[#allocation2 + $0xa0] sm:$0x3] %v9887_v0  ;;  %328 = vst [vmem:[#allocation2 + $0xa8] sm:$0xff] %v9887_v0  ;;  %v424_v25 = vld [vmem:[%s10164_s17 + $0x48] sm:$0xff]  ;;  %v425_v26 = vld [vmem:[%s10164_s17 + $0x50] sm:$0xff]  ;;  %p9813_p2 = pnand %p9812_p12, %p11511_p1  ;;  %s9815_s28 = sshll.u32 %s9888_s23, 4  ;;  %s9816_s28 = int_to_ptr.vmem [resolvable:$false] %s9815_s28 }
  0x5e   : > { %329 = vst [vmem:[#allocation2 + $0xb0] sm:$0xff] %v9887_v0  ;;  %330 = vst [vmem:[#allocation2 + $0xb8] sm:$0x3] %v9887_v0  ;;  %v426_v27 = vld [vmem:[%s10164_s17 + $0x58] sm:$0xff]  ;;  %8613 = vmatpush3.bf16.msra.mxu0 %v8610_v9  ;;  %v427_v28 = vld [vmem:[%s10164_s17 + $0x60] sm:$0xff]  ;;  %s9817_s29 = scalar_lea.vmem %s9816_s28, 512  ;;  %p9818_p4 = scmp.lt.s32.totalorder %s11231_s16, %s9816_s28 }
  0x5f   : > { %331 = vst [vmem:[#allocation2 + $0xc0] sm:$0xff] %v9887_v0  ;;  %332 = vst [vmem:[#allocation2 + $0xc8] sm:$0xff] %v9887_v0  ;;  %8615 = vmatprep.subr.bf16.mxu0 %v8614_v18  ;;  %v428_v30 = vld [vmem:[%s10164_s17 + $0x68] sm:$0xff]  ;;  %v429_v31 = vld [vmem:[%s10164_s17 + $0x70] sm:$0xff]  ;;  %p9814_p3 = pneg %p9813_p2  ;;  %p9819_p7 = scmp.lt.s32.totalorder %s9817_s29, %s9811_s22 }
  0x60   : > { %333 = vst [vmem:[#allocation2 + $0xd0] sm:$0x3] %v9887_v0  ;;  %334 = vst [vmem:[#allocation2 + $0xd8] sm:$0xff] %v9887_v0  ;;  %v430_v32 = vld [vmem:[%s10164_s17 + $0x78] sm:$0xff]  ;;  %v431_v35 = vld [vmem:[%s10164_s17 + $0x80] sm:$0xff] }
  0x61   : > { %335 = vst [vmem:[#allocation2 + $0xe0] sm:$0xff] %v9887_v0  ;;  %336 = vst [vmem:[#allocation2 + $0xe8] sm:$0x3] %v9887_v0  ;;  %v432_v36 = vld [vmem:[%s10164_s17 + $0x88] sm:$0xff]  ;;  %v574_v38 = vld [vmem:[#allocation4 + $0xe0] sm:$0xff]  ;;  %p9820_p8 = por %p9819_p7, %p9818_p4 }
  0x62   : > { %337 = vst [vmem:[#allocation2 + $0xf0] sm:$0xff] %v9887_v0  ;;  %338 = vst [vmem:[#allocation2 + $0xf8] sm:$0xff] %v9887_v0  ;;  %8617 = vmatpush3.bf16.msra.mxu0 %v8614_v18  ;;  %v575_v39 = vld [vmem:[#allocation4 + $0xe8] sm:$0xff]  ;;  %v433_v40 = vld [vmem:[%s10164_s17 + $0x90] sm:$0xff] }
  0x63   : > { %339 = vst [vmem:[#allocation2 + $0x100] sm:$0x3] %v9887_v0  ;;  %340 = vst [vmem:[#allocation2 + $0x108] sm:$0xff] %v9887_v0  ;;  %8619 = vmatprep.subr.bf16.mxu0 %v8618_v29  ;;  %v434_v41 = vld [vmem:[%s10164_s17 + $0x98] sm:$0xff]  ;;  %v8626_v42 = vpack.c.bf16 %v575_v39, %v574_v38  ;;  %v576_v43 = vld [vmem:[#allocation4 + $0xf0] sm:$0xff]  ;;  %p9821_p11 = pnand %p9820_p8, %p9814_p3 }
  0x64   : > { %341 = vst [vmem:[#allocation2 + $0x110] sm:$0xff] %v9887_v0  ;;  %342 = vst [vmem:[#allocation2 + $0x118] sm:$0x3] %v9887_v0  ;;  %v577_v44 = vld [vmem:[#allocation4 + $0xf8] sm:$0xff]  ;;  %v435_v45 = vld [vmem:[%s10164_s17 + $0xa0] sm:$0xff] }
  0x65   : > { %343 = vst [vmem:[#allocation2 + $0x120] sm:$0xff] %v9887_v0  ;;  %344 = vst [vmem:[#allocation2 + $0x128] sm:$0xff] %v9887_v0  ;;  %v436_v46 = vld [vmem:[%s10164_s17 + $0xa8] sm:$0xff]  ;;  %v437_v47 = vld [vmem:[%s10164_s17 + $0xb0] sm:$0xff]  ;;  %v8630_v50 = vpack.c.bf16 %v577_v44, %v576_v43 }
  0x66   : > { %345 = vst [vmem:[#allocation2 + $0x130] sm:$0x3] %v9887_v0  ;;  %346 = vst [vmem:[#allocation2 + $0x138] sm:$0xff] %v9887_v0  ;;  %8621 = vmatpush3.bf16.msra.mxu0 %v8618_v29  ;;  %v438_v48 = vld [vmem:[%s10164_s17 + $0xb8] sm:$0xff]  ;;  %v439_v49 = vld [vmem:[%s10164_s17 + $0xc0] sm:$0xff] }
  0x67   : > { %347 = vst [vmem:[#allocation2 + $0x140] sm:$0xff] %v9887_v0  ;;  %348 = vst [vmem:[#allocation2 + $0x148] sm:$0x3] %v9887_v0  ;;  %8623 = vmatprep.subr.bf16.mxu0 %v8622_v37  ;;  %v440_v51 = vld [vmem:[%s10164_s17 + $0xc8] sm:$0xff]  ;;  %v441_v52 = vld [vmem:[%s10164_s17 + $0xd0] sm:$0xff] }
  0x68   : > { %349 = vst [vmem:[#allocation2 + $0x150] sm:$0xff] %v9887_v0  ;;  %350 = vst [vmem:[#allocation2 + $0x158] sm:$0xff] %v9887_v0  ;;  %v442_v53 = vld [vmem:[%s10164_s17 + $0xd8] sm:$0xff]  ;;  %v513_v54 = vld [vmem:[#allocation4] sm:$0xff] }
  0x69   : > { %351 = vst [vmem:[#allocation2 + $0x160] sm:$0x3] %v9887_v0  ;;  %352 = vst [vmem:[#allocation2 + $0x168] sm:$0xff] %v9887_v0  ;;  %v514_v55 = vld [vmem:[#allocation4 + $0x8] sm:$0xff]  ;;  %v443_v56 = vld [vmem:[%s10164_s17 + $0xe0] sm:$0xff] }
  0x6a   : > { %353 = vst [vmem:[#allocation2 + $0x170] sm:$0xff] %v9887_v0  ;;  %354 = vst [vmem:[#allocation2 + $0x178] sm:$0x3] %v9887_v0  ;;  %8625 = vmatpush3.bf16.msra.mxu0 %v8622_v37  ;;  %v444_v57 = vld [vmem:[%s10164_s17 + $0xe8] sm:$0xff]  ;;  %v8634_v58 = vpack.c.bf16 %v514_v55, %v513_v54  ;;  %v515_v59 = vld [vmem:[#allocation4 + $0x10] sm:$0xff] }
  0x6b   : > { %355 = vst [vmem:[#allocation2 + $0x180] sm:$0xff] %v9887_v0  ;;  %356 = vst [vmem:[#allocation2 + $0x188] sm:$0xff] %v9887_v0  ;;  %8627 = vmatprep.subr.bf16.mxu0 %v8626_v42  ;;  %v516_v60 = vld [vmem:[#allocation4 + $0x18] sm:$0xff]  ;;  %v530_v61 = vld [vmem:[#allocation2 + $0x9] sm:$0xff] }
  0x6c   : > { %357 = vst [vmem:[#allocation2 + $0x190] sm:$0x3] %v9887_v0  ;;  %358 = vst [vmem:[#allocation2 + $0x198] sm:$0xff] %v9887_v0  ;;  %v8638_v63 = vpack.c.bf16 %v516_v60, %v515_v59  ;;  %v517_v1 = vld [vmem:[#allocation4 + $0x20] sm:$0xff]  ;;  %v518_v2 = vld [vmem:[#allocation4 + $0x28] sm:$0xff] }
  0x6d   : > { %359 = vst [vmem:[#allocation2 + $0x1a0] sm:$0xff] %v9887_v0  ;;  %360 = vst [vmem:[#allocation2 + $0x1a8] sm:$0x3] %v9887_v0  ;;  %v8642_v5 = vpack.c.bf16 %v518_v2, %v517_v1  ;;  %v519_v6 = vld [vmem:[#allocation4 + $0x30] sm:$0xff]  ;;  %v520_v7 = vld [vmem:[#allocation4 + $0x38] sm:$0xff] }
  0x6e   : > { %361 = vst [vmem:[#allocation3] sm:$0xff] %v9887_v0  ;;  %362 = vst [vmem:[#allocation3 + $0x8] sm:$0xff] %v9887_v0  ;;  %8629 = vmatpush3.bf16.msra.mxu0 %v8626_v42  ;;  %v8646_v10 = vpack.c.bf16 %v520_v7, %v519_v6  ;;  %v521_v11 = vld [vmem:[#allocation4 + $0x40] sm:$0xff]  ;;  %v522_v12 = vld [vmem:[#allocation4 + $0x48] sm:$0xff] }
  0x6f   : > { %363 = vst [vmem:[#allocation3 + $0x10] sm:$0x3] %v9887_v0  ;;  %364 = vst [vmem:[#allocation3 + $0x18] sm:$0xff] %v9887_v0  ;;  %8631 = vmatprep.subr.bf16.mxu0 %v8630_v50  ;;  %v526_v22 = vld [vmem:[#allocation4 + $0x68] sm:$0xff]  ;;  %v1065_v55 = vld [vmem:[#allocation4 + $0x120] sm:$0xff] }
  0x70   : > { %365 = vst [vmem:[#allocation3 + $0x20] sm:$0xff] %v9887_v0  ;;  %366 = vst [vmem:[#allocation3 + $0x28] sm:$0x3] %v9887_v0  ;;  %v1067_v60 = vld [vmem:[#allocation4 + $0x130] sm:$0xff]  ;;  %v1069_v2 = vld [vmem:[#allocation4 + $0x140] sm:$0xff] }
  0x71   : > { %367 = vst [vmem:[#allocation3 + $0x30] sm:$0xff] %v9887_v0  ;;  %368 = vst [vmem:[#allocation3 + $0x38] sm:$0xff] %v9887_v0 }
  0x72   : > { %369 = vst [vmem:[#allocation3 + $0x40] sm:$0x3] %v9887_v0  ;;  %370 = vst [vmem:[#allocation3 + $0x48] sm:$0xff] %v9887_v0  ;;  %8633 = vmatpush3.bf16.msra.mxu0 %v8630_v50 }
  0x73   : > { %371 = vst [vmem:[#allocation3 + $0x50] sm:$0xff] %v9887_v0  ;;  %372 = vst [vmem:[#allocation3 + $0x58] sm:$0x3] %v9887_v0  ;;  %8635 = vmatprep.subr.bf16.mxu0 %v8634_v58 }
  0x74   : > { %373 = vst [vmem:[#allocation3 + $0x60] sm:$0xff] %v9887_v0  ;;  %374 = vst [vmem:[#allocation3 + $0x68] sm:$0xff] %v9887_v0 }
  0x75   : > { %375 = vst [vmem:[#allocation3 + $0x70] sm:$0x3] %v9887_v0  ;;  %376 = vst [vmem:[#allocation3 + $0x78] sm:$0xff] %v9887_v0  ;;  %7195 = vmatmul.mubr.f32.vlgmr.msra.gmra.mrb[0].mxu0 %v530_v61  ;;  %v1068_v61 = vld [vmem:[#allocation4 + $0x138] sm:$0xff] }
  0x76   : > { %377 = vst [vmem:[#allocation3 + $0x80] sm:$0xff] %v9887_v0  ;;  %378 = vst [vmem:[#allocation3 + $0x88] sm:$0x3] %v9887_v0  ;;  %8637 = vmatpush3.bf16.msra.mxu0 %v8634_v58 }
  0x77   : > { %379 = vst [vmem:[#allocation3 + $0x90] sm:$0xff] %v9887_v0  ;;  %380 = vst [vmem:[#allocation3 + $0x98] sm:$0xff] %v9887_v0  ;;  %8639 = vmatprep.subr.bf16.mxu0 %v8638_v63 }
  0x78   : > { %381 = vst [vmem:[#allocation3 + $0xa0] sm:$0x3] %v9887_v0  ;;  %382 = vst [vmem:[#allocation3 + $0xa8] sm:$0xff] %v9887_v0 }
  0x79   : > { %383 = vst [vmem:[#allocation3 + $0xb0] sm:$0xff] %v9887_v0  ;;  %384 = vst [vmem:[#allocation3 + $0xb8] sm:$0x3] %v9887_v0 }
  0x7a   : > { %385 = vst [vmem:[#allocation3 + $0xc0] sm:$0xff] %v9887_v0  ;;  %386 = vst [vmem:[#allocation3 + $0xc8] sm:$0xff] %v9887_v0  ;;  %8641 = vmatpush3.bf16.msra.mxu0 %v8638_v63 }
  0x7b   : > { %387 = vst [vmem:[#allocation3 + $0xd0] sm:$0x3] %v9887_v0  ;;  %388 = vst [vmem:[#allocation3 + $0xd8] sm:$0xff] %v9887_v0  ;;  %8643 = vmatprep.subr.bf16.mxu0 %v8642_v5 }
  0x7c   : > { %389 = vst [vmem:[#allocation3 + $0xe0] sm:$0xff] %v9887_v0  ;;  %390 = vst [vmem:[#allocation3 + $0xe8] sm:$0x3] %v9887_v0 }
  0x7d   : > { %391 = vst [vmem:[#allocation3 + $0xf0] sm:$0xff] %v9887_v0  ;;  %392 = vst [vmem:[#allocation3 + $0xf8] sm:$0xff] %v9887_v0 }
  0x7e   : > { %393 = vst [vmem:[#allocation3 + $0x100] sm:$0x3] %v9887_v0  ;;  %394 = vst [vmem:[#allocation3 + $0x108] sm:$0xff] %v9887_v0  ;;  %8645 = vmatpush3.bf16.msra.mxu0 %v8642_v5  ;;  %v1070_v5 = vld [vmem:[#allocation4 + $0x148] sm:$0xff] }
  0x7f   : > { %395 = vst [vmem:[#allocation3 + $0x110] sm:$0xff] %v9887_v0  ;;  %396 = vst [vmem:[#allocation3 + $0x118] sm:$0x3] %v9887_v0  ;;  %8647 = vmatprep.subr.bf16.mxu0 %v8646_v10 }
  0x80   : > { %397 = vst [vmem:[#allocation3 + $0x120] sm:$0xff] %v9887_v0  ;;  %398 = vst [vmem:[#allocation3 + $0x128] sm:$0xff] %v9887_v0 }
  0x81   : > { %399 = vst [vmem:[#allocation3 + $0x130] sm:$0x3] %v9887_v0  ;;  %400 = vst [vmem:[#allocation3 + $0x138] sm:$0xff] %v9887_v0 }
  0x82   : > { %401 = vst [vmem:[#allocation3 + $0x140] sm:$0xff] %v9887_v0  ;;  %402 = vst [vmem:[#allocation3 + $0x148] sm:$0x3] %v9887_v0  ;;  %8649 = vmatpush3.bf16.msra.mxu0 %v8646_v10  ;;  %v8682_v10 = vpack.c.bf16 %v1070_v5, %v1069_v2 }
  0x83   : > { %403 = vst [vmem:[#allocation3 + $0x150] sm:$0xff] %v9887_v0  ;;  %404 = vst [vmem:[#allocation3 + $0x158] sm:$0xff] %v9887_v0 }
  0x84   : > { %405 = vst [vmem:[#allocation3 + $0x160] sm:$0x3] %v9887_v0  ;;  %406 = vst [vmem:[#allocation3 + $0x168] sm:$0xff] %v9887_v0 }
  0x85   : > { %407 = vst [vmem:[#allocation3 + $0x170] sm:$0xff] %v9887_v0  ;;  %408 = vst [vmem:[#allocation3 + $0x178] sm:$0x3] %v9887_v0 }
  0x86   : > { %409 = vst [vmem:[#allocation3 + $0x180] sm:$0xff] %v9887_v0  ;;  %410 = vst [vmem:[#allocation3 + $0x188] sm:$0xff] %v9887_v0 }
  0x87   : > { %411 = vst [vmem:[#allocation3 + $0x190] sm:$0x3] %v9887_v0  ;;  %412 = vst [vmem:[#allocation3 + $0x198] sm:$0xff] %v9887_v0 }
  0x88   : > { %413 = vst [vmem:[#allocation3 + $0x1a0] sm:$0xff] %v9887_v0  ;;  %414 = vst [vmem:[#allocation3 + $0x1a8] sm:$0x3] %v9887_v0 }
  0x89   : > { %449 = vst.msk [vmem:[#allocation2 + $0x19] sm:$0xff] %vm448_vm0, %v415_v13  ;;  %450 = vst.msk [vmem:[#allocation2 + $0x21] sm:$0xff] %vm448_vm0, %v416_v14 }
  0x8a   : > { %451 = vst.msk [vmem:[#allocation2 + $0x31] sm:$0xff] %vm448_vm0, %v417_v15  ;;  %452 = vst.msk [vmem:[#allocation2 + $0x39] sm:$0xff] %vm448_vm0, %v418_v16  ;;  %v8650_v15 = vpack.c.bf16 %v522_v12, %v521_v11  ;;  %v523_v16 = vld [vmem:[#allocation4 + $0x50] sm:$0xff]  ;;  %v1072_v12 = vld [vmem:[#allocation4 + $0x158] sm:$0xff] }
  0x8b   : > { %453 = vst.msk [vmem:[#allocation2 + $0x49] sm:$0xff] %vm448_vm0, %v419_v17  ;;  %454 = vst.msk [vmem:[#allocation2 + $0x51] sm:$0xff] %vm448_vm0, %v420_v19  ;;  %v524_v17 = vld [vmem:[#allocation4 + $0x58] sm:$0xff]  ;;  %v1071_v11 = vld [vmem:[#allocation4 + $0x150] sm:$0xff] }
  0x8c   : > { %455 = vst.msk [vmem:[#allocation2 + $0x61] sm:$0xff] %vm448_vm0, %v421_v20  ;;  %456 = vst.msk [vmem:[#allocation2 + $0x69] sm:$0xff] %vm448_vm0, %v422_v21  ;;  %8651 = vmatprep.subr.bf16.mxu0 %v8650_v15  ;;  %v8654_v20 = vpack.c.bf16 %v524_v17, %v523_v16  ;;  %v525_v21 = vld [vmem:[#allocation4 + $0x60] sm:$0xff]  ;;  %v8686_v17 = vpack.c.bf16 %v1072_v12, %v1071_v11 }
  0x8d   : > { %457 = vst.msk [vmem:[#allocation2 + $0x79] sm:$0xff] %vm448_vm0, %v423_v24  ;;  %458 = vst.msk [vmem:[#allocation2 + $0x81] sm:$0xff] %vm448_vm0, %v424_v25  ;;  %8653 = vmatpush3.bf16.msra.mxu0 %v8650_v15  ;;  %v8658_v25 = vpack.c.bf16 %v526_v22, %v525_v21  ;;  %v1074_v21 = vld [vmem:[#allocation4 + $0x168] sm:$0xff] }
  0x8e   : > { %459 = vst.msk [vmem:[#allocation2 + $0x91] sm:$0xff] %vm448_vm0, %v425_v26  ;;  %460 = vst.msk [vmem:[#allocation2 + $0x99] sm:$0xff] %vm448_vm0, %v426_v27  ;;  %8655 = vmatprep.subr.bf16.mxu0 %v8654_v20  ;;  %v527_v26 = vld [vmem:[#allocation4 + $0x70] sm:$0xff]  ;;  %v528_v27 = vld [vmem:[#allocation4 + $0x78] sm:$0xff] }
  0x8f   : > { %461 = vst.msk [vmem:[#allocation2 + $0xa9] sm:$0xff] %vm448_vm0, %v427_v28  ;;  %462 = vst.msk [vmem:[#allocation2 + $0xb1] sm:$0xff] %vm448_vm0, %v428_v30  ;;  %v8662_v30 = vpack.c.bf16 %v528_v27, %v527_v26  ;;  %v1075_v27 = vld [vmem:[#allocation4 + $0x170] sm:$0xff] }
  0x90   : > { %463 = vst.msk [vmem:[#allocation2 + $0xc1] sm:$0xff] %vm448_vm0, %v429_v31  ;;  %464 = vst.msk [vmem:[#allocation2 + $0xc9] sm:$0xff] %vm448_vm0, %v430_v32  ;;  %v10226_v62 = vld [vmem:[#allocation2 + $0x19] sm:$0xff]  ;;  %v10229_v3 = vld [vmem:[#allocation2 + $0x21] sm:$0xff] }
  0x91   : > { %465 = vst.msk [vmem:[#allocation2 + $0xd9] sm:$0xff] %vm448_vm0, %v431_v35  ;;  %466 = vst.msk [vmem:[#allocation2 + $0xe1] sm:$0xff] %vm448_vm0, %v432_v36  ;;  %7197 = vmatprep.mubr.f32.mxu0 %v10226_v62  ;;  %v10231_v4 = vld [vmem:[#allocation2 + $0x31] sm:$0xff]  ;;  %v10235_v8 = vld [vmem:[#allocation2 + $0x39] sm:$0xff]  ;;  %8657 = vmatpush3.bf16.msra.mxu0 %v8654_v20 }
  0x92   : > { %467 = vst.msk [vmem:[#allocation2 + $0xf1] sm:$0xff] %vm448_vm0, %v433_v40  ;;  %468 = vst.msk [vmem:[#allocation2 + $0xf9] sm:$0xff] %vm448_vm0, %v434_v41  ;;  %7198 = vmatmul.mubr.f32.gmra.mrb[2].mxu0 %v10229_v3  ;;  %v10237_v9 = vld [vmem:[#allocation2 + $0x49] sm:$0xff]  ;;  %v10241_v13 = vld [vmem:[#allocation2 + $0x51] sm:$0xff]  ;;  %8659 = vmatprep.subr.bf16.mxu0 %v8658_v25 }
  0x93   : > { %469 = vst.msk [vmem:[#allocation2 + $0x109] sm:$0xff] %vm448_vm0, %v435_v45  ;;  %470 = vst.msk [vmem:[#allocation2 + $0x111] sm:$0xff] %vm448_vm0, %v436_v46  ;;  %7200 = vmatprep.mubr.f32.mxu0 %v10231_v4  ;;  %v10243_v14 = vld [vmem:[#allocation2 + $0x61] sm:$0xff]  ;;  %v10247_v18 = vld [vmem:[#allocation2 + $0x69] sm:$0xff] }
  0x94   : > { %471 = vst.msk [vmem:[#allocation2 + $0x121] sm:$0xff] %vm448_vm0, %v437_v47  ;;  %472 = vst.msk [vmem:[#allocation2 + $0x129] sm:$0xff] %vm448_vm0, %v438_v48  ;;  %v10249_v19 = vld [vmem:[#allocation2 + $0x79] sm:$0xff]  ;;  %v10253_v23 = vld [vmem:[#allocation2 + $0x81] sm:$0xff] }
  0x95   : > { %473 = vst.msk [vmem:[#allocation2 + $0x139] sm:$0xff] %vm448_vm0, %v439_v49  ;;  %474 = vst.msk [vmem:[#allocation2 + $0x141] sm:$0xff] %vm448_vm0, %v440_v51  ;;  %v10255_v24 = vld [vmem:[#allocation2 + $0x91] sm:$0xff]  ;;  %v10259_v28 = vld [vmem:[#allocation2 + $0x99] sm:$0xff]  ;;  %8661 = vmatpush3.bf16.msra.mxu0 %v8658_v25 }
  0x96   : > { %475 = vst.msk [vmem:[#allocation2 + $0x151] sm:$0xff] %vm448_vm0, %v441_v52  ;;  %476 = vst.msk [vmem:[#allocation2 + $0x159] sm:$0xff] %vm448_vm0, %v442_v53  ;;  %7201 = vmatmul.mubr.f32.gmra.mrb[4].mxu0 %v10235_v8  ;;  %v10261_v29 = vld [vmem:[#allocation2 + $0xa9] sm:$0xff]  ;;  %v1061_v31 = vld [vmem:[#allocation4 + $0x100] sm:$0xff]  ;;  %8663 = vmatprep.subr.bf16.mxu0 %v8662_v30 }
  0x97   : > { %477 = vst.msk [vmem:[#allocation2 + $0x169] sm:$0xff] %vm448_vm0, %v443_v56  ;;  %478 = vst.msk [vmem:[#allocation2 + $0x171] sm:$0xff] %vm448_vm0, %v444_v57  ;;  %7203 = vmatprep.mubr.f32.mxu0 %v10237_v9  ;;  %v1062_v32 = vld [vmem:[#allocation4 + $0x108] sm:$0xff]  ;;  %v10265_v33 = vld [vmem:[#allocation2 + $0xb1] sm:$0xff] }
  0x98   : > { %v10267_v34 = vld [vmem:[#allocation2 + $0xc1] sm:$0xff]  ;;  %v8666_v35 = vpack.c.bf16 %v1062_v32, %v1061_v31  ;;  %v10271_v36 = vld [vmem:[#allocation2 + $0xc9] sm:$0xff]  ;;  %v10273_v37 = vld [vmem:[#allocation2 + $0xd9] sm:$0xff] }
  0x99   : > { %8665 = vmatpush3.bf16.msra.mxu0 %v8662_v30  ;;  %v10277_v38 = vld [vmem:[#allocation2 + $0xe1] sm:$0xff]  ;;  %v10279_v39 = vld [vmem:[#allocation2 + $0xf1] sm:$0xff]  ;;  %v10283_v40 = vld [vmem:[#allocation2 + $0xf9] sm:$0xff] }
  0x9a   : > { %7204 = vmatmul.mubr.f32.gmra.mrb[6].mxu0 %v10241_v13  ;;  %8667 = vmatprep.subr.bf16.mxu0 %v8666_v35  ;;  %v10285_v41 = vld [vmem:[#allocation2 + $0x109] sm:$0xff]  ;;  %v10289_v42 = vld [vmem:[#allocation2 + $0x111] sm:$0xff]  ;;  %v10321_v57 = vld [vmem:[#allocation2 + $0x20] sm:$0xff] }
  0x9b   : > { %7206 = vmatprep.mubr.f32.mxu0 %v10243_v14  ;;  %11369 = vst [vmem:[#allocation14_spill] sm:$0xff] %v10285_v41  ;;  %11370 = vst [vmem:[#allocation15_spill] sm:$0xff] %v10289_v42  ;;  %v10291_v43 = vld [vmem:[#allocation2 + $0x121] sm:$0xff]  ;;  %v10295_v44 = vld [vmem:[#allocation2 + $0x129] sm:$0xff] }
  0x9c   : > { %11371 = vst [vmem:[#allocation16_spill] sm:$0xff] %v10291_v43  ;;  %11372 = vst [vmem:[#allocation17_spill] sm:$0xff] %v10295_v44  ;;  %v10297_v45 = vld [vmem:[#allocation2 + $0x139] sm:$0xff]  ;;  %v10301_v46 = vld [vmem:[#allocation2 + $0x141] sm:$0xff] }
  0x9d   : > { %11373 = vst [vmem:[#allocation18_spill] sm:$0xff] %v10297_v45  ;;  %11374 = vst [vmem:[#allocation19_spill] sm:$0xff] %v10301_v46  ;;  %v10303_v47 = vld [vmem:[#allocation2 + $0x151] sm:$0xff]  ;;  %v10307_v48 = vld [vmem:[#allocation2 + $0x159] sm:$0xff] }
  0x9e   : > { %7207 = vmatmul.mubr.f32.gmra.mrb[8].mxu0 %v10247_v18  ;;  %11375 = vst [vmem:[#allocation20_spill] sm:$0xff] %v10303_v47  ;;  %11376 = vst [vmem:[#allocation21_spill] sm:$0xff] %v10307_v48  ;;  %v10309_v49 = vld [vmem:[#allocation2 + $0x169] sm:$0xff]  ;;  %v10313_v50 = vld [vmem:[#allocation2 + $0x171] sm:$0xff] }
  0x9f   : > { %7209 = vmatprep.mubr.f32.mxu0 %v10249_v19  ;;  %11377 = vst [vmem:[#allocation22_spill] sm:$0xff] %v10309_v49  ;;  %11378 = vst [vmem:[#allocation23_spill] sm:$0xff] %v10313_v50  ;;  %v1063_v51 = vld [vmem:[#allocation4 + $0x110] sm:$0xff]  ;;  %v1064_v52 = vld [vmem:[#allocation4 + $0x118] sm:$0xff] }
  0xa0   : > { %v10317_v53 = vld [vmem:[#allocation2 + $0x18] sm:$0xff]  ;;  %v8670_v54 = vpack.c.bf16 %v1064_v52, %v1063_v51  ;;  %v1066_v56 = vld [vmem:[#allocation4 + $0x128] sm:$0xff]  ;;  %v10323_v58 = vld [vmem:[#allocation2 + $0x30] sm:$0xff] }
  0xa1   : > { %v8674_v59 = vpack.c.bf16 %v1066_v56, %v1065_v55  ;;  %v10327_v63 = vld [vmem:[#allocation2 + $0x38] sm:$0xff]  ;;  %v10329_v1 = vld [vmem:[#allocation2 + $0x48] sm:$0xff]  ;;  %v10333_v6 = vld [vmem:[#allocation2 + $0x50] sm:$0xff] }
  0xa2   : > { %7210 = vmatmul.mubr.f32.gmra.mrb[10].mxu0 %v10253_v23  ;;  %v10335_v7 = vld [vmem:[#allocation2 + $0x60] sm:$0xff]  ;;  %v10339_v15 = vld [vmem:[#allocation2 + $0x68] sm:$0xff]  ;;  %v10341_v16 = vld [vmem:[#allocation2 + $0x78] sm:$0xff] }
  0xa3   : > { %7212 = vmatprep.mubr.f32.mxu0 %v10255_v24  ;;  %v1073_v20 = vld [vmem:[#allocation4 + $0x160] sm:$0xff]  ;;  %v10347_v25 = vld [vmem:[#allocation2 + $0x90] sm:$0xff]  ;;  %v1076_v30 = vld [vmem:[#allocation4 + $0x178] sm:$0xff] }
  0xa4   : > { %v10345_v22 = vld [vmem:[#allocation2 + $0x80] sm:$0xff]  ;;  %v8690_v26 = vpack.c.bf16 %v1074_v21, %v1073_v20  ;;  %v10351_v31 = vld [vmem:[#allocation2 + $0x98] sm:$0xff]  ;;  %v10353_v32 = vld [vmem:[#allocation2 + $0xa8] sm:$0xff] }
  0xa5   : > { %v1367_v51 = vld [vmem:[#allocation4 + $0x180] sm:$0xff]  ;;  %v1368_v52 = vld [vmem:[#allocation4 + $0x188] sm:$0xff]  ;;  %v10375_v2 = vld [vmem:[#allocation2 + $0xf8] sm:$0xff] }
  0xa6   : > { %7213 = vmatmul.mubr.f32.gmra.mrb[12].mxu0 %v10259_v28  ;;  %v10359_v55 = vld [vmem:[#allocation2 + $0xc0] sm:$0xff]  ;;  %v8698_v56 = vpack.c.bf16 %v1368_v52, %v1367_v51  ;;  %v10377_v5 = vld [vmem:[#allocation2 + $0x108] sm:$0xff]  ;;  %v10395_v21 = vld [vmem:[#allocation2 + $0x150] sm:$0xff] }
  0xa7   : > { %7215 = vmatprep.mubr.f32.mxu0 %v10261_v29  ;;  %v10383_v11 = vld [vmem:[#allocation2 + $0x120] sm:$0xff]  ;;  %v10387_v12 = vld [vmem:[#allocation2 + $0x128] sm:$0xff]  ;;  %v10409_v51 = vld [vmem:[#allocation2 + $0x170] sm:$0xff] }
  0xa8   : > { %v10393_v20 = vld [vmem:[#allocation2 + $0x140] sm:$0xff] }
  0xa9   : > { %v1028_v52 = vld [vmem:[#allocation2 + $0x2] sm:$0xff] }
  0xaa   : > { %7216 = vmatmul.mubr.f32.gmra.mrb[14].mxu0 %v10265_v33 }
  0xab   : > { %7218 = vmatprep.mubr.f32.mxu0 %v10267_v34 }
  0xae   : > { %7219 = vmatmul.mubr.f32.gmra.mrb[16].mxu0 %v10271_v36 }
  0xaf   : > { %7221 = vmatprep.mubr.f32.mxu0 %v10273_v37 }
  0xb2   : > { %7222 = vmatmul.mubr.f32.gmra.mrb[18].mxu0 %v10277_v38 }
  0xb3   : > { %7224 = vmatprep.mubr.f32.mxu0 %v10279_v39 }
  0xb6   : > { %7225 = vmatmul.mubr.f32.gmra.mrb[20].mxu0 %v10283_v40 }
  0xb7   : > { %7227 = vmatprep.mubr.f32.mxu0 %v10285_v41  ;;  %v1374_v41 = vld [vmem:[#allocation4 + $0x1b8] sm:$0xff] }
  0xba   : > { %7228 = vmatmul.mubr.f32.gmra.mrb[22].mxu0 %v10289_v42  ;;  %v1373_v42 = vld [vmem:[#allocation4 + $0x1b0] sm:$0xff] }
  0xbb   : > { %7230 = vmatprep.mubr.f32.mxu0 %v10291_v43 }
  0xbe   : > { %7231 = vmatmul.mubr.f32.gmra.mrb[24].mxu0 %v10295_v44  ;;  %v10417_v44 = vld [vmem:[#allocation2 + $0x32] sm:$0xff] }
  0xbf   : > { %7233 = vmatprep.mubr.f32.mxu0 %v10297_v45  ;;  %v10415_v45 = vld [vmem:[#allocation2 + $0x22] sm:$0xff]  ;;  %11381 = vst [vmem:[#allocation26_spill] sm:$0xff] %v10417_v44 }
  0xc0   : > { %11380 = vst [vmem:[#allocation25_spill] sm:$0xff] %v10415_v45 }
  0xc2   : > { %7234 = vmatmul.mubr.f32.gmra.mrb[26].mxu0 %v10301_v46  ;;  %v1372_v46 = vld [vmem:[#allocation4 + $0x1a8] sm:$0xff] }
  0xc3   : > { %7236 = vmatprep.mubr.f32.mxu0 %v10303_v47  ;;  %v1371_v47 = vld [vmem:[#allocation4 + $0x1a0] sm:$0xff] }
  0xc4   : > { %v8706_v43 = vpack.c.bf16 %v1372_v46, %v1371_v47  ;;  %v10427_v46 = vld [vmem:[#allocation2 + $0x52] sm:$0xff]  ;;  %v10429_v47 = vld [vmem:[#allocation2 + $0x62] sm:$0xff] }
  0xc5   : > { %11384 = vst [vmem:[#allocation29_spill] sm:$0xff] %v10427_v46  ;;  %11385 = vst [vmem:[#allocation30_spill] sm:$0xff] %v10429_v47 }
  0xc6   : > { %7237 = vmatmul.mubr.f32.gmra.mrb[28].mxu0 %v10307_v48 }
  0xc7   : > { %7239 = vmatprep.mubr.f32.mxu0 %v10309_v49  ;;  %v1029_v49 = vld [vmem:[#allocation2 + $0xa] sm:$0xff] }
  0xca   : > { %7240 = vmatmul.mubr.f32.gmra.mrb[30].mxu0 %v10313_v50  ;;  %v1369_v50 = vld [vmem:[#allocation4 + $0x190] sm:$0xff] }
  0xcb   : > { %7274 = vmatprep.mubr.f32.mxu0 %v9887_v0 }
  0xce   : > { %7275 = vmatmul.mubr.f32.vlgmr.msra.gmra.mrb[0].mxu0 %v9887_v0  ;;  %v8678_v0 = vpack.c.bf16 %v1068_v61, %v1067_v60  ;;  %v10365_v60 = vld [vmem:[#allocation2 + $0xd8] sm:$0xff]  ;;  %v10369_v61 = vld [vmem:[#allocation2 + $0xe0] sm:$0xff] }
  0xcf   : > { %8669 = vmatpush3.bf16.msra.mxu0 %v8666_v35  ;;  %7277 = vmatprep.mubr.f32.mxu0 %v10317_v53  ;;  %v8694_v35 = vpack.c.bf16 %v1076_v30, %v1075_v27  ;;  %v446_v27 = vld [vmem:[%s10164_s17 + $0xf8] sm:$0xff] }
  0xd0   : > { %8671 = vmatprep.subr.bf16.mxu0 %v8670_v54  ;;  %480 = vst.msk [vmem:[#allocation2 + $0x189] sm:$0xff] %vm448_vm0, %v446_v27  ;;  %v10403_v30 = vld [vmem:[#allocation2 + $0x158] sm:$0xff] }
  0xd1   : > { %v10412_v27 = vld [vmem:[#allocation2 + $0x1a] sm:$0xff] }
  0xd2   : > { %7278 = vmatmul.mubr.f32.gmra.mrb[2].mxu0 %v10321_v57  ;;  %11379 = vst [vmem:[#allocation24_spill] sm:$0xff] %v10412_v27 }
  0xd3   : > { %7280 = vmatprep.mubr.f32.mxu0 %v10323_v58  ;;  %8673 = vmatpush3.bf16.msra.mxu0 %v8670_v54  ;;  %v10357_v54 = vld [vmem:[#allocation2 + $0xb0] sm:$0xff] }
  0xd4   : > { %8675 = vmatprep.subr.bf16.mxu0 %v8674_v59 }
  0xd6   : > { %7281 = vmatmul.mubr.f32.gmra.mrb[4].mxu0 %v10327_v63 }
  0xd7   : > { %7283 = vmatprep.mubr.f32.mxu0 %v10329_v1  ;;  %8677 = vmatpush3.bf16.msra.mxu0 %v8674_v59  ;;  %v10363_v59 = vld [vmem:[#allocation2 + $0xc8] sm:$0xff] }
  0xd8   : > { %8679 = vmatprep.subr.bf16.mxu0 %v8678_v0 }
  0xda   : > { %7284 = vmatmul.mubr.f32.gmra.mrb[6].mxu0 %v10333_v6 }
  0xdb   : > { %7286 = vmatprep.mubr.f32.mxu0 %v10335_v7  ;;  %8681 = vmatpush3.bf16.msra.mxu0 %v8678_v0  ;;  %v10371_v0 = vld [vmem:[#allocation2 + $0xf0] sm:$0xff] }
  0xdc   : > { %8683 = vmatprep.subr.bf16.mxu0 %v8682_v10 }
  0xde   : > { %7287 = vmatmul.mubr.f32.gmra.mrb[8].mxu0 %v10339_v15 }
  0xdf   : > { %7289 = vmatprep.mubr.f32.mxu0 %v10341_v16  ;;  %8685 = vmatpush3.bf16.msra.mxu0 %v8682_v10  ;;  %v10381_v10 = vld [vmem:[#allocation2 + $0x110] sm:$0xff] }
  0xe0   : > { %8687 = vmatprep.subr.bf16.mxu0 %v8686_v17 }
  0xe2   : > { %7290 = vmatmul.mubr.f32.gmra.mrb[10].mxu0 %v10345_v22 }
  0xe3   : > { %7292 = vmatprep.mubr.f32.mxu0 %v10347_v25  ;;  %8689 = vmatpush3.bf16.msra.mxu0 %v8686_v17  ;;  %v10389_v17 = vld [vmem:[#allocation2 + $0x138] sm:$0xff] }
  0xe4   : > { %8691 = vmatprep.subr.bf16.mxu0 %v8690_v26 }
  0xe6   : > { %7293 = vmatmul.mubr.f32.gmra.mrb[12].mxu0 %v10351_v31 }
  0xe7   : > { %7295 = vmatprep.mubr.f32.mxu0 %v10353_v32  ;;  %8693 = vmatpush3.bf16.msra.mxu0 %v8690_v26  ;;  %v445_v26 = vld [vmem:[%s10164_s17 + $0xf0] sm:$0xff] }
  0xe8   : > { %8695 = vmatprep.subr.bf16.mxu0 %v8694_v35  ;;  %479 = vst.msk [vmem:[#allocation2 + $0x181] sm:$0xff] %vm448_vm0, %v445_v26  ;;  %v1370_v26 = vld [vmem:[#allocation4 + $0x198] sm:$0xff] }
  0xe9   : > { %v8702_v48 = vpack.c.bf16 %v1370_v26, %v1369_v50  ;;  %v10423_v50 = vld [vmem:[#allocation2 + $0x4a] sm:$0xff] }
  0xea   : > { %7296 = vmatmul.mubr.f32.gmra.mrb[14].mxu0 %v10357_v54  ;;  %11383 = vst [vmem:[#allocation28_spill] sm:$0xff] %v10423_v50  ;;  %v1376_v26 = vld [vmem:[#allocation4 + $0x1c8] sm:$0xff] }
  0xeb   : > { %7298 = vmatprep.mubr.f32.mxu0 %v10359_v55  ;;  %8697 = vmatpush3.bf16.msra.mxu0 %v8694_v35  ;;  %v10405_v35 = vld [vmem:[#allocation2 + $0x168] sm:$0xff] }
  0xec   : > { %8699 = vmatprep.subr.bf16.mxu0 %v8698_v56 }
  0xee   : > { %7299 = vmatmul.mubr.f32.gmra.mrb[16].mxu0 %v10363_v59 }
  0xef   : > { %7301 = vmatprep.mubr.f32.mxu0 %v10365_v60 }
  0xf2   : > { %7302 = vmatmul.mubr.f32.gmra.mrb[18].mxu0 %v10369_v61 }
  0xf3   : > { %7304 = vmatprep.mubr.f32.mxu0 %v10371_v0 }
  0xf6   : > { %7305 = vmatmul.mubr.f32.gmra.mrb[20].mxu0 %v10375_v2 }
  0xf7   : > { %7307 = vmatprep.mubr.f32.mxu0 %v10377_v5 }
  0xfa   : > { %7308 = vmatmul.mubr.f32.gmra.mrb[22].mxu0 %v10381_v10 }
  0xfb   : > { %7310 = vmatprep.mubr.f32.mxu0 %v10383_v11 }
  0xfe   : > { %7311 = vmatmul.mubr.f32.gmra.mrb[24].mxu0 %v10387_v12 }
  0xff   : > { %7313 = vmatprep.mubr.f32.mxu0 %v10389_v17 }
 0x102   : > { %7314 = vmatmul.mubr.f32.gmra.mrb[26].mxu0 %v10393_v20 }
 0x103   : > { %7316 = vmatprep.mubr.f32.mxu0 %v10395_v21 }
 0x106   : > { %7317 = vmatmul.mubr.f32.gmra.mrb[28].mxu0 %v10403_v30 }
 0x107   : > { %7319 = vmatprep.mubr.f32.mxu0 %v10405_v35 }
 0x10a   : > { %7320 = vmatmul.mubr.f32.gmra.mrb[30].mxu0 %v10409_v51 }
 0x10b   : > { %7354 = vmatprep.mubr.f32.mxu0 %v1028_v52  ;;  %v10421_v52 = vld [vmem:[#allocation2 + $0x3a] sm:$0xff] }
 0x10c   : > { %11382 = vst [vmem:[#allocation27_spill] sm:$0xff] %v10421_v52 }
 0x10e   : > { %7355 = vmatmul.mubr.f32.vlgmr.msra.gmra.mrb[0].mxu0 %v1029_v49  ;;  %v8710_v49 = vpack.c.bf16 %v1374_v41, %v1373_v42  ;;  %v10433_v41 = vld [vmem:[#allocation2 + $0x6a] sm:$0xff]  ;;  %v10435_v42 = vld [vmem:[#allocation2 + $0x7a] sm:$0xff] }
 0x10f   : > { %8701 = vmatpush3.bf16.msra.mxu0 %v8698_v56  ;;  %7357 = vmatprep.mubr.f32.mxu0 %v10412_v27  ;;  %v1375_v56 = vld [vmem:[#allocation4 + $0x1c0] sm:$0xff]  ;;  %v1378_v27 = vld [vmem:[#allocation4 + $0x1d8] sm:$0xff]  ;;  %11386 = vst [vmem:[#allocation31_spill] sm:$0xff] %v10433_v41  ;;  %11387 = vst [vmem:[#allocation32_spill] sm:$0xff] %v10435_v42 }
 0x110   : > { %8703 = vmatprep.subr.bf16.mxu0 %v8702_v48 }
 0x112   : > { %7358 = vmatmul.mubr.f32.gmra.mrb[2].mxu0 %v10415_v45  ;;  %v1377_v45 = vld [vmem:[#allocation4 + $0x1d0] sm:$0xff] }
 0x113   : > { %7360 = vmatprep.mubr.f32.mxu0 %v10417_v44  ;;  %8705 = vmatpush3.bf16.msra.mxu0 %v8702_v48  ;;  %v8714_v44 = vpack.c.bf16 %v1376_v26, %v1375_v56  ;;  %v8718_v48 = vpack.c.bf16 %v1378_v27, %v1377_v45  ;;  %v10441_v56 = vld [vmem:[#allocation2 + $0x92] sm:$0xff]  ;;  %v10445_v45 = vld [vmem:[#allocation2 + $0x9a] sm:$0xff]  ;;  %v10447_v27 = vld [vmem:[#allocation2 + $0xaa] sm:$0xff] }
 0x114   : > { %8707 = vmatprep.subr.bf16.mxu0 %v8706_v43 }
 0x116   : > { %7361 = vmatmul.mubr.f32.gmra.mrb[4].mxu0 %v10421_v52  ;;  %v1380_v52 = vld [vmem:[#allocation4 + $0x1e8] sm:$0xff] }
 0x117   : > { %7363 = vmatprep.mubr.f32.mxu0 %v10423_v50  ;;  %8709 = vmatpush3.bf16.msra.mxu0 %v8706_v43  ;;  %v1379_v50 = vld [vmem:[#allocation4 + $0x1e0] sm:$0xff] }
 0x118   : > { %8711 = vmatprep.subr.bf16.mxu0 %v8710_v49  ;;  %v10439_v43 = vld [vmem:[#allocation2 + $0x82] sm:$0xff]  ;;  %v8722_v26 = vpack.c.bf16 %v1380_v52, %v1379_v50 }
 0x119   : > { %v10453_v52 = vld [vmem:[#allocation2 + $0xc2] sm:$0xff] }
 0x11a   : > { %7364 = vmatmul.mubr.f32.gmra.mrb[6].mxu0 %v10427_v46  ;;  %v1382_v46 = vld [vmem:[#allocation4 + $0x1f8] sm:$0xff]  ;;  %11389 = vst [vmem:[#allocation34_spill] sm:$0xff] %v10453_v52 }
 0x11b   : > { %7366 = vmatprep.mubr.f32.mxu0 %v10429_v47  ;;  %8713 = vmatpush3.bf16.msra.mxu0 %v8710_v49  ;;  %v1381_v47 = vld [vmem:[#allocation4 + $0x1f0] sm:$0xff] }
 0x11c   : > { %8715 = vmatprep.subr.bf16.mxu0 %v8714_v44  ;;  %v8726_v49 = vpack.c.bf16 %v1382_v46, %v1381_v47  ;;  %v10459_v46 = vld [vmem:[#allocation2 + $0xda] sm:$0xff]  ;;  %v10463_v47 = vld [vmem:[#allocation2 + $0xe2] sm:$0xff] }
 0x11d   : > { %11391 = vst [vmem:[#allocation36_spill] sm:$0xff] %v10459_v46  ;;  %11392 = vst [vmem:[#allocation37_spill] sm:$0xff] %v10463_v47 }
 0x11e   : > { %7367 = vmatmul.mubr.f32.gmra.mrb[8].mxu0 %v10433_v41  ;;  %v1674_v41 = vld [vmem:[#allocation4 + $0x208] sm:$0xff] }
 0x11f   : > { %7369 = vmatprep.mubr.f32.mxu0 %v10435_v42  ;;  %8717 = vmatpush3.bf16.msra.mxu0 %v8714_v44  ;;  %v1673_v42 = vld [vmem:[#allocation4 + $0x200] sm:$0xff]  ;;  %v10451_v44 = vld [vmem:[#allocation2 + $0xb2] sm:$0xff] }
 0x120   : > { %8719 = vmatprep.subr.bf16.mxu0 %v8718_v48  ;;  %11388 = vst [vmem:[#allocation33_spill] sm:$0xff] %v10451_v44  ;;  %v8730_v50 = vpack.c.bf16 %v1674_v41, %v1673_v42  ;;  %v10469_v41 = vld [vmem:[#allocation2 + $0xfa] sm:$0xff]  ;;  %v10471_v42 = vld [vmem:[#allocation2 + $0x10a] sm:$0xff] }
 0x121   : > { %11394 = vst [vmem:[#allocation39_spill] sm:$0xff] %v10469_v41  ;;  %11395 = vst [vmem:[#allocation40_spill] sm:$0xff] %v10471_v42 }
 0x122   : > { %7370 = vmatmul.mubr.f32.gmra.mrb[10].mxu0 %v10439_v43 }
 0x123   : > { %7372 = vmatprep.mubr.f32.mxu0 %v10441_v56  ;;  %8721 = vmatpush3.bf16.msra.mxu0 %v8718_v48  ;;  %v10457_v48 = vld [vmem:[#allocation2 + $0xca] sm:$0xff] }
 0x124   : > { %8723 = vmatprep.subr.bf16.mxu0 %v8722_v26  ;;  %11390 = vst [vmem:[#allocation35_spill] sm:$0xff] %v10457_v48 }
 0x126   : > { %7373 = vmatmul.mubr.f32.gmra.mrb[12].mxu0 %v10445_v45 }
 0x127   : > { %7375 = vmatprep.mubr.f32.mxu0 %v10447_v27  ;;  %8725 = vmatpush3.bf16.msra.mxu0 %v8722_v26  ;;  %v10465_v26 = vld [vmem:[#allocation2 + $0xf2] sm:$0xff] }
 0x128   : > { %8727 = vmatprep.subr.bf16.mxu0 %v8726_v49  ;;  %11393 = vst [vmem:[#allocation38_spill] sm:$0xff] %v10465_v26 }
 0x12a   : > { %7376 = vmatmul.mubr.f32.gmra.mrb[14].mxu0 %v10451_v44  ;;  %v1678_v44 = vld [vmem:[#allocation4 + $0x228] sm:$0xff] }
 0x12b   : > { %7378 = vmatprep.mubr.f32.mxu0 %v10453_v52  ;;  %8729 = vmatpush3.bf16.msra.mxu0 %v8726_v49  ;;  %v10475_v49 = vld [vmem:[#allocation2 + $0x112] sm:$0xff] }
 0x12c   : > { %8731 = vmatprep.subr.bf16.mxu0 %v8730_v50  ;;  %11396 = vst [vmem:[#allocation41_spill] sm:$0xff] %v10475_v49 }
 0x12e   : > { %7379 = vmatmul.mubr.f32.gmra.mrb[16].mxu0 %v10457_v48  ;;  %v10477_v48 = vld [vmem:[#allocation2 + $0x122] sm:$0xff] }
 0x12f   : > { %7381 = vmatprep.mubr.f32.mxu0 %v10459_v46  ;;  %11397 = vst [vmem:[#allocation42_spill] sm:$0xff] %v10477_v48  ;;  %v10481_v46 = vld [vmem:[#allocation2 + $0x12a] sm:$0xff] }
 0x130   : > { %11398 = vst [vmem:[#allocation43_spill] sm:$0xff] %v10481_v46 }
 0x132   : > { %7382 = vmatmul.mubr.f32.gmra.mrb[18].mxu0 %v10463_v47  ;;  %v10483_v47 = vld [vmem:[#allocation2 + $0x13a] sm:$0xff] }
 0x133   : > { %7384 = vmatprep.mubr.f32.mxu0 %v10465_v26  ;;  %11399 = vst [vmem:[#allocation44_spill] sm:$0xff] %v10483_v47  ;;  %v10487_v26 = vld [vmem:[#allocation2 + $0x142] sm:$0xff] }
 0x134   : > { %11400 = vst [vmem:[#allocation45_spill] sm:$0xff] %v10487_v26 }
 0x136   : > { %7385 = vmatmul.mubr.f32.gmra.mrb[20].mxu0 %v10469_v41  ;;  %v10489_v41 = vld [vmem:[#allocation2 + $0x152] sm:$0xff] }
 0x137   : > { %7387 = vmatprep.mubr.f32.mxu0 %v10471_v42  ;;  %11401 = vst [vmem:[#allocation46_spill] sm:$0xff] %v10489_v41  ;;  %v10493_v42 = vld [vmem:[#allocation2 + $0x15a] sm:$0xff] }
 0x138   : > { %11402 = vst [vmem:[#allocation47_spill] sm:$0xff] %v10493_v42 }
 0x13a   : > { %7388 = vmatmul.mubr.f32.gmra.mrb[22].mxu0 %v10475_v49  ;;  %v10495_v49 = vld [vmem:[#allocation2 + $0x16a] sm:$0xff] }
 0x13b   : > { %7390 = vmatprep.mubr.f32.mxu0 %v10477_v48  ;;  %11403 = vst [vmem:[#allocation48_spill] sm:$0xff] %v10495_v49  ;;  %v10499_v48 = vld [vmem:[#allocation2 + $0x172] sm:$0xff] }
 0x13c   : > { %11404 = vst [vmem:[#allocation49_spill] sm:$0xff] %v10499_v48 }
 0x13e   : > { %7391 = vmatmul.mubr.f32.gmra.mrb[24].mxu0 %v10481_v46  ;;  %v1675_v46 = vld [vmem:[#allocation4 + $0x210] sm:$0xff] }
 0x13f   : > { %7393 = vmatprep.mubr.f32.mxu0 %v10483_v47  ;;  %v1676_v47 = vld [vmem:[#allocation4 + $0x218] sm:$0xff] }
 0x140   : > { %v8734_v52 = vpack.c.bf16 %v1676_v47, %v1675_v46  ;;  %v1682_v46 = vld [vmem:[#allocation4 + $0x248] sm:$0xff]  ;;  %v1685_v47 = vld [vmem:[#allocation4 + $0x260] sm:$0xff] }
 0x142   : > { %7394 = vmatmul.mubr.f32.gmra.mrb[26].mxu0 %v10487_v26  ;;  %v1677_v26 = vld [vmem:[#allocation4 + $0x220] sm:$0xff] }
 0x143   : > { %7396 = vmatprep.mubr.f32.mxu0 %v10489_v41  ;;  %v1679_v41 = vld [vmem:[#allocation4 + $0x230] sm:$0xff] }
 0x146   : > { %7397 = vmatmul.mubr.f32.gmra.mrb[28].mxu0 %v10493_v42  ;;  %v8738_v42 = vpack.c.bf16 %v1678_v44, %v1677_v26  ;;  %v1684_v44 = vld [vmem:[#allocation4 + $0x258] sm:$0xff]  ;;  %v1686_v26 = vld [vmem:[#allocation4 + $0x268] sm:$0xff] }
 0x147   : > { %7399 = vmatprep.mubr.f32.mxu0 %v10495_v49  ;;  %v1680_v49 = vld [vmem:[#allocation4 + $0x238] sm:$0xff] }
 0x14a   : > { %7400 = vmatmul.mubr.f32.gmra.mrb[30].mxu0 %v10499_v48  ;;  %v8742_v48 = vpack.c.bf16 %v1680_v49, %v1679_v41  ;;  %v8754_v41 = vpack.c.bf16 %v1686_v26, %v1685_v47  ;;  %v1688_v49 = vld [vmem:[#allocation4 + $0x278] sm:$0xff] }
 0x14b   : > { %7434 = vmatprep.mubr.f32.mxu0 %v10317_v53  ;;  %v1681_v53 = vld [vmem:[#allocation4 + $0x240] sm:$0xff]  ;;  %v1982_v47 = vld [vmem:[#allocation4 + $0x298] sm:$0xff] }
 0x14e   : > { %7435 = vmatmul.mubr.f32.vlgmr.msra.gmra.mrb[0].mxu0 %v10321_v57  ;;  %v8746_v57 = vpack.c.bf16 %v1682_v46, %v1681_v53  ;;  %v1979_v53 = vld [vmem:[#allocation4 + $0x280] sm:$0xff]  ;;  %v1980_v46 = vld [vmem:[#allocation4 + $0x288] sm:$0xff] }
 0x14f   : > { %8733 = vmatpush3.bf16.msra.mxu0 %v8730_v50  ;;  %7437 = vmatprep.mubr.f32.mxu0 %v10323_v58  ;;  %v1683_v50 = vld [vmem:[#allocation4 + $0x250] sm:$0xff] }
 0x150   : > { %8735 = vmatprep.subr.bf16.mxu0 %v8734_v52 }
 0x152   : > { %7438 = vmatmul.mubr.f32.gmra.mrb[2].mxu0 %v10327_v63 }
 0x153   : > { %7440 = vmatprep.mubr.f32.mxu0 %v10329_v1  ;;  %8737 = vmatpush3.bf16.msra.mxu0 %v8734_v52  ;;  %v8750_v52 = vpack.c.bf16 %v1684_v44, %v1683_v50  ;;  %v10531_v50 = vld [vmem:[#allocation2 + $0x180] sm:$0xff]  ;;  %v10535_v44 = vld [vmem:[#allocation2 + $0x188] sm:$0xff] }
 0x154   : > { %8739 = vmatprep.subr.bf16.mxu0 %v8738_v42 }
 0x156   : > { %7441 = vmatmul.mubr.f32.gmra.mrb[4].mxu0 %v10333_v6 }
 0x157   : > { %7443 = vmatprep.mubr.f32.mxu0 %v10335_v7  ;;  %8741 = vmatpush3.bf16.msra.mxu0 %v8738_v42  ;;  %v1687_v42 = vld [vmem:[#allocation4 + $0x270] sm:$0xff] }
 0x158   : > { %8743 = vmatprep.subr.bf16.mxu0 %v8742_v48 }
 0x15a   : > { %7444 = vmatmul.mubr.f32.gmra.mrb[6].mxu0 %v10339_v15 }
 0x15b   : > { %7446 = vmatprep.mubr.f32.mxu0 %v10341_v16  ;;  %8745 = vmatpush3.bf16.msra.mxu0 %v8742_v48  ;;  %v8758_v48 = vpack.c.bf16 %v1688_v49, %v1687_v42  ;;  %v1984_v42 = vld [vmem:[#allocation4 + $0x2a8] sm:$0xff] }
 0x15c   : > { %8747 = vmatprep.subr.bf16.mxu0 %v8746_v57 }
 0x15e   : > { %7447 = vmatmul.mubr.f32.gmra.mrb[8].mxu0 %v10345_v22 }
 0x15f   : > { %7449 = vmatprep.mubr.f32.mxu0 %v10347_v25  ;;  %8749 = vmatpush3.bf16.msra.mxu0 %v8746_v57  ;;  %v8762_v57 = vpack.c.bf16 %v1980_v46, %v1979_v53  ;;  %v1986_v53 = vld [vmem:[#allocation4 + $0x2b8] sm:$0xff] }
 0x160   : > { %8751 = vmatprep.subr.bf16.mxu0 %v8750_v52 }
 0x162   : > { %7450 = vmatmul.mubr.f32.gmra.mrb[10].mxu0 %v10351_v31 }
 0x163   : > { %7452 = vmatprep.mubr.f32.mxu0 %v10353_v32  ;;  %8753 = vmatpush3.bf16.msra.mxu0 %v8750_v52  ;;  %v1981_v52 = vld [vmem:[#allocation4 + $0x290] sm:$0xff] }
 0x164   : > { %8755 = vmatprep.subr.bf16.mxu0 %v8754_v41  ;;  %v8766_v26 = vpack.c.bf16 %v1982_v47, %v1981_v52  ;;  %v1988_v52 = vld [vmem:[#allocation4 + $0x2c8] sm:$0xff] }
 0x165   : > { %v1992_v47 = vld [vmem:[#allocation4 + $0x2e8] sm:$0xff] }
 0x166   : > { %7453 = vmatmul.mubr.f32.gmra.mrb[12].mxu0 %v10357_v54 }
 0x167   : > { %7455 = vmatprep.mubr.f32.mxu0 %v10359_v55  ;;  %8757 = vmatpush3.bf16.msra.mxu0 %v8754_v41  ;;  %v1983_v41 = vld [vmem:[#allocation4 + $0x2a0] sm:$0xff] }
 0x168   : > { %8759 = vmatprep.subr.bf16.mxu0 %v8758_v48  ;;  %v8770_v49 = vpack.c.bf16 %v1984_v42, %v1983_v41  ;;  %v2287_v41 = vld [vmem:[#allocation4 + $0x308] sm:$0xff]  ;;  %v11412_v42 = vld [vmem:[#allocation21_spill] sm:$0xff] }
 0x16a   : > { %7456 = vmatmul.mubr.f32.gmra.mrb[14].mxu0 %v10363_v59 }
 0x16b   : > { %7458 = vmatprep.mubr.f32.mxu0 %v10365_v60  ;;  %8761 = vmatpush3.bf16.msra.mxu0 %v8758_v48  ;;  %v1985_v48 = vld [vmem:[#allocation4 + $0x2b0] sm:$0xff] }
 0x16c   : > { %8763 = vmatprep.subr.bf16.mxu0 %v8762_v57  ;;  %v8774_v46 = vpack.c.bf16 %v1986_v53, %v1985_v48  ;;  %v2288_v48 = vld [vmem:[#allocation4 + $0x310] sm:$0xff]  ;;  %v2289_v53 = vld [vmem:[#allocation4 + $0x318] sm:$0xff] }
 0x16e   : > { %7459 = vmatmul.mubr.f32.gmra.mrb[16].mxu0 %v10369_v61 }
 0x16f   : > { %7461 = vmatprep.mubr.f32.mxu0 %v10371_v0 }
 0x172   : > { %7462 = vmatmul.mubr.f32.gmra.mrb[18].mxu0 %v10375_v2 }
 0x173   : > { %7464 = vmatprep.mubr.f32.mxu0 %v10377_v5 }
 0x176   : > { %7465 = vmatmul.mubr.f32.gmra.mrb[20].mxu0 %v10381_v10 }
 0x177   : > { %7467 = vmatprep.mubr.f32.mxu0 %v10383_v11 }
 0x17a   : > { %7468 = vmatmul.mubr.f32.gmra.mrb[22].mxu0 %v10387_v12 }
 0x17b   : > { %7470 = vmatprep.mubr.f32.mxu0 %v10389_v17 }
 0x17e   : > { %7471 = vmatmul.mubr.f32.gmra.mrb[24].mxu0 %v10393_v20 }
 0x17f   : > { %7473 = vmatprep.mubr.f32.mxu0 %v10395_v21 }
 0x182   : > { %7474 = vmatmul.mubr.f32.gmra.mrb[26].mxu0 %v10403_v30 }
 0x183   : > { %7476 = vmatprep.mubr.f32.mxu0 %v10405_v35 }
 0x186   : > { %7477 = vmatmul.mubr.f32.gmra.mrb[28].mxu0 %v10409_v51 }
 0x187   : > { %7479 = vmatprep.mubr.f32.mxu0 %v10531_v50 }
 0x18a   : > { %7480 = vmatmul.mubr.f32.gmra.mrb[30].mxu0 %v10535_v44 }
 0x18b   : > { %7514 = vmatprep.mubr.f32.mxu0 %v10226_v62  ;;  %v1987_v62 = vld [vmem:[#allocation4 + $0x2c0] sm:$0xff] }
 0x18e   : > { %7515 = vmatmul.mubr.f32.vlgmr.msra.gmra.mrb[0].mxu0 %v10229_v3  ;;  %v8778_v3 = vpack.c.bf16 %v1988_v52, %v1987_v62  ;;  %v8798_v62 = vpack.c.bf16 %v2289_v53, %v2288_v48  ;;  %v2290_v52 = vld [vmem:[#allocation4 + $0x320] sm:$0xff]  ;;  %v2301_v48 = vld [vmem:[#allocation4 + $0x378] sm:$0xff] }
 0x18f   : > { %8765 = vmatpush3.bf16.msra.mxu0 %v8762_v57  ;;  %7517 = vmatprep.mubr.f32.mxu0 %v10231_v4  ;;  %v1989_v4 = vld [vmem:[#allocation4 + $0x2d0] sm:$0xff]  ;;  %v1990_v57 = vld [vmem:[#allocation4 + $0x2d8] sm:$0xff] }
 0x190   : > { %8767 = vmatprep.subr.bf16.mxu0 %v8766_v26 }
 0x192   : > { %7518 = vmatmul.mubr.f32.gmra.mrb[2].mxu0 %v10235_v8  ;;  %v8782_v8 = vpack.c.bf16 %v1990_v57, %v1989_v4  ;;  %v11416_v4 = vld [vmem:[#allocation25_spill] sm:$0xff]  ;;  %v11417_v57 = vld [vmem:[#allocation26_spill] sm:$0xff] }
 0x193   : > { %7520 = vmatprep.mubr.f32.mxu0 %v10237_v9  ;;  %8769 = vmatpush3.bf16.msra.mxu0 %v8766_v26  ;;  %v1991_v9 = vld [vmem:[#allocation4 + $0x2e0] sm:$0xff]  ;;  %v1994_v26 = vld [vmem:[#allocation4 + $0x2f8] sm:$0xff] }
 0x194   : > { %8771 = vmatprep.subr.bf16.mxu0 %v8770_v49 }
 0x196   : > { %7521 = vmatmul.mubr.f32.gmra.mrb[4].mxu0 %v10241_v13  ;;  %v8786_v13 = vpack.c.bf16 %v1992_v47, %v1991_v9  ;;  %v2292_v9 = vld [vmem:[#allocation4 + $0x330] sm:$0xff]  ;;  %v2293_v47 = vld [vmem:[#allocation4 + $0x338] sm:$0xff] }
 0x197   : > { %7523 = vmatprep.mubr.f32.mxu0 %v10243_v14  ;;  %8773 = vmatpush3.bf16.msra.mxu0 %v8770_v49  ;;  %v1993_v14 = vld [vmem:[#allocation4 + $0x2f0] sm:$0xff] }
 0x198   : > { %8775 = vmatprep.subr.bf16.mxu0 %v8774_v46  ;;  %v10571_v49 = vld [vmem:[#allocation2 + $0x189] sm:$0xff] }
 0x19a   : > { %7524 = vmatmul.mubr.f32.gmra.mrb[6].mxu0 %v10247_v18  ;;  %v8790_v18 = vpack.c.bf16 %v1994_v26, %v1993_v14  ;;  %v11419_v14 = vld [vmem:[#allocation28_spill] sm:$0xff]  ;;  %v8806_v26 = vpack.c.bf16 %v2293_v47, %v2292_v9  ;;  %v11432_v9 = vld [vmem:[#allocation41_spill] sm:$0xff]  ;;  %v11433_v47 = vld [vmem:[#allocation42_spill] sm:$0xff] }
 0x19b   : > { %7526 = vmatprep.mubr.f32.mxu0 %v10249_v19  ;;  %8777 = vmatpush3.bf16.msra.mxu0 %v8774_v46  ;;  %v2286_v19 = vld [vmem:[#allocation4 + $0x300] sm:$0xff]  ;;  %v11415_v46 = vld [vmem:[#allocation24_spill] sm:$0xff] }
 0x19c   : > { %8779 = vmatprep.subr.bf16.mxu0 %v8778_v3 }
 0x19e   : > { %7527 = vmatmul.mubr.f32.gmra.mrb[8].mxu0 %v10253_v23  ;;  %v8794_v23 = vpack.c.bf16 %v2287_v41, %v2286_v19  ;;  %v2295_v19 = vld [vmem:[#allocation4 + $0x348] sm:$0xff]  ;;  %v11420_v41 = vld [vmem:[#allocation29_spill] sm:$0xff] }
 0x19f   : > { %7529 = vmatprep.mubr.f32.mxu0 %v10255_v24  ;;  %8781 = vmatpush3.bf16.msra.mxu0 %v8778_v3  ;;  %v11405_v24 = vld [vmem:[#allocation14_spill] sm:$0xff]  ;;  %v2291_v3 = vld [vmem:[#allocation4 + $0x328] sm:$0xff] }
 0x1a0   : > { %8783 = vmatprep.subr.bf16.mxu0 %v8782_v8 }
 0x1a2   : > { %7530 = vmatmul.mubr.f32.gmra.mrb[10].mxu0 %v10259_v28  ;;  %v11406_v28 = vld [vmem:[#allocation15_spill] sm:$0xff] }
 0x1a3   : > { %7532 = vmatprep.mubr.f32.mxu0 %v10261_v29  ;;  %8785 = vmatpush3.bf16.msra.mxu0 %v8782_v8  ;;  %v11407_v29 = vld [vmem:[#allocation16_spill] sm:$0xff]  ;;  %v8802_v8 = vpack.c.bf16 %v2291_v3, %v2290_v52  ;;  %v11424_v52 = vld [vmem:[#allocation33_spill] sm:$0xff]  ;;  %v11425_v3 = vld [vmem:[#allocation34_spill] sm:$0xff] }
 0x1a4   : > { %8787 = vmatprep.subr.bf16.mxu0 %v8786_v13 }
 0x1a6   : > { %7533 = vmatmul.mubr.f32.gmra.mrb[12].mxu0 %v10265_v33  ;;  %v11408_v33 = vld [vmem:[#allocation17_spill] sm:$0xff] }
 0x1a7   : > { %7535 = vmatprep.mubr.f32.mxu0 %v10267_v34  ;;  %8789 = vmatpush3.bf16.msra.mxu0 %v8786_v13  ;;  %v11409_v34 = vld [vmem:[#allocation18_spill] sm:$0xff]  ;;  %v11418_v13 = vld [vmem:[#allocation27_spill] sm:$0xff] }
 0x1a8   : > { %8791 = vmatprep.subr.bf16.mxu0 %v8790_v18 }
 0x1aa   : > { %7536 = vmatmul.mubr.f32.gmra.mrb[14].mxu0 %v10271_v36  ;;  %v11410_v36 = vld [vmem:[#allocation19_spill] sm:$0xff] }
 0x1ab   : > { %7538 = vmatprep.mubr.f32.mxu0 %v10273_v37  ;;  %8793 = vmatpush3.bf16.msra.mxu0 %v8790_v18  ;;  %v11411_v37 = vld [vmem:[#allocation20_spill] sm:$0xff]  ;;  %v2294_v18 = vld [vmem:[#allocation4 + $0x340] sm:$0xff] }
 0x1ac   : > { %8795 = vmatprep.subr.bf16.mxu0 %v8794_v23 }
 0x1ae   : > { %7539 = vmatmul.mubr.f32.gmra.mrb[16].mxu0 %v10277_v38  ;;  %v11413_v38 = vld [vmem:[#allocation22_spill] sm:$0xff] }
 0x1af   : > { %7541 = vmatprep.mubr.f32.mxu0 %v10279_v39  ;;  %v10567_v39 = vld [vmem:[#allocation2 + $0x181] sm:$0xff] }
 0x1b2   : > { %7542 = vmatmul.mubr.f32.gmra.mrb[18].mxu0 %v10283_v40  ;;  %v11414_v40 = vld [vmem:[#allocation23_spill] sm:$0xff] }
 0x1b3   : > { %7544 = vmatprep.mubr.f32.mxu0 %v11405_v24  ;;  %v11421_v24 = vld [vmem:[#allocation30_spill] sm:$0xff] }
 0x1b6   : > { %7545 = vmatmul.mubr.f32.gmra.mrb[20].mxu0 %v11406_v28  ;;  %v2296_v28 = vld [vmem:[#allocation4 + $0x350] sm:$0xff] }
 0x1b7   : > { %7547 = vmatprep.mubr.f32.mxu0 %v11407_v29  ;;  %v2297_v29 = vld [vmem:[#allocation4 + $0x358] sm:$0xff] }
 0x1ba   : > { %7548 = vmatmul.mubr.f32.gmra.mrb[22].mxu0 %v11408_v33  ;;  %v11422_v33 = vld [vmem:[#allocation31_spill] sm:$0xff] }
 0x1bb   : > { %7550 = vmatprep.mubr.f32.mxu0 %v11409_v34  ;;  %v11423_v34 = vld [vmem:[#allocation32_spill] sm:$0xff] }
 0x1be   : > { %7551 = vmatmul.mubr.f32.gmra.mrb[24].mxu0 %v11410_v36  ;;  %v8814_v36 = vpack.c.bf16 %v2297_v29, %v2296_v28  ;;  %v10607_v28 = vld [vmem:[#allocation2 + $0x18a] sm:$0xff] }
 0x1bf   : > { %7553 = vmatprep.mubr.f32.mxu0 %v11411_v37  ;;  %v2298_v37 = vld [vmem:[#allocation4 + $0x360] sm:$0xff]  ;;  %v2594_v29 = vld [vmem:[#allocation4 + $0x390] sm:$0xff] }
 0x1c2   : > { %7554 = vmatmul.mubr.f32.gmra.mrb[26].mxu0 %v11412_v42  ;;  %v2299_v42 = vld [vmem:[#allocation4 + $0x368] sm:$0xff] }
 0x1c3   : > { %7556 = vmatprep.mubr.f32.mxu0 %v11413_v38  ;;  %v8818_v38 = vpack.c.bf16 %v2299_v42, %v2298_v37  ;;  %v2597_v37 = vld [vmem:[#allocation4 + $0x3a8] sm:$0xff] }
 0x1c6   : > { %7557 = vmatmul.mubr.f32.gmra.mrb[28].mxu0 %v11414_v40  ;;  %v2300_v40 = vld [vmem:[#allocation4 + $0x370] sm:$0xff] }
 0x1c7   : > { %7559 = vmatprep.mubr.f32.mxu0 %v10567_v39  ;;  %v8822_v53 = vpack.c.bf16 %v2301_v48, %v2300_v40  ;;  %v2599_v40 = vld [vmem:[#allocation4 + $0x3b8] sm:$0xff] }
 0x1ca   : > { %7560 = vmatmul.mubr.f32.gmra.mrb[30].mxu0 %v10571_v49 }
 0x1cb   : > { %7594 = vmatprep.mubr.f32.mxu0 %v11415_v46  ;;  %v2592_v46 = vld [vmem:[#allocation4 + $0x380] sm:$0xff] }
 0x1ce   : > { %7595 = vmatmul.mubr.f32.vlgmr.msra.gmra.mrb[0].mxu0 %v11416_v4  ;;  %v11427_v4 = vld [vmem:[#allocation36_spill] sm:$0xff] }
 0x1cf   : > { %8797 = vmatpush3.bf16.msra.mxu0 %v8794_v23  ;;  %7597 = vmatprep.mubr.f32.mxu0 %v11417_v57  ;;  %v8810_v23 = vpack.c.bf16 %v2295_v19, %v2294_v18  ;;  %v11430_v57 = vld [vmem:[#allocation39_spill] sm:$0xff]  ;;  %v11437_v18 = vld [vmem:[#allocation46_spill] sm:$0xff] }
 0x1d0   : > { %8799 = vmatprep.subr.bf16.mxu0 %v8798_v62  ;;  %v11438_v19 = vld [vmem:[#allocation47_spill] sm:$0xff] }
 0x1d2   : > { %7598 = vmatmul.mubr.f32.gmra.mrb[2].mxu0 %v11418_v13  ;;  %v11434_v13 = vld [vmem:[#allocation43_spill] sm:$0xff] }
 0x1d3   : > { %7600 = vmatprep.mubr.f32.mxu0 %v11419_v14  ;;  %8801 = vmatpush3.bf16.msra.mxu0 %v8798_v62  ;;  %v2593_v62 = vld [vmem:[#allocation4 + $0x388] sm:$0xff]  ;;  %v11435_v14 = vld [vmem:[#allocation44_spill] sm:$0xff] }
 0x1d4   : > { %8803 = vmatprep.subr.bf16.mxu0 %v8802_v8 }
 0x1d6   : > { %7601 = vmatmul.mubr.f32.gmra.mrb[4].mxu0 %v11420_v41  ;;  %v11439_v41 = vld [vmem:[#allocation48_spill] sm:$0xff] }
 0x1d7   : > { %7603 = vmatprep.mubr.f32.mxu0 %v11421_v24  ;;  %8805 = vmatpush3.bf16.msra.mxu0 %v8802_v8  ;;  %v11431_v8 = vld [vmem:[#allocation40_spill] sm:$0xff]  ;;  %v10603_v24 = vld [vmem:[#allocation2 + $0x182] sm:$0xff] }
 0x1d8   : > { %8807 = vmatprep.subr.bf16.mxu0 %v8806_v26 }
 0x1da   : > { %7604 = vmatmul.mubr.f32.gmra.mrb[6].mxu0 %v11422_v33  ;;  %v2595_v33 = vld [vmem:[#allocation4 + $0x398] sm:$0xff] }
 0x1db   : > { %7606 = vmatprep.mubr.f32.mxu0 %v11423_v34  ;;  %8809 = vmatpush3.bf16.msra.mxu0 %v8806_v26  ;;  %v11436_v26 = vld [vmem:[#allocation45_spill] sm:$0xff]  ;;  %v8830_v34 = vpack.c.bf16 %v2595_v33, %v2594_v29  ;;  %v2908_v33 = vld [vmem:[#allocation4 + $0x450] sm:$0xff] }
 0x1dc   : > { %8811 = vmatprep.subr.bf16.mxu0 %v8810_v23 }
 0x1de   : > { %7607 = vmatmul.mubr.f32.gmra.mrb[8].mxu0 %v10439_v43  ;;  %v8826_v43 = vpack.c.bf16 %v2593_v62, %v2592_v46  ;;  %v2603_v46 = vld [vmem:[#allocation4 + $0x3d8] sm:$0xff]  ;;  %v2605_v62 = vld [vmem:[#allocation4 + $0x3e8] sm:$0xff] }
 0x1df   : > { %7609 = vmatprep.mubr.f32.mxu0 %v10441_v56  ;;  %8813 = vmatpush3.bf16.msra.mxu0 %v8810_v23  ;;  %v11426_v56 = vld [vmem:[#allocation35_spill] sm:$0xff]  ;;  %v11440_v23 = vld [vmem:[#allocation49_spill] sm:$0xff] }
 0x1e0   : > { %8815 = vmatprep.subr.bf16.mxu0 %v8814_v36 }
 0x1e2   : > { %7610 = vmatmul.mubr.f32.gmra.mrb[10].mxu0 %v10445_v45  ;;  %v11428_v45 = vld [vmem:[#allocation37_spill] sm:$0xff] }
 0x1e3   : > { %7612 = vmatprep.mubr.f32.mxu0 %v10447_v27  ;;  %8817 = vmatpush3.bf16.msra.mxu0 %v8814_v36  ;;  %v11429_v27 = vld [vmem:[#allocation38_spill] sm:$0xff] }
 0x1e4   : > { %8819 = vmatprep.subr.bf16.mxu0 %v8818_v38  ;;  %v2596_v36 = vld [vmem:[#allocation4 + $0x3a0] sm:$0xff] }
 0x1e5   : > { %v8834_v42 = vpack.c.bf16 %v2597_v37, %v2596_v36  ;;  %v2568_v36 = vld [vmem:[#allocation2 + $0x99] sm:$0xff]  ;;  %v2569_v37 = vld [vmem:[#allocation2 + $0xa9] sm:$0xff] }
 0x1e6   : > { %7613 = vmatmul.mubr.f32.gmra.mrb[12].mxu0 %v11424_v52  ;;  %v2607_v52 = vld [vmem:[#allocation4 + $0x3f8] sm:$0xff] }
 0x1e7   : > { %7615 = vmatprep.mubr.f32.mxu0 %v11425_v3  ;;  %8821 = vmatpush3.bf16.msra.mxu0 %v8818_v38  ;;  %v2598_v38 = vld [vmem:[#allocation4 + $0x3b0] sm:$0xff]  ;;  %v2899_v3 = vld [vmem:[#allocation4 + $0x408] sm:$0xff] }
 0x1e8   : > { %8823 = vmatprep.subr.bf16.mxu0 %v8822_v53  ;;  %v8838_v48 = vpack.c.bf16 %v2599_v40, %v2598_v38  ;;  %v2910_v38 = vld [vmem:[#allocation4 + $0x460] sm:$0xff]  ;;  %v2911_v40 = vld [vmem:[#allocation4 + $0x468] sm:$0xff] }
 0x1ea   : > { %7616 = vmatmul.mubr.f32.gmra.mrb[14].mxu0 %v11426_v56 }
 0x1eb   : > { %7618 = vmatprep.mubr.f32.mxu0 %v11427_v4  ;;  %8825 = vmatpush3.bf16.msra.mxu0 %v8822_v53  ;;  %v2601_v53 = vld [vmem:[#allocation4 + $0x3c8] sm:$0xff]  ;;  %v2905_v4 = vld [vmem:[#allocation4 + $0x438] sm:$0xff] }
 0x1ec   : > { %8827 = vmatprep.subr.bf16.mxu0 %v8826_v43 }
 0x1ee   : > { %7619 = vmatmul.mubr.f32.gmra.mrb[16].mxu0 %v11428_v45  ;;  %v3401_v45 = vld [vmem:[#allocation7 + $0xb0] sm:$0xff] }
 0x1ef   : > { %7621 = vmatprep.mubr.f32.mxu0 %v11429_v27  ;;  %v3402_v27 = vld [vmem:[#allocation7 + $0xb8] sm:$0xff] }
 0x1f2   : > { %7622 = vmatmul.mubr.f32.gmra.mrb[18].mxu0 %v11430_v57  ;;  %v2564_v57 = vld [vmem:[#allocation2 + $0x69] sm:$0xff] }
 0x1f3   : > { %7624 = vmatprep.mubr.f32.mxu0 %v11431_v8  ;;  %v2565_v8 = vld [vmem:[#allocation2 + $0x79] sm:$0xff] }
 0x1f6   : > { %7625 = vmatmul.mubr.f32.gmra.mrb[20].mxu0 %v11432_v9 }
 0x1f7   : > { %7627 = vmatprep.mubr.f32.mxu0 %v11433_v47  ;;  %v2906_v47 = vld [vmem:[#allocation4 + $0x440] sm:$0xff] }
 0x1fa   : > { %7628 = vmatmul.mubr.f32.gmra.mrb[22].mxu0 %v11434_v13  ;;  %v8902_v13 = vpack.c.bf16 %v3402_v27, %v3401_v45  ;;  %v2882_v45 = vld [vmem:[#allocation2 + $0xfa] sm:$0xff]  ;;  %v2883_v27 = vld [vmem:[#allocation2 + $0x10a] sm:$0xff] }
 0x1fb   : > { %7630 = vmatprep.mubr.f32.mxu0 %v11435_v14  ;;  %v2907_v14 = vld [vmem:[#allocation4 + $0x448] sm:$0xff] }
 0x1fe   : > { %7631 = vmatmul.mubr.f32.gmra.mrb[24].mxu0 %v11436_v26  ;;  %v3403_v26 = vld [vmem:[#allocation7 + $0xc0] sm:$0xff] }
 0x1ff   : > { %7633 = vmatprep.mubr.f32.mxu0 %v11437_v18  ;;  %v3404_v18 = vld [vmem:[#allocation7 + $0xc8] sm:$0xff] }
 0x200   : > { %v8906_v29 = vpack.c.bf16 %v3404_v18, %v3403_v26  ;;  %v2890_v26 = vld [vmem:[#allocation2 + $0x15a] sm:$0xff]  ;;  %v2891_v18 = vld [vmem:[#allocation2 + $0x16a] sm:$0xff] }
 0x202   : > { %7634 = vmatmul.mubr.f32.gmra.mrb[26].mxu0 %v11438_v19  ;;  %v2566_v19 = vld [vmem:[#allocation2 + $0x81] sm:$0xff] }
 0x203   : > { %7636 = vmatprep.mubr.f32.mxu0 %v11439_v41  ;;  %v2567_v41 = vld [vmem:[#allocation2 + $0x91] sm:$0xff] }
 0x206   : > { %7637 = vmatmul.mubr.f32.gmra.mrb[28].mxu0 %v11440_v23  ;;  %v8874_v23 = vpack.c.bf16 %v2907_v14, %v2906_v47  ;;  %v2887_v47 = vld [vmem:[#allocation2 + $0x13a] sm:$0xff]  ;;  %v2889_v14 = vld [vmem:[#allocation2 + $0x152] sm:$0xff] }
 0x207   : > { %7639 = vmatprep.mubr.f32.mxu0 %v10603_v24 }
 0x20a   : > { %7640 = vmatmul.mubr.f32.gmra.mrb[30].mxu0 %v10607_v28 }
 0x20b   : > { %7674 = vmatprep.mubr.f32.mxu0 %v10323_v58  ;;  %v2600_v58 = vld [vmem:[#allocation4 + $0x3c0] sm:$0xff] }
 0x20e   : > { %7675 = vmatmul.mubr.f32.vlgmr.msra.gmra.mrb[0].mxu0 %v10327_v63  ;;  %v8842_v63 = vpack.c.bf16 %v2601_v53, %v2600_v58  ;;  %v2571_v58 = vld [vmem:[#allocation2 + $0xc1] sm:$0xff]  ;;  %v8882_v53 = vpack.c.bf16 %v2911_v40, %v2910_v38  ;;  %v3409_v38 = vld [vmem:[#allocation7 + $0xf0] sm:$0xff]  ;;  %v3410_v40 = vld [vmem:[#allocation7 + $0xf8] sm:$0xff] }
 0x20f   : > { %8829 = vmatpush3.bf16.msra.mxu0 %v8826_v43  ;;  %7677 = vmatprep.mubr.f32.mxu0 %v10329_v1  ;;  %v2602_v1 = vld [vmem:[#allocation4 + $0x3d0] sm:$0xff] }
 0x210   : > { %8831 = vmatprep.subr.bf16.mxu0 %v8830_v34  ;;  %v2904_v43 = vld [vmem:[#allocation4 + $0x430] sm:$0xff] }
 0x211   : > { %v8870_v9 = vpack.c.bf16 %v2905_v4, %v2904_v43  ;;  %v2879_v43 = vld [vmem:[#allocation2 + $0xda] sm:$0xff]  ;;  %v2881_v4 = vld [vmem:[#allocation2 + $0xf2] sm:$0xff] }
 0x212   : > { %7678 = vmatmul.mubr.f32.gmra.mrb[2].mxu0 %v10333_v6  ;;  %v8846_v6 = vpack.c.bf16 %v2603_v46, %v2602_v1  ;;  %v2913_v1 = vld [vmem:[#allocation4 + $0x478] sm:$0xff]  ;;  %v2572_v46 = vld [vmem:[#allocation2 + $0xc9] sm:$0xff] }
 0x213   : > { %7680 = vmatprep.mubr.f32.mxu0 %v10335_v7  ;;  %8833 = vmatpush3.bf16.msra.mxu0 %v8830_v34  ;;  %v2604_v7 = vld [vmem:[#allocation4 + $0x3e0] sm:$0xff]  ;;  %v2909_v34 = vld [vmem:[#allocation4 + $0x458] sm:$0xff] }
 0x214   : > { %8835 = vmatprep.subr.bf16.mxu0 %v8834_v42 }
 0x216   : > { %7681 = vmatmul.mubr.f32.gmra.mrb[4].mxu0 %v10339_v15  ;;  %v8850_v15 = vpack.c.bf16 %v2605_v62, %v2604_v7  ;;  %v2574_v62 = vld [vmem:[#allocation2 + $0xe1] sm:$0xff] }
 0x217   : > { %7683 = vmatprep.mubr.f32.mxu0 %v10341_v16  ;;  %8837 = vmatpush3.bf16.msra.mxu0 %v8834_v42  ;;  %v2606_v16 = vld [vmem:[#allocation4 + $0x3f0] sm:$0xff]  ;;  %v8878_v42 = vpack.c.bf16 %v2909_v34, %v2908_v33  ;;  %v3406_v33 = vld [vmem:[#allocation7 + $0xd8] sm:$0xff] }
 0x218   : > { %8839 = vmatprep.subr.bf16.mxu0 %v8838_v48 }
 0x21a   : > { %7684 = vmatmul.mubr.f32.gmra.mrb[6].mxu0 %v10345_v22  ;;  %v8854_v22 = vpack.c.bf16 %v2607_v52, %v2606_v16  ;;  %v2576_v16 = vld [vmem:[#allocation2 + $0xf9] sm:$0xff]  ;;  %v2577_v52 = vld [vmem:[#allocation2 + $0x109] sm:$0xff] }
 0x21b   : > { %7686 = vmatprep.mubr.f32.mxu0 %v10347_v25  ;;  %8841 = vmatpush3.bf16.msra.mxu0 %v8838_v48  ;;  %v2898_v25 = vld [vmem:[#allocation4 + $0x400] sm:$0xff]  ;;  %v2570_v48 = vld [vmem:[#allocation2 + $0xb1] sm:$0xff] }
 0x21c   : > { %8843 = vmatprep.subr.bf16.mxu0 %v8842_v63 }
 0x21e   : > { %7687 = vmatmul.mubr.f32.gmra.mrb[8].mxu0 %v10351_v31  ;;  %v8858_v31 = vpack.c.bf16 %v2899_v3, %v2898_v25  ;;  %v2579_v25 = vld [vmem:[#allocation2 + $0x121] sm:$0xff]  ;;  %v2580_v3 = vld [vmem:[#allocation2 + $0x129] sm:$0xff] }
 0x21f   : > { %7689 = vmatprep.mubr.f32.mxu0 %v10353_v32  ;;  %8845 = vmatpush3.bf16.msra.mxu0 %v8842_v63  ;;  %v10640_v32 = vld [vmem:[#allocation2] sm:$0xff]  ;;  %v2912_v63 = vld [vmem:[#allocation4 + $0x470] sm:$0xff] }
 0x220   : > { %8847 = vmatprep.subr.bf16.mxu0 %v8846_v6  ;;  %v8886_v7 = vpack.c.bf16 %v2913_v1, %v2912_v63  ;;  %v3348_v1 = vld [vmem:[#allocation7 + $0x10] sm:$0xff] }
 0x222   : > { %7690 = vmatmul.mubr.f32.gmra.mrb[10].mxu0 %v10357_v54  ;;  %v2559_v54 = vld [vmem:[#allocation2 + $0x31] sm:$0xff] }
 0x223   : > { %7692 = vmatprep.mubr.f32.mxu0 %v10359_v55  ;;  %8849 = vmatpush3.bf16.msra.mxu0 %v8846_v6  ;;  %v2900_v55 = vld [vmem:[#allocation4 + $0x410] sm:$0xff]  ;;  %v2573_v6 = vld [vmem:[#allocation2 + $0xd9] sm:$0xff] }
 0x224   : > { %8851 = vmatprep.subr.bf16.mxu0 %v8850_v15 }
 0x226   : > { %7693 = vmatmul.mubr.f32.gmra.mrb[12].mxu0 %v10363_v59  ;;  %v2901_v59 = vld [vmem:[#allocation4 + $0x418] sm:$0xff] }
 0x227   : > { %7695 = vmatprep.mubr.f32.mxu0 %v10365_v60  ;;  %8853 = vmatpush3.bf16.msra.mxu0 %v8850_v15  ;;  %v3395_v60 = vld [vmem:[#allocation7 + $0x80] sm:$0xff]  ;;  %v2575_v15 = vld [vmem:[#allocation2 + $0xf1] sm:$0xff] }
 0x228   : > { %8855 = vmatprep.subr.bf16.mxu0 %v8854_v22 }
 0x22a   : > { %7696 = vmatmul.mubr.f32.gmra.mrb[14].mxu0 %v10369_v61  ;;  %v3396_v61 = vld [vmem:[#allocation7 + $0x88] sm:$0xff] }
 0x22b   : > { %7698 = vmatprep.mubr.f32.mxu0 %v10371_v0  ;;  %8857 = vmatpush3.bf16.msra.mxu0 %v8854_v22  ;;  %v3397_v0 = vld [vmem:[#allocation7 + $0x90] sm:$0xff] }
 0x22c   : > { %8859 = vmatprep.subr.bf16.mxu0 %v8858_v31  ;;  %v2578_v22 = vld [vmem:[#allocation2 + $0x111] sm:$0xff] }
 0x22e   : > { %7699 = vmatmul.mubr.f32.gmra.mrb[16].mxu0 %v10375_v2  ;;  %v2560_v2 = vld [vmem:[#allocation2 + $0x39] sm:$0xff] }
 0x22f   : > { %7701 = vmatprep.mubr.f32.mxu0 %v10377_v5  ;;  %v8890_v5 = vpack.c.bf16 %v3396_v61, %v3395_v60  ;;  %v2585_v60 = vld [vmem:[#allocation2 + $0x169] sm:$0xff]  ;;  %v2586_v61 = vld [vmem:[#allocation2 + $0x171] sm:$0xff] }
 0x231   : > { %8891 = vmatprep.subr.bf16.mxu1 %v8890_v5 }
 0x232   : > { %7702 = vmatmul.mubr.f32.gmra.mrb[18].mxu0 %v10381_v10  ;;  %v3398_v10 = vld [vmem:[#allocation7 + $0x98] sm:$0xff]  ;;  %8893 = vmatpush3.bf16.msra.mxu1 %v8890_v5 }
 0x233   : > { %7704 = vmatprep.mubr.f32.mxu0 %v10383_v11  ;;  %v2561_v11 = vld [vmem:[#allocation2 + $0x49] sm:$0xff]  ;;  %v2865_v5 = vld [vmem:[#allocation2 + $0x32] sm:$0xff] }
 0x236   : > { %7705 = vmatmul.mubr.f32.gmra.mrb[20].mxu0 %v10387_v12  ;;  %v8862_v12 = vpack.c.bf16 %v2901_v59, %v2900_v55  ;;  %v2583_v55 = vld [vmem:[#allocation2 + $0x151] sm:$0xff]  ;;  %v2584_v59 = vld [vmem:[#allocation2 + $0x159] sm:$0xff] }
 0x237   : > { %7707 = vmatprep.mubr.f32.mxu0 %v10389_v17  ;;  %v2902_v17 = vld [vmem:[#allocation4 + $0x420] sm:$0xff] }
 0x23a   : > { %7708 = vmatmul.mubr.f32.gmra.mrb[22].mxu0 %v10393_v20  ;;  %v8894_v20 = vpack.c.bf16 %v3398_v10, %v3397_v0  ;;  %v2589_v0 = vld [vmem:[#allocation2 + $0x199] sm:$0xff] }
 0x23b   : > { %7710 = vmatprep.mubr.f32.mxu0 %v10395_v21  ;;  %v2903_v21 = vld [vmem:[#allocation4 + $0x428] sm:$0xff]  ;;  %v2866_v10 = vld [vmem:[#allocation2 + $0x3a] sm:$0xff] }
 0x23c   : > { %8895 = vmatprep.subr.bf16.mxu1 %v8894_v20 }
 0x23d   : > { %8897 = vmatpush3.bf16.msra.mxu1 %v8894_v20  ;;  %v2870_v20 = vld [vmem:[#allocation2 + $0x6a] sm:$0xff] }
 0x23e   : > { %7711 = vmatmul.mubr.f32.gmra.mrb[24].mxu0 %v10403_v30  ;;  %v3399_v30 = vld [vmem:[#allocation7 + $0xa0] sm:$0xff] }
 0x23f   : > { %7713 = vmatprep.mubr.f32.mxu0 %v10405_v35  ;;  %v3400_v35 = vld [vmem:[#allocation7 + $0xa8] sm:$0xff] }
 0x240   : > { %v8898_v56 = vpack.c.bf16 %v3400_v35, %v3399_v30  ;;  %v2873_v30 = vld [vmem:[#allocation2 + $0x92] sm:$0xff]  ;;  %v2875_v35 = vld [vmem:[#allocation2 + $0xaa] sm:$0xff] }
 0x242   : > { %7714 = vmatmul.mubr.f32.gmra.mrb[26].mxu0 %v10409_v51  ;;  %v2562_v51 = vld [vmem:[#allocation2 + $0x51] sm:$0xff]  ;;  %8899 = vmatprep.subr.bf16.mxu1 %v8898_v56 }
 0x243   : > { %7716 = vmatprep.mubr.f32.mxu0 %v10531_v50  ;;  %v2563_v50 = vld [vmem:[#allocation2 + $0x61] sm:$0xff]  ;;  %8901 = vmatpush3.bf16.msra.mxu1 %v8898_v56 }
 0x244   : > { %8903 = vmatprep.subr.bf16.mxu1 %v8902_v13  ;;  %v2880_v56 = vld [vmem:[#allocation2 + $0xe2] sm:$0xff] }
 0x246   : > { %7717 = vmatmul.mubr.f32.gmra.mrb[28].mxu0 %v10535_v44  ;;  %v8866_v44 = vpack.c.bf16 %v2903_v21, %v2902_v17  ;;  %v2869_v17 = vld [vmem:[#allocation2 + $0x62] sm:$0xff]  ;;  %v2871_v21 = vld [vmem:[#allocation2 + $0x7a] sm:$0xff] }
 0x247   : > { %7719 = vmatprep.mubr.f32.mxu0 %v10640_v32  ;;  %8905 = vmatpush3.bf16.msra.mxu1 %v8902_v13  ;;  %v2888_v13 = vld [vmem:[#allocation2 + $0x142] sm:$0xff] }
 0x248   : > { %8907 = vmatprep.subr.bf16.mxu1 %v8906_v29 }
 0x24a   : > { %7720 = vmatmul.mubr.f32.gmra.mrb[30].mxu0 %v10640_v32 }
 0x24b   : > { %7754 = vmatprep.mubr.f32.mxu0 %v2559_v54  ;;  %8909 = vmatpush3.bf16.msra.mxu1 %v8906_v29  ;;  %v2582_v54 = vld [vmem:[#allocation2 + $0x141] sm:$0xff]  ;;  %v3405_v29 = vld [vmem:[#allocation7 + $0xd0] sm:$0xff] }
 0x24c   : > { %v8910_v34 = vpack.c.bf16 %v3406_v33, %v3405_v29 }
 0x24e   : > { %7755 = vmatmul.mubr.f32.vlgmr.msra.gmra.mrb[0].mxu0 %v2560_v2  ;;  %v2590_v2 = vld [vmem:[#allocation2 + $0x1a1] sm:$0xff]  ;;  %8911 = vmatprep.subr.bf16.mxu1 %v8910_v34 }
 0x24f   : > { %8861 = vmatpush3.bf16.msra.mxu0 %v8858_v31  ;;  %7757 = vmatprep.mubr.f32.mxu0 %v2561_v11  ;;  %v2581_v31 = vld [vmem:[#allocation2 + $0x139] sm:$0xff]  ;;  %v2867_v11 = vld [vmem:[#allocation2 + $0x4a] sm:$0xff] }
 0x250   : > { %8863 = vmatprep.subr.bf16.mxu0 %v8862_v12  ;;  %8913 = vmatpush3.bf16.msra.mxu1 %v8910_v34 }
 0x252   : > { %7758 = vmatmul.mubr.f32.gmra.mrb[2].mxu0 %v2562_v51  ;;  %v2876_v51 = vld [vmem:[#allocation2 + $0xb2] sm:$0xff] }
 0x253   : > { %7760 = vmatprep.mubr.f32.mxu0 %v2563_v50  ;;  %8865 = vmatpush3.bf16.msra.mxu0 %v8862_v12  ;;  %v2868_v12 = vld [vmem:[#allocation2 + $0x52] sm:$0xff]  ;;  %v2877_v50 = vld [vmem:[#allocation2 + $0xc2] sm:$0xff] }
 0x254   : > { %8867 = vmatprep.subr.bf16.mxu0 %v8866_v44 }
 0x256   : > { %7761 = vmatmul.mubr.f32.gmra.mrb[4].mxu0 %v2564_v57  ;;  %v2884_v57 = vld [vmem:[#allocation2 + $0x112] sm:$0xff] }
 0x257   : > { %7763 = vmatprep.mubr.f32.mxu0 %v2565_v8  ;;  %8869 = vmatpush3.bf16.msra.mxu0 %v8866_v44  ;;  %v2878_v44 = vld [vmem:[#allocation2 + $0xca] sm:$0xff]  ;;  %v2885_v8 = vld [vmem:[#allocation2 + $0x122] sm:$0xff] }
 0x258   : > { %8871 = vmatprep.subr.bf16.mxu0 %v8870_v9 }
 0x25a   : > { %7764 = vmatmul.mubr.f32.gmra.mrb[6].mxu0 %v2566_v19  ;;  %v2892_v19 = vld [vmem:[#allocation2 + $0x172] sm:$0xff] }
 0x25b   : > { %7766 = vmatprep.mubr.f32.mxu0 %v2567_v41  ;;  %8873 = vmatpush3.bf16.msra.mxu0 %v8870_v9  ;;  %v2886_v9 = vld [vmem:[#allocation2 + $0x12a] sm:$0xff]  ;;  %v2895_v41 = vld [vmem:[#allocation2 + $0x19a] sm:$0xff] }
 0x25c   : > { %8875 = vmatprep.subr.bf16.mxu0 %v8874_v23 }
 0x25e   : > { %7767 = vmatmul.mubr.f32.gmra.mrb[8].mxu0 %v2568_v36  ;;  %v3407_v36 = vld [vmem:[#allocation7 + $0xe0] sm:$0xff] }
 0x25f   : > { %7769 = vmatprep.mubr.f32.mxu0 %v2569_v37  ;;  %8877 = vmatpush3.bf16.msra.mxu0 %v8874_v23  ;;  %v2896_v23 = vld [vmem:[#allocation2 + $0x1a2] sm:$0xff] }
 0x260   : > { %8879 = vmatprep.subr.bf16.mxu0 %v8878_v42  ;;  %v3408_v37 = vld [vmem:[#allocation7 + $0xe8] sm:$0xff] }
 0x262   : > { %7770 = vmatmul.mubr.f32.gmra.mrb[10].mxu0 %v2570_v48  ;;  %v8918_v48 = vpack.c.bf16 %v3410_v40, %v3409_v38 }
 0x263   : > { %7772 = vmatprep.mubr.f32.mxu0 %v2571_v58  ;;  %8881 = vmatpush3.bf16.msra.mxu0 %v8878_v42  ;;  %v8914_v42 = vpack.c.bf16 %v3408_v37, %v3407_v36  ;;  %v3346_v58 = vld [vmem:[#allocation7] sm:$0xff] }
 0x264   : > { %8883 = vmatprep.subr.bf16.mxu0 %v8882_v53 }
 0x265   : > { %8915 = vmatprep.subr.bf16.mxu1 %v8914_v42 }
 0x266   : > { %7773 = vmatmul.mubr.f32.gmra.mrb[12].mxu0 %v2572_v46  ;;  %8917 = vmatpush3.bf16.msra.mxu1 %v8914_v42  ;;  %v3349_v46 = vld [vmem:[#allocation7 + $0x18] sm:$0xff] }
 0x267   : > { %7775 = vmatprep.mubr.f32.mxu0 %v2573_v6  ;;  %8885 = vmatpush3.bf16.msra.mxu0 %v8882_v53  ;;  %v3347_v53 = vld [vmem:[#allocation7 + $0x8] sm:$0xff]  ;;  %v8926_v6 = vpack.c.bf16 %v3349_v46, %v3348_v1 }
 0x268   : > { %8887 = vmatprep.subr.bf16.mxu0 %v8886_v7  ;;  %8919 = vmatprep.subr.bf16.mxu1 %v8918_v48  ;;  %v8922_v63 = vpack.c.bf16 %v3347_v53, %v3346_v58 }
 0x26a   : > { %7776 = vmatmul.mubr.f32.gmra.mrb[14].mxu0 %v2574_v62  ;;  %8921 = vmatpush3.bf16.msra.mxu1 %v8918_v48  ;;  %v3351_v62 = vld [vmem:[#allocation7 + $0x28] sm:$0xff] }
 0x26b   : > { %7778 = vmatprep.mubr.f32.mxu0 %v2575_v15  ;;  %8889 = vmatpush3.bf16.msra.mxu0 %v8886_v7  ;;  %v3350_v7 = vld [vmem:[#allocation7 + $0x20] sm:$0xff] }
 0x26c   : > { %8923 = vmatprep.subr.bf16.mxu1 %v8922_v63  ;;  %v8930_v15 = vpack.c.bf16 %v3351_v62, %v3350_v7 }
 0x26e   : > { %7779 = vmatmul.mubr.f32.gmra.mrb[16].mxu0 %v2576_v16  ;;  %v3352_v16 = vld [vmem:[#allocation7 + $0x30] sm:$0xff] }
 0x26f   : > { %7781 = vmatprep.mubr.f32.mxu0 %v2577_v52  ;;  %v3353_v52 = vld [vmem:[#allocation7 + $0x38] sm:$0xff] }
 0x272   : > { %7782 = vmatmul.mubr.f32.gmra.mrb[18].mxu0 %v2578_v22  ;;  %v8934_v22 = vpack.c.bf16 %v3353_v52, %v3352_v16 }
 0x273   : > { %7784 = vmatprep.mubr.f32.mxu0 %v2579_v25  ;;  %v3354_v25 = vld [vmem:[#allocation7 + $0x40] sm:$0xff] }
 0x276   : > { %7785 = vmatmul.mubr.f32.gmra.mrb[20].mxu0 %v2580_v3  ;;  %v3355_v3 = vld [vmem:[#allocation7 + $0x48] sm:$0xff] }
 0x277   : > { %7787 = vmatprep.mubr.f32.mxu0 %v2581_v31  ;;  %v8938_v31 = vpack.c.bf16 %v3355_v3, %v3354_v25 }
 0x27a   : > { %7788 = vmatmul.mubr.f32.gmra.mrb[22].mxu0 %v2582_v54  ;;  %v3356_v54 = vld [vmem:[#allocation7 + $0x50] sm:$0xff] }
 0x27b   : > { %7790 = vmatprep.mubr.f32.mxu0 %v2583_v55  ;;  %v3357_v55 = vld [vmem:[#allocation7 + $0x58] sm:$0xff] }
 0x27e   : > { %7791 = vmatmul.mubr.f32.gmra.mrb[24].mxu0 %v2584_v59  ;;  %v8942_v59 = vpack.c.bf16 %v3357_v55, %v3356_v54 }
 0x27f   : > { %7793 = vmatprep.mubr.f32.mxu0 %v2585_v60  ;;  %v3358_v60 = vld [vmem:[#allocation7 + $0x60] sm:$0xff] }
 0x282   : > { %7794 = vmatmul.mubr.f32.gmra.mrb[26].mxu0 %v2586_v61  ;;  %v3359_v61 = vld [vmem:[#allocation7 + $0x68] sm:$0xff] }
 0x283   : > { %7796 = vmatprep.mubr.f32.mxu0 %v10567_v39  ;;  %v2872_v39 = vld [vmem:[#allocation2 + $0x82] sm:$0xff] }
 0x286   : > { %7797 = vmatmul.mubr.f32.gmra.mrb[28].mxu0 %v10571_v49  ;;  %v2874_v49 = vld [vmem:[#allocation2 + $0x9a] sm:$0xff] }
 0x287   : > { %7799 = vmatprep.mubr.f32.mxu0 %v2589_v0  ;;  %v8946_v0 = vpack.c.bf16 %v3359_v61, %v3358_v60 }
 0x28a   : > { %7800 = vmatmul.mubr.f32.gmra.mrb[30].mxu0 %v2590_v2  ;;  %v3360_v2 = vld [vmem:[#allocation7 + $0x70] sm:$0xff] }
 0x28b   : > { %7834 = vmatprep.mubr.f32.mxu0 %v2865_v5  ;;  %v3361_v5 = vld [vmem:[#allocation7 + $0x78] sm:$0xff] }
 0x28e   : > { %7835 = vmatmul.mubr.f32.vlgmr.msra.gmra.mrb[0].mxu0 %v2866_v10  ;;  %v8950_v10 = vpack.c.bf16 %v3361_v5, %v3360_v2 }
 0x28f   : > { %7837 = vmatprep.mubr.f32.mxu0 %v2867_v11  ;;  %v3894_v11 = vld [vmem:[#allocation7 + $0x100] sm:$0xff] }
 0x292   : > { %7838 = vmatmul.mubr.f32.gmra.mrb[2].mxu0 %v2868_v12  ;;  %v3895_v12 = vld [vmem:[#allocation7 + $0x108] sm:$0xff] }
 0x293   : > { %7840 = vmatprep.mubr.f32.mxu0 %v2869_v17  ;;  %v10648_v17 = vpack.c.bf16 %v3895_v12, %v3894_v11 }
 0x296   : > { %7841 = vmatmul.mubr.f32.gmra.mrb[4].mxu0 %v2870_v20  ;;  %v10654_v20 = vld [vmem:[%s11278_s2] ss:$0 sm:$0xff] }
 0x297   : > { %7843 = vmatprep.mubr.f32.mxu0 %v2871_v21 }
 0x29a   : > { %7844 = vmatmul.mubr.f32.gmra.mrb[6].mxu0 %v2872_v39  ;;  %v10659_v39 = vld [vmem:[%s11279_s3] ss:$0 sm:$0xff] }
 0x29b   : > { %7846 = vmatprep.mubr.f32.mxu0 %v2873_v30 }
 0x29e   : > { %7847 = vmatmul.mubr.f32.gmra.mrb[8].mxu0 %v2874_v49 }
 0x29f   : > { %7849 = vmatprep.mubr.f32.mxu0 %v2875_v35 }
 0x2a2   : > { %7850 = vmatmul.mubr.f32.gmra.mrb[10].mxu0 %v2876_v51 }
 0x2a3   : > { %7852 = vmatprep.mubr.f32.mxu0 %v2877_v50 }
 0x2a6   : > { %7853 = vmatmul.mubr.f32.gmra.mrb[12].mxu0 %v2878_v44 }
 0x2a7   : > { %7855 = vmatprep.mubr.f32.mxu0 %v2879_v43 }
 0x2aa   : > { %7856 = vmatmul.mubr.f32.gmra.mrb[14].mxu0 %v2880_v56 }
 0x2ab   : > { %7858 = vmatprep.mubr.f32.mxu0 %v2881_v4 }
 0x2ae   : > { %7859 = vmatmul.mubr.f32.gmra.mrb[16].mxu0 %v2882_v45 }
 0x2af   : > { %7861 = vmatprep.mubr.f32.mxu0 %v2883_v27 }
 0x2b2   : > { %7862 = vmatmul.mubr.f32.gmra.mrb[18].mxu0 %v2884_v57 }
 0x2b3   : > { %7864 = vmatprep.mubr.f32.mxu0 %v2885_v8 }
 0x2b6   : > { %7865 = vmatmul.mubr.f32.gmra.mrb[20].mxu0 %v2886_v9 }
 0x2b7   : > { %7867 = vmatprep.mubr.f32.mxu0 %v2887_v47 }
 0x2ba   : > { %7868 = vmatmul.mubr.f32.gmra.mrb[22].mxu0 %v2888_v13 }
 0x2bb   : > { %7870 = vmatprep.mubr.f32.mxu0 %v2889_v14 }
 0x2be   : > { %7871 = vmatmul.mubr.f32.gmra.mrb[24].mxu0 %v2890_v26 }
 0x2bf   : > { %7873 = vmatprep.mubr.f32.mxu0 %v2891_v18 }
 0x2c2   : > { %7874 = vmatmul.mubr.f32.gmra.mrb[26].mxu0 %v2892_v19 }
 0x2c3   : > { %7876 = vmatprep.mubr.f32.mxu0 %v10603_v24  ;;  %v3362_v24 = vld [vmem:[#allocation3 + $0x1] sm:$0xff] }
 0x2c4   : > { %7914 = vmatprep.mubr.f32.mxu1 %v3362_v24 }
 0x2c6   : > { %7877 = vmatmul.mubr.f32.gmra.mrb[28].mxu0 %v10607_v28  ;;  %v3363_v28 = vld [vmem:[#allocation3 + $0x9] sm:$0xff] }
 0x2c7   : > { %7879 = vmatprep.mubr.f32.mxu0 %v2895_v41  ;;  %7915 = vmatmul.mubr.f32.vlgmr.msra.gmra.mrb[0].mxu1 %v3363_v28 }
 0x2c8   : > { %8925 = vmatpush3.bf16.msra.mxu1 %v8922_v63 }
 0x2c9   : > { %8927 = vmatprep.subr.bf16.mxu1 %v8926_v6 }
 0x2ca   : > { %7880 = vmatmul.mubr.f32.gmra.mrb[30].mxu0 %v2896_v23 }
 0x2cc   : > { %8929 = vmatpush3.bf16.msra.mxu1 %v8926_v6 }
 0x2cd   : > { %8931 = vmatprep.subr.bf16.mxu1 %v8930_v15 }
 0x2d0   : > { %8933 = vmatpush3.bf16.msra.mxu1 %v8930_v15 }
 0x2d1   : > { %8935 = vmatprep.subr.bf16.mxu1 %v8934_v22 }
 0x2d4   : > { %8937 = vmatpush3.bf16.msra.mxu1 %v8934_v22 }
 0x2d5   : > { %8939 = vmatprep.subr.bf16.mxu1 %v8938_v31 }
 0x2d8   : > { %8941 = vmatpush3.bf16.msra.mxu1 %v8938_v31 }
 0x2d9   : > { %8943 = vmatprep.subr.bf16.mxu1 %v8942_v59 }
 0x2dc   : > { %8945 = vmatpush3.bf16.msra.mxu1 %v8942_v59 }
 0x2dd   : > { %8947 = vmatprep.subr.bf16.mxu1 %v8946_v0 }
 0x2e0   : > { %8949 = vmatpush3.bf16.msra.mxu1 %v8946_v0 }
 0x2e1   : > { %8951 = vmatprep.subr.bf16.mxu1 %v8950_v10 }
 0x2e4   : > { %8953 = vmatpush3.bf16.msra.mxu1 %v8950_v10 }
 0x2e5   : > { %8955 = vmatprep.subr.bf16.mxu1 %v10648_v17 }
 0x361   : > { %v7836_v21 = vpop.f32.mrb[0].mxu0 }
 0x362   : > { %v3179_v30 = vmul.f32 %v7836_v21, %v10654_v20  ;;  %v2980_v49 = vpop.f32.mrb[1].mxu0 }
 0x363   : > { %v3178_v35 = vmul.f32 %v10654_v20, %v2980_v49 }
 0x364   : > { %v3218_v51 = vadd.f32 %v10659_v39, %v3179_v30 }
 0x365   : > { %v3217_v50 = vadd.f32 %v10659_v39, %v3178_v35  ;;  %v7839_v44 = vpop.f32.mrb[2].mxu0 }
 0x366   : > { %v3250_v43 = vmax.f32 %v3218_v51, 0.0  ;;  %v3181_v56 = vmul.f32 %v7839_v44, %v10654_v20  ;;  %v2990_v4 = vpop.f32.mrb[3].mxu0 }
 0x367   : > { %v3249_v45 = vmax.f32 %v3217_v50, 0.0  ;;  %v3180_v27 = vmul.f32 %v10654_v20, %v2990_v4 }
 0x368   : > { %3283 = vst [vmem:[#allocation3 + $0x21] sm:$0xff] %v3250_v43  ;;  %v3220_v57 = vadd.f32 %v10659_v39, %v3181_v56 }
 0x369   : > { %3282 = vst [vmem:[#allocation3 + $0x19] sm:$0xff] %v3249_v45  ;;  %v3219_v8 = vadd.f32 %v10659_v39, %v3180_v27  ;;  %v7842_v9 = vpop.f32.mrb[4].mxu0  ;;  %7917 = vmatprep.mubr.f32.mxu1 %v3249_v45 }
 0x36a   : > { %v3252_v47 = vmax.f32 %v3220_v57, 0.0  ;;  %v3183_v13 = vmul.f32 %v7842_v9, %v10654_v20  ;;  %v3000_v14 = vpop.f32.mrb[5].mxu0  ;;  %7918 = vmatmul.mubr.f32.gmra.mrb[2].mxu1 %v3250_v43 }
 0x36b   : > { %v3251_v26 = vmax.f32 %v3219_v8, 0.0  ;;  %v3182_v18 = vmul.f32 %v10654_v20, %v3000_v14 }
 0x36c   : > { %3285 = vst [vmem:[#allocation3 + $0x39] sm:$0xff] %v3252_v47  ;;  %v3222_v19 = vadd.f32 %v10659_v39, %v3183_v13 }
 0x36d   : > { %3284 = vst [vmem:[#allocation3 + $0x31] sm:$0xff] %v3251_v26  ;;  %v3221_v41 = vadd.f32 %v10659_v39, %v3182_v18  ;;  %v7845_v23 = vpop.f32.mrb[6].mxu0  ;;  %7920 = vmatprep.mubr.f32.mxu1 %v3251_v26 }
 0x36e   : > { %v3254_v29 = vmax.f32 %v3222_v19, 0.0  ;;  %v3185_v33 = vmul.f32 %v7845_v23, %v10654_v20  ;;  %v3010_v34 = vpop.f32.mrb[7].mxu0  ;;  %7921 = vmatmul.mubr.f32.gmra.mrb[4].mxu1 %v3252_v47 }
 0x36f   : > { %v3253_v36 = vmax.f32 %v3221_v41, 0.0  ;;  %v3184_v37 = vmul.f32 %v10654_v20, %v3010_v34 }
 0x370   : > { %3287 = vst [vmem:[#allocation3 + $0x51] sm:$0xff] %v3254_v29  ;;  %v3224_v42 = vadd.f32 %v10659_v39, %v3185_v33 }
 0x371   : > { %3286 = vst [vmem:[#allocation3 + $0x49] sm:$0xff] %v3253_v36  ;;  %v3223_v38 = vadd.f32 %v10659_v39, %v3184_v37  ;;  %v7848_v40 = vpop.f32.mrb[8].mxu0  ;;  %7923 = vmatprep.mubr.f32.mxu1 %v3253_v36 }
 0x372   : > { %v3256_v48 = vmax.f32 %v3224_v42, 0.0  ;;  %v3187_v24 = vmul.f32 %v7848_v40, %v10654_v20  ;;  %v3020_v28 = vpop.f32.mrb[9].mxu0  ;;  %7924 = vmatmul.mubr.f32.gmra.mrb[6].mxu1 %v3254_v29 }
 0x373   : > { %v3255_v58 = vmax.f32 %v3223_v38, 0.0  ;;  %v3186_v53 = vmul.f32 %v10654_v20, %v3020_v28 }
 0x374   : > { %3289 = vst [vmem:[#allocation3 + $0x69] sm:$0xff] %v3256_v48  ;;  %v3226_v63 = vadd.f32 %v10659_v39, %v3187_v24 }
 0x375   : > { %3288 = vst [vmem:[#allocation3 + $0x61] sm:$0xff] %v3255_v58  ;;  %v3225_v1 = vadd.f32 %v10659_v39, %v3186_v53  ;;  %v7851_v46 = vpop.f32.mrb[10].mxu0  ;;  %7926 = vmatprep.mubr.f32.mxu1 %v3255_v58 }
 0x376   : > { %v3258_v6 = vmax.f32 %v3226_v63, 0.0  ;;  %v3189_v7 = vmul.f32 %v7851_v46, %v10654_v20  ;;  %v3030_v62 = vpop.f32.mrb[11].mxu0  ;;  %7927 = vmatmul.mubr.f32.gmra.mrb[8].mxu1 %v3256_v48 }
 0x377   : > { %v3257_v15 = vmax.f32 %v3225_v1, 0.0  ;;  %v3188_v16 = vmul.f32 %v10654_v20, %v3030_v62 }
 0x378   : > { %3291 = vst [vmem:[#allocation3 + $0x81] sm:$0xff] %v3258_v6  ;;  %v3228_v52 = vadd.f32 %v10659_v39, %v3189_v7 }
 0x379   : > { %3290 = vst [vmem:[#allocation3 + $0x79] sm:$0xff] %v3257_v15  ;;  %v3227_v22 = vadd.f32 %v10659_v39, %v3188_v16  ;;  %v7854_v25 = vpop.f32.mrb[12].mxu0  ;;  %7929 = vmatprep.mubr.f32.mxu1 %v3257_v15 }
 0x37a   : > { %v3260_v3 = vmax.f32 %v3228_v52, 0.0  ;;  %v3191_v31 = vmul.f32 %v7854_v25, %v10654_v20  ;;  %v3040_v54 = vpop.f32.mrb[13].mxu0  ;;  %7930 = vmatmul.mubr.f32.gmra.mrb[10].mxu1 %v3258_v6 }
 0x37b   : > { %v3259_v55 = vmax.f32 %v3227_v22, 0.0  ;;  %v3190_v59 = vmul.f32 %v10654_v20, %v3040_v54 }
 0x37c   : > { %3293 = vst [vmem:[#allocation3 + $0x99] sm:$0xff] %v3260_v3  ;;  %v3230_v60 = vadd.f32 %v10659_v39, %v3191_v31 }
 0x37d   : > { %3292 = vst [vmem:[#allocation3 + $0x91] sm:$0xff] %v3259_v55  ;;  %v3229_v61 = vadd.f32 %v10659_v39, %v3190_v59  ;;  %v7857_v0 = vpop.f32.mrb[14].mxu0  ;;  %7932 = vmatprep.mubr.f32.mxu1 %v3259_v55 }
 0x37e   : > { %v3262_v2 = vmax.f32 %v3230_v60, 0.0  ;;  %v3193_v5 = vmul.f32 %v7857_v0, %v10654_v20  ;;  %v3050_v10 = vpop.f32.mrb[15].mxu0  ;;  %7933 = vmatmul.mubr.f32.gmra.mrb[12].mxu1 %v3260_v3 }
 0x37f   : > { %v3261_v11 = vmax.f32 %v3229_v61, 0.0  ;;  %v3192_v12 = vmul.f32 %v10654_v20, %v3050_v10 }
 0x380   : > { %3295 = vst [vmem:[#allocation3 + $0xb1] sm:$0xff] %v3262_v2  ;;  %v3232_v21 = vadd.f32 %v10659_v39, %v3193_v5 }
 0x381   : > { %3294 = vst [vmem:[#allocation3 + $0xa9] sm:$0xff] %v3261_v11  ;;  %v3231_v30 = vadd.f32 %v10659_v39, %v3192_v12  ;;  %v7860_v49 = vpop.f32.mrb[16].mxu0  ;;  %7935 = vmatprep.mubr.f32.mxu1 %v3261_v11 }
 0x382   : > { %v3264_v35 = vmax.f32 %v3232_v21, 0.0  ;;  %v3195_v51 = vmul.f32 %v7860_v49, %v10654_v20  ;;  %v3060_v50 = vpop.f32.mrb[17].mxu0  ;;  %7936 = vmatmul.mubr.f32.gmra.mrb[14].mxu1 %v3262_v2 }
 0x383   : > { %v3263_v44 = vmax.f32 %v3231_v30, 0.0  ;;  %v3194_v43 = vmul.f32 %v10654_v20, %v3060_v50 }
 0x384   : > { %3297 = vst [vmem:[#allocation3 + $0xc9] sm:$0xff] %v3264_v35  ;;  %v3234_v56 = vadd.f32 %v10659_v39, %v3195_v51 }
 0x385   : > { %3296 = vst [vmem:[#allocation3 + $0xc1] sm:$0xff] %v3263_v44  ;;  %v3233_v4 = vadd.f32 %v10659_v39, %v3194_v43  ;;  %v7863_v45 = vpop.f32.mrb[18].mxu0  ;;  %7938 = vmatprep.mubr.f32.mxu1 %v3263_v44  ;;  %v3896_v44 = vld [vmem:[#allocation7 + $0x110] sm:$0xff]  ;;  %v3897_v43 = vld [vmem:[#allocation7 + $0x118] sm:$0xff] }
 0x386   : > { %v10697_v27 = vmax.f32 %v3234_v56, 0.0  ;;  %v3197_v57 = vmul.f32 %v7863_v45, %v10654_v20  ;;  %v3070_v8 = vpop.f32.mrb[19].mxu0  ;;  %7939 = vmatmul.mubr.f32.gmra.mrb[16].mxu1 %v3264_v35  ;;  %v3899_v45 = vld [vmem:[#allocation7 + $0x128] sm:$0xff] }
 0x387   : > { %v10700_v9 = vmax.f32 %v3233_v4, 0.0  ;;  %v3196_v47 = vmul.f32 %v10654_v20, %v3070_v8  ;;  %v8958_v4 = vpack.c.bf16 %v3897_v43, %v3896_v44 }
 0x388   : > { %3299 = vst [vmem:[#allocation3 + $0xe1] sm:$0xff] %v10697_v27  ;;  %v3236_v13 = vadd.f32 %v10659_v39, %v3197_v57  ;;  %v10793_v57 = vld [vmem:[#allocation3 + $0x18] sm:$0xff] }
 0x389   : > { %3298 = vst [vmem:[#allocation3 + $0xd9] sm:$0xff] %v10700_v9  ;;  %v3235_v14 = vadd.f32 %v10659_v39, %v3196_v47  ;;  %v7866_v26 = vpop.f32.mrb[20].mxu0  ;;  %7941 = vmatprep.mubr.f32.mxu1 %v10700_v9  ;;  %v10797_v47 = vld [vmem:[#allocation3 + $0x20] sm:$0xff] }
 0x38a   : > { %v10708_v18 = vmax.f32 %v3236_v13, 0.0  ;;  %v3199_v19 = vmul.f32 %v7866_v26, %v10654_v20  ;;  %v3080_v41 = vpop.f32.mrb[21].mxu0  ;;  %7942 = vmatmul.mubr.f32.gmra.mrb[18].mxu1 %v10697_v27  ;;  %v3900_v13 = vld [vmem:[#allocation7 + $0x130] sm:$0xff]  ;;  %v10800_v26 = vld [vmem:[#allocation3 + $0x30] sm:$0xff] }
 0x38b   : > { %v10712_v23 = vmax.f32 %v3235_v14, 0.0  ;;  %v3198_v29 = vmul.f32 %v10654_v20, %v3080_v41  ;;  %v3901_v14 = vld [vmem:[#allocation7 + $0x138] sm:$0xff]  ;;  %v3902_v41 = vld [vmem:[#allocation7 + $0x140] sm:$0xff] }
 0x38c   : > { %3301 = vst [vmem:[#allocation3 + $0xf9] sm:$0xff] %v10708_v18  ;;  %v3238_v33 = vadd.f32 %v10659_v39, %v3199_v19  ;;  %v10803_v19 = vld [vmem:[#allocation3 + $0x38] sm:$0xff] }
 0x38d   : > { %3300 = vst [vmem:[#allocation3 + $0xf1] sm:$0xff] %v10712_v23  ;;  %v3237_v34 = vadd.f32 %v10659_v39, %v3198_v29  ;;  %v7869_v36 = vpop.f32.mrb[22].mxu0  ;;  %7944 = vmatprep.mubr.f32.mxu1 %v10712_v23  ;;  %v3903_v29 = vld [vmem:[#allocation7 + $0x148] sm:$0xff] }
 0x38e   : > { %v10720_v37 = vmax.f32 %v3238_v33, 0.0  ;;  %v3201_v42 = vmul.f32 %v7869_v36, %v10654_v20  ;;  %v3090_v38 = vpop.f32.mrb[23].mxu0  ;;  %7945 = vmatmul.mubr.f32.gmra.mrb[20].mxu1 %v10708_v18  ;;  %v8970_v33 = vpack.c.bf16 %v3903_v29, %v3902_v41  ;;  %v3904_v36 = vld [vmem:[#allocation7 + $0x150] sm:$0xff]  ;;  %v4203_v29 = vld [vmem:[#allocation7 + $0x198] sm:$0xff] }
 0x38f   : > { %v10724_v40 = vmax.f32 %v3237_v34, 0.0  ;;  %v3200_v48 = vmul.f32 %v10654_v20, %v3090_v38  ;;  %v10809_v34 = vld [vmem:[#allocation3 + $0x50] sm:$0xff]  ;;  %v10812_v38 = vld [vmem:[#allocation3 + $0x60] sm:$0xff] }
 0x390   : > { %3303 = vst [vmem:[#allocation3 + $0x111] sm:$0xff] %v10720_v37  ;;  %v3240_v24 = vadd.f32 %v10659_v39, %v3201_v42  ;;  %v3905_v42 = vld [vmem:[#allocation7 + $0x158] sm:$0xff]  ;;  %v4202_v41 = vld [vmem:[#allocation7 + $0x190] sm:$0xff] }
 0x391   : > { %3302 = vst [vmem:[#allocation3 + $0x109] sm:$0xff] %v10724_v40  ;;  %v3239_v28 = vadd.f32 %v10659_v39, %v3200_v48  ;;  %v7872_v58 = vpop.f32.mrb[24].mxu0  ;;  %7947 = vmatprep.mubr.f32.mxu1 %v10724_v40  ;;  %v8974_v48 = vpack.c.bf16 %v3905_v42, %v3904_v36  ;;  %v8990_v36 = vpack.c.bf16 %v4203_v29, %v4202_v41  ;;  %v4204_v42 = vld [vmem:[#allocation7 + $0x1a0] sm:$0xff]  ;;  %v4209_v41 = vld [vmem:[#allocation7 + $0x1c8] sm:$0xff] }
 0x392   : > { %v10732_v53 = vmax.f32 %v3240_v24, 0.0  ;;  %v3203_v63 = vmul.f32 %v7872_v58, %v10654_v20  ;;  %v3100_v1 = vpop.f32.mrb[25].mxu0  ;;  %7948 = vmatmul.mubr.f32.gmra.mrb[22].mxu1 %v10720_v37  ;;  %v10815_v24 = vld [vmem:[#allocation3 + $0x68] sm:$0xff]  ;;  %v3907_v58 = vld [vmem:[#allocation7 + $0x168] sm:$0xff] }
 0x393   : > { %v10736_v46 = vmax.f32 %v3239_v28, 0.0  ;;  %v3202_v6 = vmul.f32 %v10654_v20, %v3100_v1  ;;  %v3906_v28 = vld [vmem:[#allocation7 + $0x160] sm:$0xff] }
 0x394   : > { %3305 = vst [vmem:[#allocation3 + $0x129] sm:$0xff] %v10732_v53  ;;  %v3242_v7 = vadd.f32 %v10659_v39, %v3203_v63  ;;  %v10818_v63 = vld [vmem:[#allocation3 + $0x78] sm:$0xff]  ;;  %v8978_v1 = vpack.c.bf16 %v3907_v58, %v3906_v28 }
 0x395   : > { %3304 = vst [vmem:[#allocation3 + $0x121] sm:$0xff] %v10736_v46  ;;  %v3241_v62 = vadd.f32 %v10659_v39, %v3202_v6  ;;  %v7875_v15 = vpop.f32.mrb[26].mxu0  ;;  %7950 = vmatprep.mubr.f32.mxu1 %v10736_v46  ;;  %v10821_v6 = vld [vmem:[#allocation3 + $0x80] sm:$0xff] }
 0x396   : > { %v10744_v16 = vmax.f32 %v3242_v7, 0.0  ;;  %v3205_v52 = vmul.f32 %v7875_v15, %v10654_v20  ;;  %v3110_v22 = vpop.f32.mrb[27].mxu0  ;;  %7951 = vmatmul.mubr.f32.gmra.mrb[24].mxu1 %v10732_v53  ;;  %v3908_v7 = vld [vmem:[#allocation7 + $0x170] sm:$0xff]  ;;  %v10824_v15 = vld [vmem:[#allocation3 + $0x90] sm:$0xff] }
 0x397   : > { %v10748_v25 = vmax.f32 %v3241_v62, 0.0  ;;  %v3204_v3 = vmul.f32 %v10654_v20, %v3110_v22  ;;  %v3909_v62 = vld [vmem:[#allocation7 + $0x178] sm:$0xff]  ;;  %v10827_v22 = vld [vmem:[#allocation3 + $0x98] sm:$0xff] }
 0x398   : > { %3307 = vst [vmem:[#allocation3 + $0x141] sm:$0xff] %v10744_v16  ;;  %v3244_v31 = vadd.f32 %v10659_v39, %v3205_v52  ;;  %v8982_v52 = vpack.c.bf16 %v3909_v62, %v3908_v7  ;;  %v10884_v28 = vld [vmem:[#allocation3 + $0x1a] sm:$0xff]  ;;  %v4207_v62 = vld [vmem:[#allocation7 + $0x1b8] sm:$0xff] }
 0x399   : > { %3306 = vst [vmem:[#allocation3 + $0x139] sm:$0xff] %v10748_v25  ;;  %v3243_v54 = vadd.f32 %v10659_v39, %v3204_v3  ;;  %v7878_v55 = vpop.f32.mrb[28].mxu0  ;;  %7953 = vmatprep.mubr.f32.mxu1 %v10748_v25  ;;  %v4200_v3 = vld [vmem:[#allocation7 + $0x180] sm:$0xff]  ;;  %v4206_v7 = vld [vmem:[#allocation7 + $0x1b0] sm:$0xff] }
 0x39a   : > { %v10756_v59 = vmax.f32 %v3244_v31, 0.0  ;;  %v3207_v60 = vmul.f32 %v7878_v55, %v10654_v20  ;;  %v3120_v61 = vpop.f32.mrb[29].mxu0  ;;  %7954 = vmatmul.mubr.f32.gmra.mrb[26].mxu1 %v10744_v16  ;;  %v4201_v31 = vld [vmem:[#allocation7 + $0x188] sm:$0xff] }
 0x39b   : > { %v10760_v0 = vmax.f32 %v3243_v54, 0.0  ;;  %v3206_v2 = vmul.f32 %v10654_v20, %v3120_v61  ;;  %v10830_v54 = vld [vmem:[#allocation3 + $0xa8] sm:$0xff]  ;;  %v8986_v55 = vpack.c.bf16 %v4201_v31, %v4200_v3  ;;  %v10836_v61 = vld [vmem:[#allocation3 + $0xc0] sm:$0xff]  ;;  %v8998_v3 = vpack.c.bf16 %v4207_v62, %v4206_v7 }
 0x39c   : > { %3309 = vst [vmem:[#allocation3 + $0x159] sm:$0xff] %v10756_v59  ;;  %v3246_v5 = vadd.f32 %v10659_v39, %v3207_v60  ;;  %v10833_v60 = vld [vmem:[#allocation3 + $0xb0] sm:$0xff]  ;;  %v10860_v44 = vld [vmem:[#allocation3 + $0x120] sm:$0xff]  ;;  %v10863_v43 = vld [vmem:[#allocation3 + $0x128] sm:$0xff] }
 0x39d   : > { %3308 = vst [vmem:[#allocation3 + $0x151] sm:$0xff] %v10760_v0  ;;  %v3245_v10 = vadd.f32 %v10659_v39, %v3206_v2  ;;  %v7881_v11 = vpop.f32.mrb[30].mxu0  ;;  %7956 = vmatprep.mubr.f32.mxu1 %v10760_v0  ;;  %v10839_v2 = vld [vmem:[#allocation3 + $0xc8] sm:$0xff]  ;;  %v10893_v31 = vld [vmem:[#allocation3 + $0x3a] sm:$0xff] }
 0x39e   : > { %v10768_v12 = vmax.f32 %v3246_v5, 0.0  ;;  %v3209_v21 = vmul.f32 %v7881_v11, %v10654_v20  ;;  %v3130_v30 = vpop.f32.mrb[31].mxu0  ;;  %7957 = vmatmul.mubr.f32.gmra.mrb[28].mxu1 %v10756_v59  ;;  %v10842_v5 = vld [vmem:[#allocation3 + $0xd8] sm:$0xff]  ;;  %v10848_v11 = vld [vmem:[#allocation3 + $0xf0] sm:$0xff] }
 0x39f   : > { %v10772_v49 = vmax.f32 %v3245_v10, 0.0  ;;  %v3208_v35 = vmul.f32 %v10654_v20, %v3130_v30  ;;  %v10845_v10 = vld [vmem:[#allocation3 + $0xe0] sm:$0xff]  ;;  %v10854_v30 = vld [vmem:[#allocation3 + $0x108] sm:$0xff] }
 0x3a0   : > { %3311 = vst [vmem:[#allocation3 + $0x171] sm:$0xff] %v10768_v12  ;;  %v10777_v51 = vadd.f32 %v10659_v39, %v3209_v21  ;;  %v10851_v21 = vld [vmem:[#allocation3 + $0xf8] sm:$0xff]  ;;  %v10905_v62 = vld [vmem:[#allocation3 + $0x6a] sm:$0xff] }
 0x3a1   : > { %3310 = vst [vmem:[#allocation3 + $0x169] sm:$0xff] %v10772_v49  ;;  %v10781_v50 = vadd.f32 %v10659_v39, %v3208_v35  ;;  %7959 = vmatprep.mubr.f32.mxu1 %v10772_v49  ;;  %v3898_v39 = vld [vmem:[#allocation7 + $0x120] sm:$0xff]  ;;  %11445 = vst [vmem:[#allocation18_spill] sm:$0xff] %v10905_v62 }
 0x3a2   : > { %v11323_v56 = vmax.f32 %v10777_v51, 0.0  ;;  %7960 = vmatmul.mubr.f32.gmra.mrb[30].mxu1 %v10768_v12  ;;  %v8962_v8 = vpack.c.bf16 %v3899_v45, %v3898_v39  ;;  %v10857_v35 = vld [vmem:[#allocation3 + $0x110] sm:$0xff]  ;;  %v10869_v39 = vld [vmem:[#allocation3 + $0x140] sm:$0xff] }
 0x3a3   : > { %v11324_v20 = vmax.f32 %v10781_v50, 0.0  ;;  %7994 = vmatprep.mubr.f32.mxu1 %v10640_v32 }
 0x3a4   : > { %3313 = vst [vmem:[#allocation3 + $0x189] sm:$0xff] %v11323_v56  ;;  %v10872_v45 = vld [vmem:[#allocation3 + $0x150] sm:$0xff] }
 0x3a5   : > { %3312 = vst [vmem:[#allocation3 + $0x181] sm:$0xff] %v11324_v20  ;;  %v4212_v56 = vld [vmem:[#allocation7 + $0x1e0] sm:$0xff]  ;;  %v4213_v20 = vld [vmem:[#allocation7 + $0x1e8] sm:$0xff] }
 0x3a6   : > { %7995 = vmatmul.mubr.f32.vlgmr.msra.gmra.mrb[0].mxu1 %v10640_v32  ;;  %v8966_v32 = vpack.c.bf16 %v3901_v14, %v3900_v13  ;;  %v3861_v14 = vld [vmem:[#allocation3 + $0x2] sm:$0xff] }
 0x3a7   : > { %7997 = vmatprep.mubr.f32.mxu1 %v10793_v57  ;;  %8957 = vmatpush3.bf16.msra.mxu1 %v10648_v17  ;;  %v10806_v17 = vld [vmem:[#allocation3 + $0x48] sm:$0xff] }
 0x3a8   : > { %8959 = vmatprep.subr.bf16.mxu1 %v8958_v4  ;;  %v10878_v13 = vld [vmem:[#allocation3 + $0x168] sm:$0xff] }
 0x3a9   : > { %11441 = vst [vmem:[#allocation14_spill] sm:$0xff] %v10878_v13 }
 0x3aa   : > { %7998 = vmatmul.mubr.f32.gmra.mrb[2].mxu1 %v10797_v47 }
 0x3ab   : > { %8000 = vmatprep.mubr.f32.mxu1 %v10800_v26  ;;  %8961 = vmatpush3.bf16.msra.mxu1 %v8958_v4  ;;  %v10866_v4 = vld [vmem:[#allocation3 + $0x138] sm:$0xff] }
 0x3ac   : > { %8963 = vmatprep.subr.bf16.mxu1 %v8962_v8 }
 0x3ae   : > { %8001 = vmatmul.mubr.f32.gmra.mrb[4].mxu1 %v10803_v19 }
 0x3af   : > { %8003 = vmatprep.mubr.f32.mxu1 %v10806_v17  ;;  %8965 = vmatpush3.bf16.msra.mxu1 %v8962_v8  ;;  %v10875_v8 = vld [vmem:[#allocation3 + $0x158] sm:$0xff] }
 0x3b0   : > { %8967 = vmatprep.subr.bf16.mxu1 %v8966_v32 }
 0x3b2   : > { %8004 = vmatmul.mubr.f32.gmra.mrb[6].mxu1 %v10809_v34 }
 0x3b3   : > { %8006 = vmatprep.mubr.f32.mxu1 %v10812_v38  ;;  %8969 = vmatpush3.bf16.msra.mxu1 %v8966_v32  ;;  %v10881_v32 = vld [vmem:[#allocation3 + $0x170] sm:$0xff] }
 0x3b4   : > { %8971 = vmatprep.subr.bf16.mxu1 %v8970_v33  ;;  %11442 = vst [vmem:[#allocation15_spill] sm:$0xff] %v10881_v32 }
 0x3b6   : > { %8007 = vmatmul.mubr.f32.gmra.mrb[8].mxu1 %v10815_v24 }
 0x3b7   : > { %8009 = vmatprep.mubr.f32.mxu1 %v10818_v63  ;;  %8973 = vmatpush3.bf16.msra.mxu1 %v8970_v33  ;;  %v3862_v33 = vld [vmem:[#allocation3 + $0xa] sm:$0xff] }
 0x3b8   : > { %8975 = vmatprep.subr.bf16.mxu1 %v8974_v48 }
 0x3ba   : > { %8010 = vmatmul.mubr.f32.gmra.mrb[10].mxu1 %v10821_v6 }
 0x3bb   : > { %8012 = vmatprep.mubr.f32.mxu1 %v10824_v15  ;;  %8977 = vmatpush3.bf16.msra.mxu1 %v8974_v48  ;;  %v4205_v48 = vld [vmem:[#allocation7 + $0x1a8] sm:$0xff] }
 0x3bc   : > { %8979 = vmatprep.subr.bf16.mxu1 %v8978_v1  ;;  %v8994_v58 = vpack.c.bf16 %v4205_v48, %v4204_v42  ;;  %v4210_v42 = vld [vmem:[#allocation7 + $0x1d0] sm:$0xff]  ;;  %v4211_v48 = vld [vmem:[#allocation7 + $0x1d8] sm:$0xff] }
 0x3bd   : > { %v9006_v7 = vpack.c.bf16 %v4211_v48, %v4210_v42  ;;  %v10917_v48 = vld [vmem:[#allocation3 + $0x9a] sm:$0xff] }
 0x3be   : > { %8013 = vmatmul.mubr.f32.gmra.mrb[12].mxu1 %v10827_v22 }
 0x3bf   : > { %8015 = vmatprep.mubr.f32.mxu1 %v10830_v54  ;;  %8981 = vmatpush3.bf16.msra.mxu1 %v8978_v1  ;;  %v10887_v1 = vld [vmem:[#allocation3 + $0x22] sm:$0xff] }
 0x3c0   : > { %8983 = vmatprep.subr.bf16.mxu1 %v8982_v52 }
 0x3c2   : > { %8016 = vmatmul.mubr.f32.gmra.mrb[14].mxu1 %v10833_v60 }
 0x3c3   : > { %8018 = vmatprep.mubr.f32.mxu1 %v10836_v61  ;;  %8985 = vmatpush3.bf16.msra.mxu1 %v8982_v52  ;;  %v10890_v52 = vld [vmem:[#allocation3 + $0x32] sm:$0xff] }
 0x3c4   : > { %8987 = vmatprep.subr.bf16.mxu1 %v8986_v55 }
 0x3c6   : > { %8019 = vmatmul.mubr.f32.gmra.mrb[16].mxu1 %v10839_v2 }
 0x3c7   : > { %8021 = vmatprep.mubr.f32.mxu1 %v10842_v5 }
 0x3ca   : > { %8022 = vmatmul.mubr.f32.gmra.mrb[18].mxu1 %v10845_v10 }
 0x3cb   : > { %8024 = vmatprep.mubr.f32.mxu1 %v10848_v11 }
 0x3ce   : > { %8025 = vmatmul.mubr.f32.gmra.mrb[20].mxu1 %v10851_v21 }
 0x3cf   : > { %8027 = vmatprep.mubr.f32.mxu1 %v10854_v30 }
 0x3d2   : > { %8028 = vmatmul.mubr.f32.gmra.mrb[22].mxu1 %v10857_v35 }
 0x3d3   : > { %8030 = vmatprep.mubr.f32.mxu1 %v10860_v44 }
 0x3d6   : > { %8031 = vmatmul.mubr.f32.gmra.mrb[24].mxu1 %v10863_v43 }
 0x3d7   : > { %8033 = vmatprep.mubr.f32.mxu1 %v10866_v4 }
 0x3da   : > { %8034 = vmatmul.mubr.f32.gmra.mrb[26].mxu1 %v10869_v39 }
 0x3db   : > { %8036 = vmatprep.mubr.f32.mxu1 %v10872_v45 }
 0x3de   : > { %8037 = vmatmul.mubr.f32.gmra.mrb[28].mxu1 %v10875_v8 }
 0x3df   : > { %8039 = vmatprep.mubr.f32.mxu1 %v10878_v13 }
 0x3e2   : > { %8040 = vmatmul.mubr.f32.gmra.mrb[30].mxu1 %v10881_v32 }
 0x3e3   : > { %8074 = vmatprep.mubr.f32.mxu1 %v3861_v14  ;;  %v4208_v14 = vld [vmem:[#allocation7 + $0x1c0] sm:$0xff] }
 0x3e4   : > { %v9002_v29 = vpack.c.bf16 %v4209_v41, %v4208_v14  ;;  %v9010_v14 = vpack.c.bf16 %v4213_v20, %v4212_v56  ;;  %v10911_v41 = vld [vmem:[#allocation3 + $0x82] sm:$0xff]  ;;  %v10920_v56 = vld [vmem:[#allocation3 + $0xaa] sm:$0xff] }
 0x3e5   : > { %11447 = vst [vmem:[#allocation20_spill] sm:$0xff] %v10920_v56 }
 0x3e6   : > { %8075 = vmatmul.mubr.f32.vlgmr.msra.gmra.mrb[0].mxu1 %v3862_v33  ;;  %v10899_v33 = vld [vmem:[#allocation3 + $0x52] sm:$0xff] }
 0x3e7   : > { %8077 = vmatprep.mubr.f32.mxu1 %v10884_v28  ;;  %8989 = vmatpush3.bf16.msra.mxu1 %v8986_v55  ;;  %v10896_v55 = vld [vmem:[#allocation3 + $0x4a] sm:$0xff]  ;;  %11443 = vst [vmem:[#allocation16_spill] sm:$0xff] %v10899_v33 }
 0x3e8   : > { %8991 = vmatprep.subr.bf16.mxu1 %v8990_v36 }
 0x3ea   : > { %8078 = vmatmul.mubr.f32.gmra.mrb[2].mxu1 %v10887_v1 }
 0x3eb   : > { %8080 = vmatprep.mubr.f32.mxu1 %v10890_v52  ;;  %8993 = vmatpush3.bf16.msra.mxu1 %v8990_v36  ;;  %v10902_v36 = vld [vmem:[#allocation3 + $0x62] sm:$0xff] }
 0x3ec   : > { %8995 = vmatprep.subr.bf16.mxu1 %v8994_v58  ;;  %11444 = vst [vmem:[#allocation17_spill] sm:$0xff] %v10902_v36 }
 0x3ee   : > { %8081 = vmatmul.mubr.f32.gmra.mrb[4].mxu1 %v10893_v31 }
 0x3ef   : > { %8083 = vmatprep.mubr.f32.mxu1 %v10896_v55  ;;  %8997 = vmatpush3.bf16.msra.mxu1 %v8994_v58  ;;  %v10908_v58 = vld [vmem:[#allocation3 + $0x7a] sm:$0xff] }
 0x3f0   : > { %8999 = vmatprep.subr.bf16.mxu1 %v8998_v3  ;;  %11446 = vst [vmem:[#allocation19_spill] sm:$0xff] %v10908_v58 }
 0x3f2   : > { %8084 = vmatmul.mubr.f32.gmra.mrb[6].mxu1 %v10899_v33  ;;  %v4214_v33 = vld [vmem:[#allocation7 + $0x1f0] sm:$0xff] }
 0x3f3   : > { %8086 = vmatprep.mubr.f32.mxu1 %v10902_v36  ;;  %9001 = vmatpush3.bf16.msra.mxu1 %v8998_v3  ;;  %v4215_v36 = vld [vmem:[#allocation7 + $0x1f8] sm:$0xff]  ;;  %v10914_v3 = vld [vmem:[#allocation3 + $0x92] sm:$0xff] }
 0x3f4   : > { %9003 = vmatprep.subr.bf16.mxu1 %v9002_v29  ;;  %v9014_v42 = vpack.c.bf16 %v4215_v36, %v4214_v33  ;;  %v10929_v33 = vld [vmem:[#allocation3 + $0xca] sm:$0xff]  ;;  %v10932_v36 = vld [vmem:[#allocation3 + $0xda] sm:$0xff] }
 0x3f5   : > { %11450 = vst [vmem:[#allocation23_spill] sm:$0xff] %v10929_v33  ;;  %11451 = vst [vmem:[#allocation24_spill] sm:$0xff] %v10932_v36 }
 0x3f6   : > { %8087 = vmatmul.mubr.f32.gmra.mrb[8].mxu1 %v10905_v62  ;;  %v4506_v62 = vld [vmem:[#allocation7 + $0x200] sm:$0xff] }
 0x3f7   : > { %8089 = vmatprep.mubr.f32.mxu1 %v10908_v58  ;;  %9005 = vmatpush3.bf16.msra.mxu1 %v9002_v29  ;;  %v4507_v58 = vld [vmem:[#allocation7 + $0x208] sm:$0xff] }
 0x3f8   : > { %9007 = vmatprep.subr.bf16.mxu1 %v9006_v7  ;;  %v9018_v20 = vpack.c.bf16 %v4507_v58, %v4506_v62  ;;  %v10923_v29 = vld [vmem:[#allocation3 + $0xb2] sm:$0xff]  ;;  %v10941_v58 = vld [vmem:[#allocation3 + $0xfa] sm:$0xff] }
 0x3f9   : > { %11448 = vst [vmem:[#allocation21_spill] sm:$0xff] %v10923_v29  ;;  %v10938_v62 = vld [vmem:[#allocation3 + $0xf2] sm:$0xff]  ;;  %11454 = vst [vmem:[#allocation27_spill] sm:$0xff] %v10941_v58 }
 0x3fa   : > { %8090 = vmatmul.mubr.f32.gmra.mrb[10].mxu1 %v10911_v41  ;;  %11453 = vst [vmem:[#allocation26_spill] sm:$0xff] %v10938_v62 }
 0x3fb   : > { %8092 = vmatprep.mubr.f32.mxu1 %v10914_v3  ;;  %9009 = vmatpush3.bf16.msra.mxu1 %v9006_v7  ;;  %v10926_v7 = vld [vmem:[#allocation3 + $0xc2] sm:$0xff] }
 0x3fc   : > { %9011 = vmatprep.subr.bf16.mxu1 %v9010_v14  ;;  %11449 = vst [vmem:[#allocation22_spill] sm:$0xff] %v10926_v7 }
 0x3fe   : > { %8093 = vmatmul.mubr.f32.gmra.mrb[12].mxu1 %v10917_v48 }
 0x3ff   : > { %8095 = vmatprep.mubr.f32.mxu1 %v10920_v56  ;;  %9013 = vmatpush3.bf16.msra.mxu1 %v9010_v14  ;;  %v10935_v14 = vld [vmem:[#allocation3 + $0xe2] sm:$0xff]  ;;  %v4511_v56 = vld [vmem:[#allocation7 + $0x228] sm:$0xff] }
 0x400   : > { %9015 = vmatprep.subr.bf16.mxu1 %v9014_v42  ;;  %11452 = vst [vmem:[#allocation25_spill] sm:$0xff] %v10935_v14 }
 0x402   : > { %8096 = vmatmul.mubr.f32.gmra.mrb[14].mxu1 %v10923_v29  ;;  %v4510_v29 = vld [vmem:[#allocation7 + $0x220] sm:$0xff] }
 0x403   : > { %8098 = vmatprep.mubr.f32.mxu1 %v10926_v7  ;;  %9017 = vmatpush3.bf16.msra.mxu1 %v9014_v42  ;;  %v10944_v42 = vld [vmem:[#allocation3 + $0x10a] sm:$0xff]  ;;  %v4508_v7 = vld [vmem:[#allocation7 + $0x210] sm:$0xff] }
 0x404   : > { %9019 = vmatprep.subr.bf16.mxu1 %v9018_v20  ;;  %11455 = vst [vmem:[#allocation28_spill] sm:$0xff] %v10944_v42 }
 0x406   : > { %8099 = vmatmul.mubr.f32.gmra.mrb[16].mxu1 %v10929_v33  ;;  %v10947_v33 = vld [vmem:[#allocation3 + $0x112] sm:$0xff] }
 0x407   : > { %8101 = vmatprep.mubr.f32.mxu1 %v10932_v36  ;;  %11456 = vst [vmem:[#allocation29_spill] sm:$0xff] %v10947_v33  ;;  %v10950_v36 = vld [vmem:[#allocation3 + $0x122] sm:$0xff] }
 0x408   : > { %11457 = vst [vmem:[#allocation30_spill] sm:$0xff] %v10950_v36 }
 0x40a   : > { %8102 = vmatmul.mubr.f32.gmra.mrb[18].mxu1 %v10935_v14  ;;  %v10953_v14 = vld [vmem:[#allocation3 + $0x12a] sm:$0xff] }
 0x40b   : > { %8104 = vmatprep.mubr.f32.mxu1 %v10938_v62  ;;  %11458 = vst [vmem:[#allocation31_spill] sm:$0xff] %v10953_v14  ;;  %v10956_v62 = vld [vmem:[#allocation3 + $0x13a] sm:$0xff] }
 0x40c   : > { %11459 = vst [vmem:[#allocation32_spill] sm:$0xff] %v10956_v62 }
 0x40e   : > { %8105 = vmatmul.mubr.f32.gmra.mrb[20].mxu1 %v10941_v58  ;;  %v10959_v58 = vld [vmem:[#allocation3 + $0x142] sm:$0xff] }
 0x40f   : > { %8107 = vmatprep.mubr.f32.mxu1 %v10944_v42  ;;  %11460 = vst [vmem:[#allocation33_spill] sm:$0xff] %v10959_v58  ;;  %v10962_v42 = vld [vmem:[#allocation3 + $0x152] sm:$0xff] }
 0x410   : > { %11461 = vst [vmem:[#allocation34_spill] sm:$0xff] %v10962_v42 }
 0x412   : > { %8108 = vmatmul.mubr.f32.gmra.mrb[22].mxu1 %v10947_v33  ;;  %v10965_v33 = vld [vmem:[#allocation3 + $0x15a] sm:$0xff] }
 0x413   : > { %8110 = vmatprep.mubr.f32.mxu1 %v10950_v36  ;;  %11462 = vst [vmem:[#allocation35_spill] sm:$0xff] %v10965_v33  ;;  %v10968_v36 = vld [vmem:[#allocation3 + $0x16a] sm:$0xff] }
 0x414   : > { %11463 = vst [vmem:[#allocation36_spill] sm:$0xff] %v10968_v36 }
 0x416   : > { %8111 = vmatmul.mubr.f32.gmra.mrb[24].mxu1 %v10953_v14  ;;  %v10971_v14 = vld [vmem:[#allocation3 + $0x172] sm:$0xff] }
 0x417   : > { %8113 = vmatprep.mubr.f32.mxu1 %v10956_v62  ;;  %11464 = vst [vmem:[#allocation37_spill] sm:$0xff] %v10971_v14  ;;  %v4509_v62 = vld [vmem:[#allocation7 + $0x218] sm:$0xff] }
 0x41a   : > { %8114 = vmatmul.mubr.f32.gmra.mrb[26].mxu1 %v10959_v58  ;;  %v9022_v58 = vpack.c.bf16 %v4509_v62, %v4508_v7  ;;  %v4515_v7 = vld [vmem:[#allocation7 + $0x248] sm:$0xff]  ;;  %v4518_v62 = vld [vmem:[#allocation7 + $0x260] sm:$0xff] }
 0x41b   : > { %8116 = vmatprep.mubr.f32.mxu1 %v10962_v42  ;;  %v4512_v42 = vld [vmem:[#allocation7 + $0x230] sm:$0xff] }
 0x41e   : > { %8117 = vmatmul.mubr.f32.gmra.mrb[28].mxu1 %v10965_v33  ;;  %v9026_v33 = vpack.c.bf16 %v4511_v56, %v4510_v29  ;;  %v4517_v56 = vld [vmem:[#allocation7 + $0x258] sm:$0xff] }
 0x41f   : > { %8119 = vmatprep.mubr.f32.mxu1 %v10968_v36  ;;  %v4513_v36 = vld [vmem:[#allocation7 + $0x238] sm:$0xff] }
 0x422   : > { %8120 = vmatmul.mubr.f32.gmra.mrb[30].mxu1 %v10971_v14  ;;  %v9030_v14 = vpack.c.bf16 %v4513_v36, %v4512_v42  ;;  %v4519_v36 = vld [vmem:[#allocation7 + $0x268] sm:$0xff]  ;;  %v4521_v42 = vld [vmem:[#allocation7 + $0x278] sm:$0xff] }
 0x423   : > { %8154 = vmatprep.mubr.f32.mxu1 %v10793_v57  ;;  %v4514_v57 = vld [vmem:[#allocation7 + $0x240] sm:$0xff] }
 0x426   : > { %8155 = vmatmul.mubr.f32.vlgmr.msra.gmra.mrb[0].mxu1 %v10797_v47  ;;  %v9034_v47 = vpack.c.bf16 %v4515_v7, %v4514_v57  ;;  %v4812_v57 = vld [vmem:[#allocation7 + $0x280] sm:$0xff]  ;;  %v4813_v7 = vld [vmem:[#allocation7 + $0x288] sm:$0xff] }
 0x427   : > { %8157 = vmatprep.mubr.f32.mxu1 %v10800_v26  ;;  %9021 = vmatpush3.bf16.msra.mxu1 %v9018_v20  ;;  %v4516_v20 = vld [vmem:[#allocation7 + $0x250] sm:$0xff] }
 0x428   : > { %9023 = vmatprep.subr.bf16.mxu1 %v9022_v58  ;;  %v9038_v29 = vpack.c.bf16 %v4517_v56, %v4516_v20  ;;  %v11004_v20 = vld [vmem:[#allocation3 + $0x180] sm:$0xff]  ;;  %v11007_v56 = vld [vmem:[#allocation3 + $0x188] sm:$0xff] }
 0x429   : > { %11465 = vst [vmem:[#allocation38_spill] sm:$0xff] %v11004_v20  ;;  %11466 = vst [vmem:[#allocation39_spill] sm:$0xff] %v11007_v56 }
 0x42a   : > { %8158 = vmatmul.mubr.f32.gmra.mrb[2].mxu1 %v10803_v19 }
 0x42b   : > { %8160 = vmatprep.mubr.f32.mxu1 %v10806_v17  ;;  %9025 = vmatpush3.bf16.msra.mxu1 %v9022_v58  ;;  %v4520_v58 = vld [vmem:[#allocation7 + $0x270] sm:$0xff] }
 0x42c   : > { %9027 = vmatprep.subr.bf16.mxu1 %v9026_v33 }
 0x42e   : > { %8161 = vmatmul.mubr.f32.gmra.mrb[4].mxu1 %v10809_v34 }
 0x42f   : > { %8163 = vmatprep.mubr.f32.mxu1 %v10812_v38  ;;  %9029 = vmatpush3.bf16.msra.mxu1 %v9026_v33  ;;  %v9042_v33 = vpack.c.bf16 %v4519_v36, %v4518_v62  ;;  %v4815_v62 = vld [vmem:[#allocation7 + $0x298] sm:$0xff]  ;;  %v4473_v36 = vld [vmem:[#allocation3 + $0x19] sm:$0xff] }
 0x430   : > { %9031 = vmatprep.subr.bf16.mxu1 %v9030_v14 }
 0x432   : > { %8164 = vmatmul.mubr.f32.gmra.mrb[6].mxu1 %v10815_v24 }
 0x433   : > { %8166 = vmatprep.mubr.f32.mxu1 %v10818_v63  ;;  %9033 = vmatpush3.bf16.msra.mxu1 %v9030_v14  ;;  %v9046_v14 = vpack.c.bf16 %v4521_v42, %v4520_v58  ;;  %v4474_v58 = vld [vmem:[#allocation3 + $0x21] sm:$0xff]  ;;  %v4816_v42 = vld [vmem:[#allocation7 + $0x2a0] sm:$0xff] }
 0x434   : > { %9035 = vmatprep.subr.bf16.mxu1 %v9034_v47 }
 0x436   : > { %8167 = vmatmul.mubr.f32.gmra.mrb[8].mxu1 %v10821_v6 }
 0x437   : > { %8169 = vmatprep.mubr.f32.mxu1 %v10824_v15  ;;  %9037 = vmatpush3.bf16.msra.mxu1 %v9034_v47  ;;  %v9050_v47 = vpack.c.bf16 %v4813_v7, %v4812_v57  ;;  %v11010_v57 = vld [vmem:[#allocation3 + $0x31] sm:$0xff] }
 0x438   : > { %9039 = vmatprep.subr.bf16.mxu1 %v9038_v29 }
 0x43a   : > { %8170 = vmatmul.mubr.f32.gmra.mrb[10].mxu1 %v10827_v22 }
 0x43b   : > { %8172 = vmatprep.mubr.f32.mxu1 %v10830_v54  ;;  %9041 = vmatpush3.bf16.msra.mxu1 %v9038_v29  ;;  %v4814_v29 = vld [vmem:[#allocation7 + $0x290] sm:$0xff] }
 0x43c   : > { %9043 = vmatprep.subr.bf16.mxu1 %v9042_v33 }
 0x43e   : > { %8173 = vmatmul.mubr.f32.gmra.mrb[12].mxu1 %v10833_v60 }
 0x43f   : > { %8175 = vmatprep.mubr.f32.mxu1 %v10836_v61  ;;  %9045 = vmatpush3.bf16.msra.mxu1 %v9042_v33  ;;  %v9054_v33 = vpack.c.bf16 %v4815_v62, %v4814_v29  ;;  %v11019_v62 = vld [vmem:[#allocation3 + $0x51] sm:$0xff] }
 0x440   : > { %9047 = vmatprep.subr.bf16.mxu1 %v9046_v14  ;;  %11469 = vst [vmem:[#allocation42_spill] sm:$0xff] %v11019_v62 }
 0x442   : > { %8176 = vmatmul.mubr.f32.gmra.mrb[14].mxu1 %v10839_v2 }
 0x443   : > { %8178 = vmatprep.mubr.f32.mxu1 %v10842_v5  ;;  %9049 = vmatpush3.bf16.msra.mxu1 %v9046_v14  ;;  %v4817_v14 = vld [vmem:[#allocation7 + $0x2a8] sm:$0xff] }
 0x444   : > { %9051 = vmatprep.subr.bf16.mxu1 %v9050_v47  ;;  %v9058_v7 = vpack.c.bf16 %v4817_v14, %v4816_v42  ;;  %v11025_v14 = vld [vmem:[#allocation3 + $0x69] sm:$0xff] }
 0x445   : > { %11471 = vst [vmem:[#allocation44_spill] sm:$0xff] %v11025_v14 }
 0x446   : > { %8179 = vmatmul.mubr.f32.gmra.mrb[16].mxu1 %v10845_v10 }
 0x447   : > { %8181 = vmatprep.mubr.f32.mxu1 %v10848_v11 }
 0x44a   : > { %8182 = vmatmul.mubr.f32.gmra.mrb[18].mxu1 %v10851_v21 }
 0x44b   : > { %8184 = vmatprep.mubr.f32.mxu1 %v10854_v30 }
 0x44e   : > { %8185 = vmatmul.mubr.f32.gmra.mrb[20].mxu1 %v10857_v35 }
 0x44f   : > { %8187 = vmatprep.mubr.f32.mxu1 %v10860_v44 }
 0x452   : > { %8188 = vmatmul.mubr.f32.gmra.mrb[22].mxu1 %v10863_v43 }
 0x453   : > { %8190 = vmatprep.mubr.f32.mxu1 %v10866_v4 }
 0x456   : > { %8191 = vmatmul.mubr.f32.gmra.mrb[24].mxu1 %v10869_v39 }
 0x457   : > { %8193 = vmatprep.mubr.f32.mxu1 %v10872_v45 }
 0x45a   : > { %8194 = vmatmul.mubr.f32.gmra.mrb[26].mxu1 %v10875_v8 }
 0x45b   : > { %8196 = vmatprep.mubr.f32.mxu1 %v10878_v13  ;;  %v4819_v13 = vld [vmem:[#allocation7 + $0x2b8] sm:$0xff] }
 0x45e   : > { %8197 = vmatmul.mubr.f32.gmra.mrb[28].mxu1 %v10881_v32  ;;  %v4818_v32 = vld [vmem:[#allocation7 + $0x2b0] sm:$0xff] }
 0x45f   : > { %8199 = vmatprep.mubr.f32.mxu1 %v11004_v20  ;;  %v11013_v20 = vld [vmem:[#allocation3 + $0x39] sm:$0xff]  ;;  %v9062_v29 = vpack.c.bf16 %v4819_v13, %v4818_v32 }
 0x460   : > { %11467 = vst [vmem:[#allocation40_spill] sm:$0xff] %v11013_v20  ;;  %v11028_v13 = vld [vmem:[#allocation3 + $0x79] sm:$0xff] }
 0x461   : > { %11472 = vst [vmem:[#allocation45_spill] sm:$0xff] %v11028_v13 }
 0x462   : > { %8200 = vmatmul.mubr.f32.gmra.mrb[30].mxu1 %v11007_v56  ;;  %v11016_v56 = vld [vmem:[#allocation3 + $0x49] sm:$0xff] }
 0x463   : > { %8234 = vmatprep.mubr.f32.mxu1 %v4473_v36  ;;  %11468 = vst [vmem:[#allocation41_spill] sm:$0xff] %v11016_v56  ;;  %v4820_v36 = vld [vmem:[#allocation7 + $0x2c0] sm:$0xff] }
 0x466   : > { %8235 = vmatmul.mubr.f32.vlgmr.msra.gmra.mrb[0].mxu1 %v4474_v58  ;;  %v4821_v58 = vld [vmem:[#allocation7 + $0x2c8] sm:$0xff] }
 0x467   : > { %8237 = vmatprep.mubr.f32.mxu1 %v11010_v57  ;;  %9053 = vmatpush3.bf16.msra.mxu1 %v9050_v47  ;;  %v11022_v47 = vld [vmem:[#allocation3 + $0x61] sm:$0xff]  ;;  %v9066_v42 = vpack.c.bf16 %v4821_v58, %v4820_v36  ;;  %v11037_v58 = vld [vmem:[#allocation3 + $0x99] sm:$0xff] }
 0x468   : > { %9055 = vmatprep.subr.bf16.mxu1 %v9054_v33  ;;  %11470 = vst [vmem:[#allocation43_spill] sm:$0xff] %v11022_v47 }
 0x46a   : > { %8238 = vmatmul.mubr.f32.gmra.mrb[2].mxu1 %v11013_v20  ;;  %v4822_v20 = vld [vmem:[#allocation7 + $0x2d0] sm:$0xff] }
 0x46b   : > { %8240 = vmatprep.mubr.f32.mxu1 %v11016_v56  ;;  %9057 = vmatpush3.bf16.msra.mxu1 %v9054_v33  ;;  %v4823_v56 = vld [vmem:[#allocation7 + $0x2d8] sm:$0xff] }
 0x46c   : > { %9059 = vmatprep.subr.bf16.mxu1 %v9058_v7  ;;  %v9070_v32 = vpack.c.bf16 %v4823_v56, %v4822_v20  ;;  %v11031_v33 = vld [vmem:[#allocation3 + $0x81] sm:$0xff]  ;;  %v11040_v20 = vld [vmem:[#allocation3 + $0xa9] sm:$0xff] }
 0x46d   : > { %11473 = vst [vmem:[#allocation46_spill] sm:$0xff] %v11031_v33 }
 0x46e   : > { %8241 = vmatmul.mubr.f32.gmra.mrb[4].mxu1 %v11019_v62  ;;  %v4824_v62 = vld [vmem:[#allocation7 + $0x2e0] sm:$0xff] }
 0x46f   : > { %8243 = vmatprep.mubr.f32.mxu1 %v11022_v47  ;;  %9061 = vmatpush3.bf16.msra.mxu1 %v9058_v7  ;;  %v4825_v47 = vld [vmem:[#allocation7 + $0x2e8] sm:$0xff] }
 0x470   : > { %9063 = vmatprep.subr.bf16.mxu1 %v9062_v29  ;;  %v11034_v7 = vld [vmem:[#allocation3 + $0x91] sm:$0xff]  ;;  %v9074_v36 = vpack.c.bf16 %v4825_v47, %v4824_v62  ;;  %v11046_v62 = vld [vmem:[#allocation3 + $0xc1] sm:$0xff] }
 0x471   : > { %11474 = vst [vmem:[#allocation47_spill] sm:$0xff] %v11034_v7 }
 0x472   : > { %8244 = vmatmul.mubr.f32.gmra.mrb[6].mxu1 %v11025_v14  ;;  %v4826_v14 = vld [vmem:[#allocation7 + $0x2f0] sm:$0xff] }
 0x473   : > { %8246 = vmatprep.mubr.f32.mxu1 %v11028_v13  ;;  %9065 = vmatpush3.bf16.msra.mxu1 %v9062_v29  ;;  %v4827_v13 = vld [vmem:[#allocation7 + $0x2f8] sm:$0xff]  ;;  %v11043_v29 = vld [vmem:[#allocation3 + $0xb1] sm:$0xff] }
 0x474   : > { %9067 = vmatprep.subr.bf16.mxu1 %v9066_v42  ;;  %v9078_v56 = vpack.c.bf16 %v4827_v13, %v4826_v14  ;;  %v11480_v14 = vld [vmem:[#allocation19_spill] sm:$0xff] }
 0x475   : > { %v5132_v13 = vld [vmem:[#allocation7 + $0x368] sm:$0xff] }
 0x476   : > { %8247 = vmatmul.mubr.f32.gmra.mrb[8].mxu1 %v11031_v33  ;;  %v5119_v33 = vld [vmem:[#allocation7 + $0x300] sm:$0xff] }
 0x477   : > { %8249 = vmatprep.mubr.f32.mxu1 %v11034_v7  ;;  %9069 = vmatpush3.bf16.msra.mxu1 %v9066_v42  ;;  %v5120_v7 = vld [vmem:[#allocation7 + $0x308] sm:$0xff]  ;;  %v11049_v42 = vld [vmem:[#allocation3 + $0xc9] sm:$0xff] }
 0x478   : > { %9071 = vmatprep.subr.bf16.mxu1 %v9070_v32  ;;  %v9082_v47 = vpack.c.bf16 %v5120_v7, %v5119_v33  ;;  %v5133_v33 = vld [vmem:[#allocation7 + $0x370] sm:$0xff]  ;;  %v5134_v7 = vld [vmem:[#allocation7 + $0x378] sm:$0xff] }
 0x47a   : > { %8250 = vmatmul.mubr.f32.gmra.mrb[10].mxu1 %v11037_v58 }
 0x47b   : > { %8252 = vmatprep.mubr.f32.mxu1 %v11040_v20  ;;  %9073 = vmatpush3.bf16.msra.mxu1 %v9070_v32 }
 0x47c   : > { %9075 = vmatprep.subr.bf16.mxu1 %v9074_v36 }
 0x47e   : > { %8253 = vmatmul.mubr.f32.gmra.mrb[12].mxu1 %v11043_v29 }
 0x47f   : > { %8255 = vmatprep.mubr.f32.mxu1 %v11046_v62  ;;  %9077 = vmatpush3.bf16.msra.mxu1 %v9074_v36  ;;  %v11481_v36 = vld [vmem:[#allocation20_spill] sm:$0xff] }
 0x480   : > { %9079 = vmatprep.subr.bf16.mxu1 %v9078_v56 }
 0x482   : > { %8256 = vmatmul.mubr.f32.gmra.mrb[14].mxu1 %v11049_v42 }
 0x483   : > { %8258 = vmatprep.mubr.f32.mxu1 %v10700_v9  ;;  %9081 = vmatpush3.bf16.msra.mxu1 %v9078_v56  ;;  %v5121_v9 = vld [vmem:[#allocation7 + $0x310] sm:$0xff]  ;;  %v9110_v56 = vpack.c.bf16 %v5134_v7, %v5133_v33  ;;  %v5432_v7 = vld [vmem:[#allocation7 + $0x3b8] sm:$0xff] }
 0x484   : > { %9083 = vmatprep.subr.bf16.mxu1 %v9082_v47  ;;  %v5431_v33 = vld [vmem:[#allocation7 + $0x3b0] sm:$0xff] }
 0x486   : > { %8259 = vmatmul.mubr.f32.gmra.mrb[16].mxu1 %v10697_v27  ;;  %v11475_v27 = vmax.f32 %v10781_v50, 0.0 }
 0x487   : > { %8261 = vmatprep.mubr.f32.mxu1 %v10712_v23  ;;  %v11476_v23 = vmax.f32 %v10777_v51, 0.0  ;;  %v11478_v51 = vld [vmem:[#allocation17_spill] sm:$0xff] }
 0x48a   : > { %8262 = vmatmul.mubr.f32.gmra.mrb[18].mxu1 %v10708_v18  ;;  %v5122_v18 = vld [vmem:[#allocation7 + $0x318] sm:$0xff] }
 0x48b   : > { %8264 = vmatprep.mubr.f32.mxu1 %v10724_v40  ;;  %v5123_v40 = vld [vmem:[#allocation7 + $0x320] sm:$0xff] }
 0x48e   : > { %8265 = vmatmul.mubr.f32.gmra.mrb[20].mxu1 %v10720_v37  ;;  %v9086_v37 = vpack.c.bf16 %v5122_v18, %v5121_v9  ;;  %v11482_v9 = vld [vmem:[#allocation21_spill] sm:$0xff]  ;;  %v11483_v18 = vld [vmem:[#allocation22_spill] sm:$0xff] }
 0x48f   : > { %8267 = vmatprep.mubr.f32.mxu1 %v10736_v46 }
 0x492   : > { %8268 = vmatmul.mubr.f32.gmra.mrb[22].mxu1 %v10732_v53  ;;  %v5124_v53 = vld [vmem:[#allocation7 + $0x328] sm:$0xff] }
 0x493   : > { %8270 = vmatprep.mubr.f32.mxu1 %v10748_v25  ;;  %v9090_v46 = vpack.c.bf16 %v5124_v53, %v5123_v40  ;;  %v5126_v25 = vld [vmem:[#allocation7 + $0x338] sm:$0xff]  ;;  %v11488_v40 = vld [vmem:[#allocation27_spill] sm:$0xff]  ;;  %v11489_v53 = vld [vmem:[#allocation28_spill] sm:$0xff] }
 0x496   : > { %8271 = vmatmul.mubr.f32.gmra.mrb[24].mxu1 %v10744_v16  ;;  %v5125_v16 = vld [vmem:[#allocation7 + $0x330] sm:$0xff] }
 0x497   : > { %8273 = vmatprep.mubr.f32.mxu1 %v10760_v0  ;;  %v5127_v0 = vld [vmem:[#allocation7 + $0x340] sm:$0xff] }
 0x49a   : > { %8274 = vmatmul.mubr.f32.gmra.mrb[26].mxu1 %v10756_v59  ;;  %v9094_v59 = vpack.c.bf16 %v5126_v25, %v5125_v16  ;;  %v11491_v16 = vld [vmem:[#allocation30_spill] sm:$0xff]  ;;  %v11492_v25 = vld [vmem:[#allocation31_spill] sm:$0xff] }
 0x49b   : > { %8276 = vmatprep.mubr.f32.mxu1 %v10772_v49  ;;  %v11477_v49 = vld [vmem:[#allocation16_spill] sm:$0xff] }
 0x49e   : > { %8277 = vmatmul.mubr.f32.gmra.mrb[28].mxu1 %v10768_v12  ;;  %v5128_v12 = vld [vmem:[#allocation7 + $0x348] sm:$0xff] }
 0x49f   : > { %8279 = vmatprep.mubr.f32.mxu1 %v11475_v27  ;;  %v9098_v50 = vpack.c.bf16 %v5128_v12, %v5127_v0  ;;  %v5426_v27 = vld [vmem:[#allocation7 + $0x388] sm:$0xff]  ;;  %v11494_v0 = vld [vmem:[#allocation33_spill] sm:$0xff]  ;;  %v11495_v12 = vld [vmem:[#allocation34_spill] sm:$0xff] }
 0x4a2   : > { %8280 = vmatmul.mubr.f32.gmra.mrb[30].mxu1 %v11476_v23  ;;  %v11485_v23 = vld [vmem:[#allocation24_spill] sm:$0xff] }
 0x4a3   : > { %8314 = vmatprep.mubr.f32.mxu1 %v10884_v28  ;;  %v5129_v28 = vld [vmem:[#allocation7 + $0x350] sm:$0xff] }
 0x4a6   : > { %8315 = vmatmul.mubr.f32.vlgmr.msra.gmra.mrb[0].mxu1 %v10887_v1  ;;  %v5130_v1 = vld [vmem:[#allocation7 + $0x358] sm:$0xff] }
 0x4a7   : > { %8317 = vmatprep.mubr.f32.mxu1 %v10890_v52  ;;  %9085 = vmatpush3.bf16.msra.mxu1 %v9082_v47  ;;  %v11479_v52 = vld [vmem:[#allocation18_spill] sm:$0xff] }
 0x4a8   : > { %9087 = vmatprep.subr.bf16.mxu1 %v9086_v37  ;;  %v5425_v47 = vld [vmem:[#allocation7 + $0x380] sm:$0xff] }
 0x4aa   : > { %8318 = vmatmul.mubr.f32.gmra.mrb[2].mxu1 %v10893_v31  ;;  %v9102_v31 = vpack.c.bf16 %v5130_v1, %v5129_v28  ;;  %v11100_v28 = vld [vmem:[#allocation3 + $0x182] sm:$0xff]  ;;  %v11103_v1 = vld [vmem:[#allocation3 + $0x18a] sm:$0xff] }
 0x4ab   : > { %8320 = vmatprep.mubr.f32.mxu1 %v10896_v55  ;;  %9089 = vmatpush3.bf16.msra.mxu1 %v9086_v37  ;;  %v5131_v55 = vld [vmem:[#allocation7 + $0x360] sm:$0xff] }
 0x4ac   : > { %9091 = vmatprep.subr.bf16.mxu1 %v9090_v46  ;;  %v9106_v32 = vpack.c.bf16 %v5132_v13, %v5131_v55  ;;  %v11487_v37 = vld [vmem:[#allocation26_spill] sm:$0xff]  ;;  %v5430_v13 = vld [vmem:[#allocation7 + $0x3a8] sm:$0xff] }
 0x4ad   : > { %v5429_v55 = vld [vmem:[#allocation7 + $0x3a0] sm:$0xff] }
 0x4ae   : > { %8321 = vmatmul.mubr.f32.gmra.mrb[4].mxu1 %v11477_v49  ;;  %v11496_v49 = vld [vmem:[#allocation35_spill] sm:$0xff] }
 0x4af   : > { %8323 = vmatprep.mubr.f32.mxu1 %v11478_v51  ;;  %9093 = vmatpush3.bf16.msra.mxu1 %v9090_v46  ;;  %v11490_v46 = vld [vmem:[#allocation29_spill] sm:$0xff]  ;;  %v11497_v51 = vld [vmem:[#allocation36_spill] sm:$0xff] }
 0x4b0   : > { %9095 = vmatprep.subr.bf16.mxu1 %v9094_v59 }
 0x4b2   : > { %8324 = vmatmul.mubr.f32.gmra.mrb[6].mxu1 %v11479_v52  ;;  %v5427_v52 = vld [vmem:[#allocation7 + $0x390] sm:$0xff] }
 0x4b3   : > { %8326 = vmatprep.mubr.f32.mxu1 %v11480_v14  ;;  %9097 = vmatpush3.bf16.msra.mxu1 %v9094_v59  ;;  %v11493_v59 = vld [vmem:[#allocation32_spill] sm:$0xff]  ;;  %v5428_v14 = vld [vmem:[#allocation7 + $0x398] sm:$0xff] }
 0x4b4   : > { %9099 = vmatprep.subr.bf16.mxu1 %v9098_v50 }
 0x4b6   : > { %8327 = vmatmul.mubr.f32.gmra.mrb[8].mxu1 %v10911_v41  ;;  %v9114_v41 = vpack.c.bf16 %v5426_v27, %v5425_v47  ;;  %v5436_v47 = vld [vmem:[#allocation7 + $0x3d8] sm:$0xff]  ;;  %v5438_v27 = vld [vmem:[#allocation7 + $0x3e8] sm:$0xff] }
 0x4b7   : > { %8329 = vmatprep.mubr.f32.mxu1 %v10914_v3  ;;  %9101 = vmatpush3.bf16.msra.mxu1 %v9098_v50  ;;  %v11484_v3 = vld [vmem:[#allocation23_spill] sm:$0xff]  ;;  %v11498_v50 = vld [vmem:[#allocation37_spill] sm:$0xff] }
 0x4b8   : > { %9103 = vmatprep.subr.bf16.mxu1 %v9102_v31 }
 0x4ba   : > { %8330 = vmatmul.mubr.f32.gmra.mrb[10].mxu1 %v10917_v48  ;;  %v11486_v48 = vld [vmem:[#allocation25_spill] sm:$0xff] }
 0x4bb   : > { %8332 = vmatprep.mubr.f32.mxu1 %v11481_v36  ;;  %9105 = vmatpush3.bf16.msra.mxu1 %v9102_v31  ;;  %v9118_v31 = vpack.c.bf16 %v5428_v14, %v5427_v52  ;;  %v9126_v36 = vpack.c.bf16 %v5432_v7, %v5431_v33  ;;  %v5406_v14 = vld [vmem:[#allocation3 + $0xd9] sm:$0xff]  ;;  %v5416_v33 = vld [vmem:[#allocation3 + $0x151] sm:$0xff] }
 0x4bc   : > { %9107 = vmatprep.subr.bf16.mxu1 %v9106_v32  ;;  %v5417_v7 = vld [vmem:[#allocation3 + $0x159] sm:$0xff] }
 0x4be   : > { %8333 = vmatmul.mubr.f32.gmra.mrb[12].mxu1 %v11482_v9  ;;  %v5440_v9 = vld [vmem:[#allocation7 + $0x3f8] sm:$0xff] }
 0x4bf   : > { %8335 = vmatprep.mubr.f32.mxu1 %v11483_v18  ;;  %9109 = vmatpush3.bf16.msra.mxu1 %v9106_v32  ;;  %v9122_v32 = vpack.c.bf16 %v5430_v13, %v5429_v55  ;;  %v5732_v18 = vld [vmem:[#allocation7 + $0x408] sm:$0xff]  ;;  %v5410_v55 = vld [vmem:[#allocation3 + $0x109] sm:$0xff] }
 0x4c0   : > { %9111 = vmatprep.subr.bf16.mxu1 %v9110_v56  ;;  %v5413_v13 = vld [vmem:[#allocation3 + $0x129] sm:$0xff] }
 0x4c2   : > { %8336 = vmatmul.mubr.f32.gmra.mrb[14].mxu1 %v11484_v3 }
 0x4c3   : > { %8338 = vmatprep.mubr.f32.mxu1 %v11485_v23  ;;  %9113 = vmatpush3.bf16.msra.mxu1 %v9110_v56  ;;  %v5434_v56 = vld [vmem:[#allocation7 + $0x3c8] sm:$0xff] }
 0x4c4   : > { %9115 = vmatprep.subr.bf16.mxu1 %v9114_v41  ;;  %v5740_v23 = vld [vmem:[#allocation7 + $0x448] sm:$0xff] }
 0x4c6   : > { %8339 = vmatmul.mubr.f32.gmra.mrb[16].mxu1 %v11486_v48  ;;  %v11507_v48 = vld [vmem:[#allocation44_spill] sm:$0xff] }
 0x4c7   : > { %8341 = vmatprep.mubr.f32.mxu1 %v11487_v37  ;;  %v11508_v37 = vld [vmem:[#allocation45_spill] sm:$0xff] }
 0x4ca   : > { %8342 = vmatmul.mubr.f32.gmra.mrb[18].mxu1 %v11488_v40 }
 0x4cb   : > { %8344 = vmatprep.mubr.f32.mxu1 %v11489_v53  ;;  %v5741_v53 = vld [vmem:[#allocation7 + $0x450] sm:$0xff] }
 0x4ce   : > { %8345 = vmatmul.mubr.f32.gmra.mrb[20].mxu1 %v11490_v46  ;;  %v5742_v46 = vld [vmem:[#allocation7 + $0x458] sm:$0xff] }
 0x4cf   : > { %8347 = vmatprep.mubr.f32.mxu1 %v11491_v16  ;;  %v11509_v16 = vld [vmem:[#allocation46_spill] sm:$0xff] }
 0x4d2   : > { %8348 = vmatmul.mubr.f32.gmra.mrb[22].mxu1 %v11492_v25  ;;  %v11510_v25 = vld [vmem:[#allocation47_spill] sm:$0xff] }
 0x4d3   : > { %8350 = vmatprep.mubr.f32.mxu1 %v11493_v59  ;;  %v9166_v59 = vpack.c.bf16 %v5742_v46, %v5741_v53  ;;  %v11160_v53 = vld [vmem:[%s11282_s6] ss:$0 sm:$0xff] }
 0x4d6   : > { %8351 = vmatmul.mubr.f32.gmra.mrb[24].mxu1 %v11494_v0  ;;  %v5743_v0 = vld [vmem:[#allocation7 + $0x460] sm:$0xff] }
 0x4d7   : > { %8353 = vmatprep.mubr.f32.mxu1 %v11495_v12  ;;  %v5744_v12 = vld [vmem:[#allocation7 + $0x468] sm:$0xff] }
 0x4da   : > { %8354 = vmatmul.mubr.f32.gmra.mrb[26].mxu1 %v11496_v49  ;;  %v9170_v49 = vpack.c.bf16 %v5744_v12, %v5743_v0 }
 0x4db   : > { %8356 = vmatprep.mubr.f32.mxu1 %v11497_v51  ;;  %v5745_v51 = vld [vmem:[#allocation7 + $0x470] sm:$0xff] }
 0x4de   : > { %8357 = vmatmul.mubr.f32.gmra.mrb[28].mxu1 %v11498_v50  ;;  %v5746_v50 = vld [vmem:[#allocation7 + $0x478] sm:$0xff] }
 0x4df   : > { %8359 = vmatprep.mubr.f32.mxu1 %v11100_v28  ;;  %v9174_v52 = vpack.c.bf16 %v5746_v50, %v5745_v51 }
 0x4e2   : > { %8360 = vmatmul.mubr.f32.gmra.mrb[30].mxu1 %v11103_v1 }
 0x4e3   : > { %8394 = vmatprep.mubr.f32.mxu1 %v10800_v26  ;;  %v5433_v26 = vld [vmem:[#allocation7 + $0x3c0] sm:$0xff] }
 0x4e6   : > { %8395 = vmatmul.mubr.f32.vlgmr.msra.gmra.mrb[0].mxu1 %v10803_v19  ;;  %v9130_v19 = vpack.c.bf16 %v5434_v56, %v5433_v26  ;;  %v5419_v26 = vld [vmem:[#allocation3 + $0x171] sm:$0xff]  ;;  %v5420_v56 = vld [vmem:[#allocation3 + $0x181] sm:$0xff] }
 0x4e7   : > { %8397 = vmatprep.mubr.f32.mxu1 %v10806_v17  ;;  %9117 = vmatpush3.bf16.msra.mxu1 %v9114_v41  ;;  %v5435_v17 = vld [vmem:[#allocation7 + $0x3d0] sm:$0xff]  ;;  %v11506_v41 = vld [vmem:[#allocation43_spill] sm:$0xff] }
 0x4e8   : > { %9119 = vmatprep.subr.bf16.mxu1 %v9118_v31 }
 0x4ea   : > { %8398 = vmatmul.mubr.f32.gmra.mrb[2].mxu1 %v10809_v34  ;;  %v9134_v34 = vpack.c.bf16 %v5436_v47, %v5435_v17  ;;  %v5421_v17 = vld [vmem:[#allocation3 + $0x189] sm:$0xff]  ;;  %v5423_v47 = vld [vmem:[#allocation3 + $0x1a1] sm:$0xff] }
 0x4eb   : > { %8400 = vmatprep.mubr.f32.mxu1 %v10812_v38  ;;  %9121 = vmatpush3.bf16.msra.mxu1 %v9118_v31  ;;  %v5437_v38 = vld [vmem:[#allocation7 + $0x3e0] sm:$0xff]  ;;  %v5409_v31 = vld [vmem:[#allocation3 + $0xf9] sm:$0xff] }
 0x4ec   : > { %9123 = vmatprep.subr.bf16.mxu1 %v9122_v32 }
 0x4ee   : > { %8401 = vmatmul.mubr.f32.gmra.mrb[4].mxu1 %v10815_v24  ;;  %v9138_v24 = vpack.c.bf16 %v5438_v27, %v5437_v38  ;;  %v5699_v38 = vld [vmem:[#allocation3 + $0x3a] sm:$0xff]  ;;  %v5700_v27 = vld [vmem:[#allocation3 + $0x4a] sm:$0xff] }
 0x4ef   : > { %8403 = vmatprep.mubr.f32.mxu1 %v10818_v63  ;;  %9125 = vmatpush3.bf16.msra.mxu1 %v9122_v32  ;;  %v5439_v63 = vld [vmem:[#allocation7 + $0x3f0] sm:$0xff] }
 0x4f0   : > { %9127 = vmatprep.subr.bf16.mxu1 %v9126_v36  ;;  %v5415_v32 = vld [vmem:[#allocation3 + $0x141] sm:$0xff] }
 0x4f2   : > { %8404 = vmatmul.mubr.f32.gmra.mrb[6].mxu1 %v10821_v6  ;;  %v9142_v6 = vpack.c.bf16 %v5440_v9, %v5439_v63  ;;  %v5702_v63 = vld [vmem:[#allocation3 + $0x62] sm:$0xff]  ;;  %v5703_v9 = vld [vmem:[#allocation3 + $0x6a] sm:$0xff] }
 0x4f3   : > { %8406 = vmatprep.mubr.f32.mxu1 %v10824_v15  ;;  %9129 = vmatpush3.bf16.msra.mxu1 %v9126_v36  ;;  %v5731_v15 = vld [vmem:[#allocation7 + $0x400] sm:$0xff] }
 0x4f4   : > { %9131 = vmatprep.subr.bf16.mxu1 %v9130_v19  ;;  %v5418_v36 = vld [vmem:[#allocation3 + $0x169] sm:$0xff] }
 0x4f6   : > { %8407 = vmatmul.mubr.f32.gmra.mrb[8].mxu1 %v10827_v22  ;;  %v9146_v22 = vpack.c.bf16 %v5732_v18, %v5731_v15  ;;  %v5705_v15 = vld [vmem:[#allocation3 + $0x82] sm:$0xff]  ;;  %v5706_v18 = vld [vmem:[#allocation3 + $0x92] sm:$0xff] }
 0x4f7   : > { %8409 = vmatprep.mubr.f32.mxu1 %v10830_v54  ;;  %9133 = vmatpush3.bf16.msra.mxu1 %v9130_v19  ;;  %v11499_v54 = vld [vmem:[#allocation14_spill] sm:$0xff]  ;;  %v5422_v19 = vld [vmem:[#allocation3 + $0x199] sm:$0xff] }
 0x4f8   : > { %9135 = vmatprep.subr.bf16.mxu1 %v9134_v34 }
 0x4fa   : > { %8410 = vmatmul.mubr.f32.gmra.mrb[10].mxu1 %v10833_v60  ;;  %v11500_v60 = vld [vmem:[#allocation15_spill] sm:$0xff] }
 0x4fb   : > { %8412 = vmatprep.mubr.f32.mxu1 %v10836_v61  ;;  %9137 = vmatpush3.bf16.msra.mxu1 %v9134_v34  ;;  %v11501_v61 = vld [vmem:[#allocation38_spill] sm:$0xff] }
 0x4fc   : > { %9139 = vmatprep.subr.bf16.mxu1 %v9138_v24  ;;  %v5698_v34 = vld [vmem:[#allocation3 + $0x32] sm:$0xff] }
 0x4fe   : > { %8413 = vmatmul.mubr.f32.gmra.mrb[12].mxu1 %v10839_v2  ;;  %v11502_v2 = vld [vmem:[#allocation39_spill] sm:$0xff] }
 0x4ff   : > { %8415 = vmatprep.mubr.f32.mxu1 %v10842_v5  ;;  %9141 = vmatpush3.bf16.msra.mxu1 %v9138_v24  ;;  %v9754_v5 = vld [vmem:[#allocation2] sm:$0xff] }
 0x500   : > { %9143 = vmatprep.subr.bf16.mxu1 %v9142_v6  ;;  %v5701_v24 = vld [vmem:[#allocation3 + $0x52] sm:$0xff] }
 0x502   : > { %8416 = vmatmul.mubr.f32.gmra.mrb[14].mxu1 %v10845_v10  ;;  %v5733_v10 = vld [vmem:[#allocation7 + $0x410] sm:$0xff] }
 0x503   : > { %8418 = vmatprep.mubr.f32.mxu1 %v10848_v11  ;;  %9145 = vmatpush3.bf16.msra.mxu1 %v9142_v6  ;;  %v5734_v11 = vld [vmem:[#allocation7 + $0x418] sm:$0xff]  ;;  %v5704_v6 = vld [vmem:[#allocation3 + $0x7a] sm:$0xff] }
 0x504   : > { %9147 = vmatprep.subr.bf16.mxu1 %v9146_v22 }
 0x506   : > { %8419 = vmatmul.mubr.f32.gmra.mrb[16].mxu1 %v10851_v21  ;;  %v9150_v21 = vpack.c.bf16 %v5734_v11, %v5733_v10  ;;  %v5713_v10 = vld [vmem:[#allocation3 + $0xe2] sm:$0xff]  ;;  %v5714_v11 = vld [vmem:[#allocation3 + $0xf2] sm:$0xff] }
 0x507   : > { %8421 = vmatprep.mubr.f32.mxu1 %v10854_v30  ;;  %v5735_v30 = vld [vmem:[#allocation7 + $0x420] sm:$0xff] }
 0x50a   : > { %8422 = vmatmul.mubr.f32.gmra.mrb[18].mxu1 %v10857_v35  ;;  %v5736_v35 = vld [vmem:[#allocation7 + $0x428] sm:$0xff] }
 0x50b   : > { %8424 = vmatprep.mubr.f32.mxu1 %v10860_v44  ;;  %v11503_v44 = vld [vmem:[#allocation40_spill] sm:$0xff] }
 0x50e   : > { %8425 = vmatmul.mubr.f32.gmra.mrb[20].mxu1 %v10863_v43  ;;  %v11504_v43 = vld [vmem:[#allocation41_spill] sm:$0xff] }
 0x50f   : > { %8427 = vmatprep.mubr.f32.mxu1 %v10866_v4  ;;  %v9154_v4 = vpack.c.bf16 %v5736_v35, %v5735_v30  ;;  %v5716_v30 = vld [vmem:[#allocation3 + $0x10a] sm:$0xff]  ;;  %v5717_v35 = vld [vmem:[#allocation3 + $0x112] sm:$0xff] }
 0x512   : > { %8428 = vmatmul.mubr.f32.gmra.mrb[22].mxu1 %v10869_v39  ;;  %v5737_v39 = vld [vmem:[#allocation7 + $0x430] sm:$0xff] }
 0x513   : > { %8430 = vmatprep.mubr.f32.mxu1 %v10872_v45  ;;  %v5738_v45 = vld [vmem:[#allocation7 + $0x438] sm:$0xff] }
 0x514   : > { %v9158_v3 = vpack.c.bf16 %v5738_v45, %v5737_v39  ;;  %v5721_v39 = vld [vmem:[#allocation3 + $0x142] sm:$0xff]  ;;  %v5722_v45 = vld [vmem:[#allocation3 + $0x152] sm:$0xff] }
 0x516   : > { %8431 = vmatmul.mubr.f32.gmra.mrb[24].mxu1 %v10875_v8  ;;  %v11505_v8 = vld [vmem:[#allocation42_spill] sm:$0xff] }
 0x517   : > { %8433 = vmatprep.mubr.f32.mxu1 %v11499_v54  ;;  %v5708_v54 = vld [vmem:[#allocation3 + $0xaa] sm:$0xff] }
 0x51a   : > { %8434 = vmatmul.mubr.f32.gmra.mrb[26].mxu1 %v11500_v60  ;;  %v5709_v60 = vld [vmem:[#allocation3 + $0xb2] sm:$0xff] }
 0x51b   : > { %8436 = vmatprep.mubr.f32.mxu1 %v11501_v61  ;;  %v5710_v61 = vld [vmem:[#allocation3 + $0xc2] sm:$0xff] }
 0x51e   : > { %8437 = vmatmul.mubr.f32.gmra.mrb[28].mxu1 %v11502_v2  ;;  %v5711_v2 = vld [vmem:[#allocation3 + $0xca] sm:$0xff] }
 0x51f   : > { %8439 = vmatprep.mubr.f32.mxu1 %v9754_v5 }
 0x522   : > { %8440 = vmatmul.mubr.f32.gmra.mrb[30].mxu1 %v9754_v5  ;;  %v5712_v5 = vld [vmem:[#allocation3 + $0xda] sm:$0xff] }
 0x523   : > { %8474 = vmatprep.mubr.f32.mxu1 %v11010_v57  ;;  %v5739_v57 = vld [vmem:[#allocation7 + $0x440] sm:$0xff] }
 0x524   : > { %v9162_v40 = vpack.c.bf16 %v5740_v23, %v5739_v57  ;;  %v5728_v57 = vld [vmem:[#allocation3 + $0x19a] sm:$0xff]  ;;  %v5729_v23 = vld [vmem:[#allocation3 + $0x1a2] sm:$0xff] }
 0x526   : > { %8475 = vmatmul.mubr.f32.vlgmr.msra.gmra.mrb[0].mxu1 %v11503_v44  ;;  %v5718_v44 = vld [vmem:[#allocation3 + $0x122] sm:$0xff] }
 0x527   : > { %8477 = vmatprep.mubr.f32.mxu1 %v11504_v43  ;;  %9149 = vmatpush3.bf16.msra.mxu1 %v9146_v22  ;;  %v5707_v22 = vld [vmem:[#allocation3 + $0x9a] sm:$0xff]  ;;  %v5719_v43 = vld [vmem:[#allocation3 + $0x12a] sm:$0xff] }
 0x528   : > { %9151 = vmatprep.subr.bf16.mxu1 %v9150_v21 }
 0x52a   : > { %8478 = vmatmul.mubr.f32.gmra.mrb[2].mxu1 %v11505_v8  ;;  %v5723_v8 = vld [vmem:[#allocation3 + $0x15a] sm:$0xff] }
 0x52b   : > { %8480 = vmatprep.mubr.f32.mxu1 %v11506_v41  ;;  %9153 = vmatpush3.bf16.msra.mxu1 %v9150_v21  ;;  %v5715_v21 = vld [vmem:[#allocation3 + $0xfa] sm:$0xff]  ;;  %v5724_v41 = vld [vmem:[#allocation3 + $0x16a] sm:$0xff] }
 0x52c   : > { %9155 = vmatprep.subr.bf16.mxu1 %v9154_v4 }
 0x52e   : > { %8481 = vmatmul.mubr.f32.gmra.mrb[4].mxu1 %v11507_v48  ;;  %v11155_v48 = vld [vmem:[%s11281_s5] ss:$0 sm:$0xff] }
 0x52f   : > { %8483 = vmatprep.mubr.f32.mxu1 %v11508_v37  ;;  %9157 = vmatpush3.bf16.msra.mxu1 %v9154_v4  ;;  %v5720_v4 = vld [vmem:[#allocation3 + $0x13a] sm:$0xff] }
 0x530   : > { %9159 = vmatprep.subr.bf16.mxu1 %v9158_v3 }
 0x532   : > { %8484 = vmatmul.mubr.f32.gmra.mrb[6].mxu1 %v11509_v16 }
 0x533   : > { %8486 = vmatprep.mubr.f32.mxu1 %v11510_v25  ;;  %9161 = vmatpush3.bf16.msra.mxu1 %v9158_v3  ;;  %v5725_v3 = vld [vmem:[#allocation3 + $0x172] sm:$0xff] }
 0x534   : > { %9163 = vmatprep.subr.bf16.mxu1 %v9162_v40 }
 0x536   : > { %8487 = vmatmul.mubr.f32.gmra.mrb[8].mxu1 %v11037_v58  ;;  %v5407_v58 = vld [vmem:[#allocation3 + $0xe1] sm:$0xff] }
 0x537   : > { %8489 = vmatprep.mubr.f32.mxu1 %v11040_v20  ;;  %9165 = vmatpush3.bf16.msra.mxu1 %v9162_v40  ;;  %v5408_v20 = vld [vmem:[#allocation3 + $0xf1] sm:$0xff] }
 0x538   : > { %9167 = vmatprep.subr.bf16.mxu1 %v9166_v59 }
 0x53a   : > { %8490 = vmatmul.mubr.f32.gmra.mrb[10].mxu1 %v11043_v29  ;;  %v5411_v29 = vld [vmem:[#allocation3 + $0x111] sm:$0xff] }
 0x53b   : > { %8492 = vmatprep.mubr.f32.mxu1 %v11046_v62  ;;  %9169 = vmatpush3.bf16.msra.mxu1 %v9166_v59  ;;  %v5412_v62 = vld [vmem:[#allocation3 + $0x121] sm:$0xff] }
 0x53c   : > { %9171 = vmatprep.subr.bf16.mxu1 %v9170_v49 }
 0x53e   : > { %8493 = vmatmul.mubr.f32.gmra.mrb[12].mxu1 %v11049_v42  ;;  %v5414_v42 = vld [vmem:[#allocation3 + $0x139] sm:$0xff] }
 0x53f   : > { %8495 = vmatprep.mubr.f32.mxu1 %v5406_v14  ;;  %9173 = vmatpush3.bf16.msra.mxu1 %v9170_v49 }
 0x540   : > { %9175 = vmatprep.subr.bf16.mxu1 %v9174_v52 }
 0x542   : > { %8496 = vmatmul.mubr.f32.gmra.mrb[14].mxu1 %v5407_v58 }
 0x543   : > { %8498 = vmatprep.mubr.f32.mxu1 %v5408_v20  ;;  %9177 = vmatpush3.bf16.msra.mxu1 %v9174_v52 }
 0x546   : > { %8499 = vmatmul.mubr.f32.gmra.mrb[16].mxu1 %v5409_v31 }
 0x547   : > { %8501 = vmatprep.mubr.f32.mxu1 %v5410_v55 }
 0x54a   : > { %8502 = vmatmul.mubr.f32.gmra.mrb[18].mxu1 %v5411_v29 }
 0x54b   : > { %8504 = vmatprep.mubr.f32.mxu1 %v5412_v62 }
 0x54e   : > { %8505 = vmatmul.mubr.f32.gmra.mrb[20].mxu1 %v5413_v13 }
 0x54f   : > { %8507 = vmatprep.mubr.f32.mxu1 %v5414_v42 }
 0x552   : > { %8508 = vmatmul.mubr.f32.gmra.mrb[22].mxu1 %v5415_v32 }
 0x553   : > { %8510 = vmatprep.mubr.f32.mxu1 %v5416_v33 }
 0x556   : > { %8511 = vmatmul.mubr.f32.gmra.mrb[24].mxu1 %v5417_v7 }
 0x557   : > { %8513 = vmatprep.mubr.f32.mxu1 %v5418_v36 }
 0x55a   : > { %8514 = vmatmul.mubr.f32.gmra.mrb[26].mxu1 %v5419_v26 }
 0x55b   : > { %8516 = vmatprep.mubr.f32.mxu1 %v5420_v56 }
 0x55e   : > { %8517 = vmatmul.mubr.f32.gmra.mrb[28].mxu1 %v5421_v17 }
 0x55f   : > { %8519 = vmatprep.mubr.f32.mxu1 %v5422_v19 }
 0x562   : > { %8520 = vmatmul.mubr.f32.gmra.mrb[30].mxu1 %v5423_v47 }
 0x563   : > { %8554 = vmatprep.mubr.f32.mxu1 %v5698_v34 }
 0x566   : > { %8555 = vmatmul.mubr.f32.vlgmr.msra.gmra.mrb[0].mxu1 %v5699_v38 }
 0x567   : > { %8557 = vmatprep.mubr.f32.mxu1 %v5700_v27 }
 0x56a   : > { %8558 = vmatmul.mubr.f32.gmra.mrb[2].mxu1 %v5701_v24 }
 0x56b   : > { %8560 = vmatprep.mubr.f32.mxu1 %v5702_v63 }
 0x56e   : > { %8561 = vmatmul.mubr.f32.gmra.mrb[4].mxu1 %v5703_v9 }
 0x56f   : > { %8563 = vmatprep.mubr.f32.mxu1 %v5704_v6 }
 0x572   : > { %8564 = vmatmul.mubr.f32.gmra.mrb[6].mxu1 %v5705_v15 }
 0x573   : > { %8566 = vmatprep.mubr.f32.mxu1 %v5706_v18 }
 0x576   : > { %8567 = vmatmul.mubr.f32.gmra.mrb[8].mxu1 %v5707_v22 }
 0x577   : > { %8569 = vmatprep.mubr.f32.mxu1 %v5708_v54 }
 0x57a   : > { %8570 = vmatmul.mubr.f32.gmra.mrb[10].mxu1 %v5709_v60 }
 0x57b   : > { %8572 = vmatprep.mubr.f32.mxu1 %v5710_v61 }
 0x57e   : > { %8573 = vmatmul.mubr.f32.gmra.mrb[12].mxu1 %v5711_v2 }
 0x57f   : > { %8575 = vmatprep.mubr.f32.mxu1 %v5712_v5 }
 0x582   : > { %8576 = vmatmul.mubr.f32.gmra.mrb[14].mxu1 %v5713_v10 }
 0x583   : > { %8578 = vmatprep.mubr.f32.mxu1 %v5714_v11 }
 0x586   : > { %8579 = vmatmul.mubr.f32.gmra.mrb[16].mxu1 %v5715_v21 }
 0x587   : > { %8581 = vmatprep.mubr.f32.mxu1 %v5716_v30 }
 0x58a   : > { %8582 = vmatmul.mubr.f32.gmra.mrb[18].mxu1 %v5717_v35 }
 0x58b   : > { %8584 = vmatprep.mubr.f32.mxu1 %v5718_v44 }
 0x58e   : > { %8585 = vmatmul.mubr.f32.gmra.mrb[20].mxu1 %v5719_v43 }
 0x58f   : > { %8587 = vmatprep.mubr.f32.mxu1 %v5720_v4 }
 0x592   : > { %8588 = vmatmul.mubr.f32.gmra.mrb[22].mxu1 %v5721_v39 }
 0x593   : > { %8590 = vmatprep.mubr.f32.mxu1 %v5722_v45 }
 0x596   : > { %8591 = vmatmul.mubr.f32.gmra.mrb[24].mxu1 %v5723_v8 }
 0x597   : > { %8593 = vmatprep.mubr.f32.mxu1 %v5724_v41 }
 0x59a   : > { %8594 = vmatmul.mubr.f32.gmra.mrb[26].mxu1 %v5725_v3 }
 0x59b   : > { %8596 = vmatprep.mubr.f32.mxu1 %v11100_v28 }
 0x59e   : > { %8597 = vmatmul.mubr.f32.gmra.mrb[28].mxu1 %v11103_v1 }
 0x59f   : > { %8599 = vmatprep.mubr.f32.mxu1 %v5728_v57 }
 0x5a2   : > { %8600 = vmatmul.mubr.f32.gmra.mrb[30].mxu1 %v5729_v23 }
 0x639   : > { %v8556_v37 = vpop.f32.mrb[0].mxu1 }
 0x63a   : > { %v5813_v40 = vpop.f32.mrb[1].mxu1  ;;  %v6012_v28 = vmul.f32 %v8556_v37, %v11155_v48 }
 0x63b   : > { %v6011_v46 = vmul.f32 %v11155_v48, %v5813_v40 }
 0x63c   : > { %v6051_v12 = vadd.f32 %v11160_v53, %v6012_v28 }
 0x63d   : > { %v8559_v1 = vpop.f32.mrb[2].mxu1  ;;  %v6050_v16 = vadd.f32 %v11160_v53, %v6011_v46 }
 0x63e   : > { %v5823_v25 = vpop.f32.mrb[3].mxu1  ;;  %v6014_v50 = vmul.f32 %v8559_v1, %v11155_v48  ;;  %v6083_v52 = vmax.f32 %v6051_v12, 0.0 }
 0x63f   : > { %v6013_v59 = vmul.f32 %v11155_v48, %v5823_v25  ;;  %v6082_v0 = vmax.f32 %v6050_v16, 0.0 }
 0x640   : > { %v6053_v29 = vadd.f32 %v11160_v53, %v6014_v50 }
 0x641   : > { %6114 = vxpose.xlu0.b32.start [1/16] (narrow) %v6082_v0, 8  ;;  %v8562_v49 = vpop.f32.mrb[4].mxu1  ;;  %v6052_v14 = vadd.f32 %v11160_v53, %v6013_v59 }
 0x642   : > { %v5833_v51 = vpop.f32.mrb[5].mxu1  ;;  %v6016_v42 = vmul.f32 %v8562_v49, %v11155_v48  ;;  %v6085_v32 = vmax.f32 %v6053_v29, 0.0 }
 0x643   : > { %v6015_v31 = vmul.f32 %v11155_v48, %v5833_v51  ;;  %v6084_v55 = vmax.f32 %v6052_v14, 0.0 }
 0x644   : > { %v6055_v19 = vadd.f32 %v11160_v53, %v6016_v42 }
 0x645   : > { %6115 = vxpose.xlu0.b32.cont [2/16] (narrow) %v6083_v52, 8  ;;  %v8565_v58 = vpop.f32.mrb[6].mxu1  ;;  %v6054_v33 = vadd.f32 %v11160_v53, %v6015_v31 }
 0x646   : > { %v5843_v20 = vpop.f32.mrb[7].mxu1  ;;  %v6018_v34 = vmul.f32 %v8565_v58, %v11155_v48  ;;  %v6087_v38 = vmax.f32 %v6055_v19, 0.0 }
 0x647   : > { %v6017_v26 = vmul.f32 %v11155_v48, %v5843_v20  ;;  %v6086_v56 = vmax.f32 %v6054_v33, 0.0 }
 0x648   : > { %v6057_v15 = vadd.f32 %v11160_v53, %v6018_v34 }
 0x649   : > { %6116 = vxpose.xlu0.b32.cont [3/16] (narrow) %v6084_v55, 8  ;;  %v8568_v62 = vpop.f32.mrb[8].mxu1  ;;  %v6056_v27 = vadd.f32 %v11160_v53, %v6017_v26 }
 0x64a   : > { %v5853_v13 = vpop.f32.mrb[9].mxu1  ;;  %v6020_v22 = vmul.f32 %v8568_v62, %v11155_v48  ;;  %v6089_v2 = vmax.f32 %v6057_v15, 0.0 }
 0x64b   : > { %v6019_v9 = vmul.f32 %v11155_v48, %v5853_v13  ;;  %v6088_v6 = vmax.f32 %v6056_v27, 0.0 }
 0x64c   : > { %v6059_v35 = vadd.f32 %v11160_v53, %v6020_v22 }
 0x64d   : > { %6117 = vxpose.xlu0.b32.cont [4/16] (narrow) %v6085_v32, 8  ;;  %v8571_v7 = vpop.f32.mrb[10].mxu1  ;;  %v6058_v5 = vadd.f32 %v11160_v53, %v6019_v9 }
 0x64e   : > { %v5863_v36 = vpop.f32.mrb[11].mxu1  ;;  %v6022_v8 = vmul.f32 %v8571_v7, %v11155_v48  ;;  %v6091_v3 = vmax.f32 %v6059_v35, 0.0 }
 0x64f   : > { %v6021_v21 = vmul.f32 %v11155_v48, %v5863_v36  ;;  %v6090_v43 = vmax.f32 %v6058_v5, 0.0 }
 0x650   : > { %v6061_v16 = vadd.f32 %v11160_v53, %v6022_v8 }
 0x651   : > { %6118 = vxpose.xlu0.b32.cont [5/16] (narrow) %v6086_v56, 8  ;;  %v8574_v17 = vpop.f32.mrb[12].mxu1  ;;  %v6060_v37 = vadd.f32 %v11160_v53, %v6021_v21 }
 0x652   : > { %v5873_v47 = vpop.f32.mrb[13].mxu1  ;;  %v6024_v51 = vmul.f32 %v8574_v17, %v11155_v48  ;;  %v6093_v14 = vmax.f32 %v6061_v16, 0.0 }
 0x653   : > { %v6023_v46 = vmul.f32 %v11155_v48, %v5873_v47  ;;  %v6092_v59 = vmax.f32 %v6060_v37, 0.0 }
 0x654   : > { %v6063_v26 = vadd.f32 %v11160_v53, %v6024_v51 }
 0x655   : > { %6119 = vxpose.xlu0.b32.cont [6/16] (narrow) %v6087_v38, 8  ;;  %v11177_v24 = vpop.f32.mrb[14].mxu1  ;;  %v6062_v58 = vadd.f32 %v11160_v53, %v6023_v46 }
 0x656   : > { %v5883_v63 = vpop.f32.mrb[15].mxu1  ;;  %v6095_v15 = vmax.f32 %v6063_v26, 0.0 }
 0x657   : > { %v6025_v32 = vmul.f32 %v11155_v48, %v5883_v63  ;;  %v6094_v36 = vmax.f32 %v6062_v58, 0.0  ;;  %v6026_v63 = vmul.f32 %v11177_v24, %v11155_v48 }
 0x659   : > { %6120 = vxpose.xlu0.b32.cont [7/16] (narrow) %v6088_v6, 8  ;;  %v8580_v18 = vpop.f32.mrb[16].mxu1  ;;  %v6065_v21 = vadd.f32 %v11160_v53, %v6026_v63 }
 0x65a   : > { %v5893_v54 = vpop.f32.mrb[17].mxu1  ;;  %v6028_v60 = vmul.f32 %v8580_v18, %v11155_v48  ;;  %v6064_v18 = vadd.f32 %v11160_v53, %v6025_v32 }
 0x65b   : > { %v6027_v61 = vmul.f32 %v11155_v48, %v5893_v54 }
 0x65c   : > { %v6067_v39 = vadd.f32 %v11160_v53, %v6028_v60  ;;  %v6096_v35 = vmax.f32 %v6064_v18, 0.0 }
 0x65d   : > { %6121 = vxpose.xlu0.b32.cont [8/16] (narrow) %v6089_v2, 8  ;;  %v8583_v10 = vpop.f32.mrb[18].mxu1  ;;  %v6066_v11 = vadd.f32 %v11160_v53, %v6027_v61 }
 0x65e   : > { %v5903_v30 = vpop.f32.mrb[19].mxu1  ;;  %v6030_v57 = vmul.f32 %v8583_v10, %v11155_v48  ;;  %v6099_v23 = vmax.f32 %v6067_v39, 0.0 }
 0x65f   : > { %v6029_v44 = vmul.f32 %v11155_v48, %v5903_v30  ;;  %v6098_v4 = vmax.f32 %v6066_v11, 0.0 }
 0x660   : > { %v6069_v12 = vadd.f32 %v11160_v53, %v6030_v57 }
 0x661   : > { %6122 = vxpose.xlu0.b32.cont [9/16] (narrow) %v6090_v43, 8  ;;  %6146 = vxpose.xlu1.b32.start [1/16] (narrow) %v6098_v4, 8  ;;  %v8586_v45 = vpop.f32.mrb[20].mxu1  ;;  %v6068_v40 = vadd.f32 %v11160_v53, %v6029_v44 }
 0x662   : > { %v5913_v41 = vpop.f32.mrb[21].mxu1  ;;  %v6032_v20 = vmul.f32 %v8586_v45, %v11155_v48  ;;  %v6101_v55 = vmax.f32 %v6069_v12, 0.0  ;;  %v6097_v45 = vmax.f32 %v6065_v21, 0.0 }
 0x663   : > { %v6031_v25 = vmul.f32 %v11155_v48, %v5913_v41  ;;  %v6100_v0 = vmax.f32 %v6068_v40, 0.0 }
 0x664   : > { %v6071_v47 = vadd.f32 %v11160_v53, %v6032_v20 }
 0x665   : > { %6123 = vxpose.xlu0.b32.cont [10/16] (narrow) %v6091_v3, 8  ;;  %6147 = vxpose.xlu1.b32.cont [2/16] (narrow) %v6099_v23, 8  ;;  %v8589_v28 = vpop.f32.mrb[22].mxu1  ;;  %v6070_v29 = vadd.f32 %v11160_v53, %v6031_v25 }
 0x666   : > { %v5923_v1 = vpop.f32.mrb[23].mxu1  ;;  %v6034_v22 = vmul.f32 %v8589_v28, %v11155_v48  ;;  %v6103_v60 = vmax.f32 %v6071_v47, 0.0 }
 0x667   : > { %v6033_v56 = vmul.f32 %v11155_v48, %v5923_v1  ;;  %v6102_v17 = vmax.f32 %v6070_v29, 0.0 }
 0x668   : > { %v6073_v43 = vadd.f32 %v11160_v53, %v6034_v22 }
 0x669   : > { %6124 = vxpose.xlu0.b32.cont [11/16] (narrow) %v6092_v59, 8  ;;  %6148 = vxpose.xlu1.b32.cont [3/16] (narrow) %v6100_v0, 8  ;;  %v8592_v49 = vpop.f32.mrb[24].mxu1  ;;  %v6072_v61 = vadd.f32 %v11160_v53, %v6033_v56 }
 0x66a   : > { %v6036_v50 = vmul.f32 %v8592_v49, %v11155_v48  ;;  %v5933_v52 = vpop.f32.mrb[25].mxu1  ;;  %v6105_v8 = vmax.f32 %v6073_v43, 0.0 }
 0x66b   : > { %v6035_v31 = vmul.f32 %v11155_v48, %v5933_v52  ;;  %v6104_v44 = vmax.f32 %v6072_v61, 0.0 }
 0x66c   : > { %v6075_v62 = vadd.f32 %v11160_v53, %v6036_v50 }
 0x66d   : > { %6125 = vxpose.xlu0.b32.cont [12/16] (narrow) %v6093_v14, 8  ;;  %6149 = vxpose.xlu1.b32.cont [4/16] (narrow) %v6101_v55, 8  ;;  %v8595_v13 = vpop.f32.mrb[26].mxu1  ;;  %v6074_v42 = vadd.f32 %v11160_v53, %v6035_v31 }
 0x66e   : > { %v6038_v33 = vmul.f32 %v8595_v13, %v11155_v48  ;;  %v5943_v7 = vpop.f32.mrb[27].mxu1  ;;  %v6107_v3 = vmax.f32 %v6075_v62, 0.0 }
 0x66f   : > { %v6037_v19 = vmul.f32 %v11155_v48, %v5943_v7  ;;  %v6106_v41 = vmax.f32 %v6074_v42, 0.0 }
 0x670   : > { %v6077_v34 = vadd.f32 %v11160_v53, %v6038_v33 }
 0x671   : > { %6126 = vxpose.xlu0.b32.cont [13/16] (narrow) %v6094_v36, 8  ;;  %6150 = vxpose.xlu1.b32.cont [5/16] (narrow) %v6102_v17, 8  ;;  %v8598_v38 = vpop.f32.mrb[28].mxu1  ;;  %v6076_v27 = vadd.f32 %v11160_v53, %v6037_v19 }
 0x672   : > { %v6040_v9 = vmul.f32 %v8598_v38, %v11155_v48  ;;  %v5953_v6 = vpop.f32.mrb[29].mxu1  ;;  %v6109_v57 = vmax.f32 %v6077_v34, 0.0 }
 0x673   : > { %v6039_v54 = vmul.f32 %v11155_v48, %v5953_v6 }
 0x674   : > { %v6079_v2 = vadd.f32 %v11160_v53, %v6040_v9 }
 0x675   : > { %6127 = vxpose.xlu0.b32.cont [14/16] (narrow) %v6095_v15, 8  ;;  %6151 = vxpose.xlu1.b32.cont [6/16] (narrow) %v6103_v60, 8  ;;  %v8601_v5 = vpop.f32.mrb[30].mxu1  ;;  %v6078_v24 = vadd.f32 %v11160_v53, %v6039_v54 }
 0x676   : > { %v6042_v10 = vmul.f32 %v8601_v5, %v11155_v48  ;;  %v5963_v11 = vpop.f32.mrb[31].mxu1  ;;  %v6111_v37 = vmax.f32 %v6079_v2, 0.0 }
 0x677   : > { %v6041_v30 = vmul.f32 %v11155_v48, %v5963_v11  ;;  %v6108_v48 = vmax.f32 %v6076_v27, 0.0  ;;  %v6110_v23 = vmax.f32 %v6078_v24, 0.0 }
 0x678   : > { %v6081_v4 = vadd.f32 %v11160_v53, %v6042_v10 }
 0x679   : > { %6128 = vxpose.xlu0.b32.cont [15/16] (narrow) %v6096_v35, 8  ;;  %6152 = vxpose.xlu1.b32.cont [7/16] (narrow) %v6104_v44, 8  ;;  %v6080_v39 = vadd.f32 %v11160_v53, %v6041_v30 }
 0x67a   : > { %v6113_v53 = vmax.f32 %v6081_v4, 0.0 }
 0x67b   : > { %v6112_v40 = vmax.f32 %v6080_v39, 0.0 }
 0x67d   : > { %6129 = vxpose.xlu0.b32.end [16/16] (narrow) %v6097_v45, 8  ;;  %6153 = vxpose.xlu1.b32.cont [8/16] (narrow) %v6105_v8, 8 }
 0x681   : > { %6154 = vxpose.xlu1.b32.cont [9/16] (narrow) %v6106_v41, 8 }
 0x685   : > { %6155 = vxpose.xlu1.b32.cont [10/16] (narrow) %v6107_v3, 8 }
 0x689   : > { %6156 = vxpose.xlu1.b32.cont [11/16] (narrow) %v6108_v48, 8 }
 0x68d   : > { %6157 = vxpose.xlu1.b32.cont [12/16] (narrow) %v6109_v57, 8 }
 0x691   : > { %6158 = vxpose.xlu1.b32.cont [13/16] (narrow) %v6110_v23, 8 }
 0x695   : > { %6159 = vxpose.xlu1.b32.cont [14/16] (narrow) %v6111_v37, 8 }
 0x699   : > { %6160 = vxpose.xlu1.b32.cont [15/16] (narrow) %v6112_v40, 8 }
 0x69d   : > { %6161 = vxpose.xlu1.b32.end [16/16] (narrow) %v6113_v53, 8 }
 0x6c1   : > { %v6130_v28 = vpop.trf.xlu0 }
 0x6c2   : > { %6178 = vst [vmem:[%s301_s13] sm:$0xff] %v6130_v28 }
 0x6e1   : > { %v6162_v46 = vpop.trf.xlu1 }
 0x6e2   : > { %6179 = vst [vmem:[%s301_s13 + $0x8] sm:$0xff] %v6162_v46 }
 0x6e3   : > { %9824 = shalt.err (!%p9821_p11)
}
 0x6e4   : > { %s9825_s8 = scalar_lea.hbm %s11236_s20, 256  ;;  %s9829_s10 = scalar_lea.hbm %s11283_s7, 512 }
 0x6e5   : > { %p9826_p13 = scmp.ne.s32.totalorder %s11236_s20, %s9825_s8  ;;  %p9830_p6 = scmp.lt.u32.totalorder %s11236_s20, %s11283_s7 }
 0x6e6   : > { %p9831_p9 = scmp.lt.u32.totalorder %s9829_s10, %s9825_s8  ;;  %p9833_p12 = scmp.lt.u32.totalorder %s9825_s8, %s11236_s20 }
 0x6e7   : > { %p9827_p5 = pnand %p9826_p13, %p11511_p1 }
 0x6e8   : > { %p9832_p10 = por %p9831_p9, %p9830_p6 }
 0x6e9   : > { %p9828_p0 = pneg %p9827_p5 }
 0x6ea   : > { %p9834_p2 = por %p9833_p12, %p9832_p10 }
 0x6ec   : > { %p9835_p3 = pnand %p9834_p2, %p9828_p0 }
 0x6ee   : > { %9838 = shalt.err (!%p9835_p3)
}
 0x6ef   : > { %9698 = dma.vmem_to_hbm [thread:$0]  (%p11511_p1), %s11231_s16, 256, %s11236_s20, %s6181_s21  }
 0x6f0 PF: > { %p9715_p4 = scmp.ge.s32.totalorder %s9881_s27, 2  ;;  %s6207_s18 = sand.u32 1, %s9869_s24  }
 0x6f1   : > { %p11512_p7 = scmp.ne.s32.totalorder %s11361_s12, 0  ;;  %s6208_s14 = scalar_lea.sflag [#allocation6], %s6207_s18 }
 0x6f3   : > { %p9708_p8 = pnand %p9715_p4, %p11512_p7 }
 0x6f5   : > { %9864 = dma.done.wait (!%p9708_p8), %s6208_s14, 256  }
 0x6f6   : > { %9866 = vsyncadd (!%p9708_p8), %s6208_s14, 4294967040  ;;  %s11513_s17 = sld [smem:[#allocation13_spill]]  ;;  %p19_p11 = scmp.ge.s32.totalorder %s9954_s30, 4  }
 0x6f7   : > { %s11514_s24 = smov %s9873_s25  ;;  %s11515_s25 = smov %s9877_s26 }
 0x6f8   : > { %s11517_s27 = smov %s9954_s30  ;;  %21 = sbr.rel (!%p19_p11) target bundleno = 5 (0x5), region = 112 }
 0x6fc   : > { %s11516_s26 = smov %s11513_s17 }
 0x6ff   :  { %6213 = vsyncpa [#allocation5], 1 }
 0x700   :  { %6215 = vsyncpa [#allocation5 + $0x1], 1 }
 0x701   :  { %6216 = vsyncpa [#allocation8], 1 }
 0x702   :  { %6217 = vsyncpa [#allocation6], 1 }
 0x703   :  { %6219 = vsyncpa [#allocation6 + $0x1], 1 }

</bundles_post_ra>
